<compile_context>
chip_gen: v7x
topology: tpu7x:2x2x1
jax: 0.10.0
libtpu: 0.0.40
codegen_flags: <defaults>
</compile_context>

<pallas_src>
from math import sqrt

import jax
import jax.numpy as jnp
from jax.experimental import pallas as pl
from jax.experimental.pallas import tpu as pltpu

DELTA = 1e-6  # the constant referenced (but not defined) in the original file


def _attn_type2_kernel(feat_ref, hv_ref, pehv_ref, mask_ref, idx_ref,
                       resf_ref, a_ref, alpha_ref):
    # feat_ref : (Bt, Lp, Fp) native dtype    hv_ref   : (Bt, Fp) f32
    # pehv_ref : (Bt, Pp) f32                 mask_ref : (Bt, Lp) f32
    # idx_ref  : (Bt, Lp) int32
    # resf_ref : (Bt, Fp) f32   a_ref : (Bt, Pp) f32   alpha_ref : (Bt, Lp) f32
    Pp = pehv_ref.shape[-1]

    feat = feat_ref[...]                                   # stays in native dtype
    hv = hv_ref[...]
    pe_hv = pehv_ref[...]
    mask = mask_ref[...]
    pe_idx = idx_ref[...]

    # one-hot over the (padded) PE axis: (1,1,Pp) iota broadcast-compare, bf16 (0/1 exact).
    lane_p = jax.lax.broadcasted_iota(jnp.int32, (1, 1, Pp), 2)
    one_hot = (lane_p == pe_idx[:, :, None]).astype(jnp.bfloat16)      # (Bt, Lp, Pp)

    # scores: (feat + PE[idx]) . hv  ==  feat.hv + pe_hv[b, idx]
    score_f = jnp.sum(feat * hv[:, None, :], axis=-1)                  # (Bt, Lp) f32
    score_p = jnp.sum(one_hot * pe_hv[:, None, :], axis=-1)            # (Bt, Lp) f32
    scores = score_f + score_p

    # mask + softmax over (padded) length; large finite negative avoids -inf NaNs on
    # fully-masked / padded rows.
    scores = jnp.where(mask != 0, scores, jnp.float32(-1e30))
    m = jnp.max(scores, axis=-1, keepdims=True)
    e = jnp.exp(scores - m)
    denom = jnp.sum(e, axis=-1, keepdims=True)                         # (Bt, 1)
    alpha = e * pl.reciprocal(denom, approx=False)                     # (Bt, Lp)

    # res decomposition: res = sum_l alpha*feat  +  (sum_l alpha*one_hot) @ PE
    resf_ref[...] = jnp.sum(alpha[:, :, None] * feat, axis=1).astype(resf_ref.dtype)
    a_ref[...] = jnp.sum(alpha[:, :, None] * one_hot, axis=1).astype(a_ref.dtype)
    alpha_ref[...] = alpha


def _round_up(x, m):
    return ((x + m - 1) // m) * m


def _vmem_capacity_bytes():
    try:
        return int(pltpu.get_tpu_info().vmem_capacity_bytes)
    except Exception:
        return 64 << 20            # conservative fallback: v7x per-TensorCore VMEM


def _per_row_vmem_bytes(Lp, Fp, Pp, feat_itemsize):
    """Approximate per-batch-row VMEM working set of one grid step."""
    return (
        2 * Lp * Fp * feat_itemsize           # feature block (double-buffered input)
        + Lp * Fp * 4                         # feat*hv / alpha*feat product slab (f32)
        + Lp * Pp * 2                         # bf16 one-hot (live across both uses)
        + 2 * Lp * Pp * 4                     # one_hot*pe_hv and alpha*one_hot products
        + 2 * 4 * (2 * Fp + 2 * Pp + 3 * Lp)  # hv/res_f, pe_hv/A, mask/idx/alpha streams
        + 8 * Lp * 4                          # scores / exp / misc (Bt, Lp) vectors
    )


def _auto_block_b(B, Lp, Fp, Pp, feat_itemsize, vmem_cap):
    """Largest sublane-multiple batch tile whose working set fits ~half of VMEM,
    keeping >=2 grid steps when B allows so both v7x TensorCores get work."""
    per_row = _per_row_vmem_bytes(Lp, Fp, Pp, feat_itemsize)
    budget = vmem_cap // 2 - (2 << 20)        # headroom for compiler scratch / regalloc
    b8 = _round_up(max(B, 1), 8)
    bt = max(8, min(256, (budget // max(per_row, 1)) // 8 * 8))
    bt = min(bt, b8)
    if b8 >= 16:                              # guarantee >=2 grid steps (megacore)
        bt = min(bt, _round_up(pl.cdiv(b8, 2), 8))
    return int(bt)


def attention_type2(feature, hidden, mask, w, pe_table, *, block_b=None):
    """feature: (B,L,F) (any float dtype), hidden: (B,H), mask: (B,L,1),
       w: (H,F) linear weight (no bias), pe_table: (P,F).
       Returns (res: (B,F) f32, alpha: (B,L) f32)."""
    B, L, F = feature.shape
    H = w.shape[0]
    P = pe_table.shape[0]
    f32 = jnp.float32

    # Lane-dense padding of last dims (no-op when production shapes already comply).
    Lp, Fp, Pp = _round_up(L, 128), _round_up(F, 128), _round_up(P, 128)

    mask2 = mask.reshape(B, L).astype(f32)
    seq_len = jnp.sum(mask2, axis=1, keepdims=True)                    # (B, 1)

    # PE index math hoisted to the wrapper (identical formula to the module).
    pos = jnp.arange(Lp, dtype=f32)[None, :]
    frac = jnp.minimum(pos / (seq_len + DELTA), 1.0 - DELTA)
    pe_idx = jnp.clip((frac * P).astype(jnp.int32), 0, P - 1)          # (B, Lp) int32

    # Zero-pad to lane-dense shapes; padded L positions stay masked, padded F/P
    # columns are zero and drop out of every contraction.
    featp = jnp.pad(feature, ((0, 0), (0, Lp - L), (0, Fp - F)))       # native dtype
    maskp = jnp.pad(mask2, ((0, 0), (0, Lp - L)))
    wp = jnp.pad(w.astype(f32), ((0, 0), (0, Fp - F)))                 # (H, Fp)
    pep = jnp.pad(pe_table.astype(f32), ((0, Pp - P), (0, Fp - F)))    # (Pp, Fp)

    # Hoisted projections (two small batched MXU matmuls); 1/sqrt(H) folded into hv.
    # HIGHEST keeps f32 parity with the PyTorch module when inputs are f32; bf16
    # inputs take the cheap native MXU path (relevant on v5e).
    prec = (jax.lax.Precision.HIGHEST if hidden.dtype == jnp.float32
            else jax.lax.Precision.DEFAULT)
    hv = jnp.dot(hidden.astype(f32), wp, precision=prec) / jnp.float32(sqrt(H))  # (B, Fp)
    pe_hv = jnp.dot(hv, pep.T, precision=prec)                                   # (B, Pp)

    # Batch tiling sized against the real VMEM capacity of this generation.
    vmem_cap = _vmem_capacity_bytes()
    if block_b is not None:
        Bt = min(_round_up(int(block_b), 8), _round_up(max(B, 1), 8))
    else:
        Bt = _auto_block_b(B, Lp, Fp, Pp, featp.dtype.itemsize, vmem_cap)
    n_blocks = pl.cdiv(max(B, 1), Bt)
    B_pad = n_blocks * Bt
    if B_pad != B:
        pad = B_pad - B
        featp = jnp.pad(featp, ((0, pad), (0, 0), (0, 0)))
        hv = jnp.pad(hv, ((0, pad), (0, 0)))
        pe_hv = jnp.pad(pe_hv, ((0, pad), (0, 0)))
        maskp = jnp.pad(maskp, ((0, pad), (0, 0)))                     # fully masked rows
        pe_idx = jnp.pad(pe_idx, ((0, pad), (0, 0)))

    est = Bt * _per_row_vmem_bytes(Lp, Fp, Pp, featp.dtype.itemsize) + (2 << 20)
    vmem_limit = int(min(int(vmem_cap * 0.9), max(32 << 20, 2 * est)))

    res_f, a_mat, alpha_p = pl.pallas_call(
        _attn_type2_kernel,
        grid=(n_blocks,),
        in_specs=[
            pl.BlockSpec((Bt, Lp, Fp), lambda b: (b, 0, 0)),   # feature (native dtype)
            pl.BlockSpec((Bt, Fp), lambda b: (b, 0)),          # hv = hidden @ W / sqrt(H)
            pl.BlockSpec((Bt, Pp), lambda b: (b, 0)),          # pe_hv = hv @ PE.T
            pl.BlockSpec((Bt, Lp), lambda b: (b, 0)),          # mask
            pl.BlockSpec((Bt, Lp), lambda b: (b, 0)),          # pe_idx (int32)
        ],
        out_specs=[
            pl.BlockSpec((Bt, Fp), lambda b: (b, 0)),          # res_feat (lane-dense)
            pl.BlockSpec((Bt, Pp), lambda b: (b, 0)),          # A = sum_l alpha*one_hot
            pl.BlockSpec((Bt, Lp), lambda b: (b, 0)),          # alpha
        ],
        out_shape=[
            jax.ShapeDtypeStruct((B_pad, Fp), f32),
            jax.ShapeDtypeStruct((B_pad, Pp), f32),
            jax.ShapeDtypeStruct((B_pad, Lp), f32),
        ],
        compiler_params=pltpu.CompilerParams(
            dimension_semantics=("parallel",),
            vmem_limit_bytes=vmem_limit),
    )(featp, hv, pe_hv, maskp, pe_idx)

    # Tiny epilogue: PE contribution to res as one (B,P)@(P,F) matmul in full f32;
    # O(B*P*F), negligible next to the O(B*L*F) feature stream.
    res = res_f + jnp.dot(a_mat, pep, precision=prec)
    return res[:B, :F], alpha_p[:B, :L]


def _reference(feature, hidden, mask, w, pe_table):
    """Pure-JAX transcription of AttentionType2._forward_pe."""
    B, L, F = feature.shape
    H = w.shape[0]
    P = pe_table.shape[0]
    seq_len = mask.sum(1)                                    # (B, 1)
    pe_index = jnp.arange(L, dtype=jnp.float32)[None, :] / (seq_len + DELTA)
    pe_index = jnp.minimum(pe_index, 1.0 - DELTA)
    pe_index = (pe_index * P).astype(jnp.int32)              # (B, L)
    feat = feature + pe_table[pe_index]                      # (B, L, F)
    alpha = jnp.einsum("blf,hf->blh", feat, w,
                       precision=jax.lax.Precision.HIGHEST)
    alpha = alpha * hidden[:, None, :]
    alpha = alpha.sum(2, keepdims=True) / sqrt(H)            # (B, L, 1)
    alpha = alpha + jnp.where(mask == 0, -jnp.inf, 0.0)
    alpha = jax.nn.softmax(alpha, axis=1)
    res = (alpha * feat).sum(1)                              # (B, F)
    return res, alpha.squeeze(2)


if __name__ == "__main__":
    B, L, F, H, P = 2, 8, 32, 32, 100   # feature_dim=32, hidden_dim=32, pe_size=100

    key = jax.random.PRNGKey(0)
    k_feat, k_hid, k_w = jax.random.split(key, 3)

    feature = jax.random.normal(k_feat, (B, L, F), dtype=jnp.float32)
    hidden = jax.random.normal(k_hid, (B, H), dtype=jnp.float32)

    # variable-length mask, (B, L, 1) float like the PyTorch module expects
    seq_lens = jnp.array([L, 5], dtype=jnp.int32)
    mask = (jnp.arange(L)[None, :] < seq_lens[:, None]).astype(jnp.float32)[:, :, None]

    # deterministic parameter init: linear weight ~ N/sqrt(F), position embedding = eye
    # (matches nn.init.eye(self.position_embedding.weight))
    w = jax.random.normal(k_w, (H, F), dtype=jnp.float32) / sqrt(F)
    pe_table = jnp.eye(P, F, dtype=jnp.float32)

    res, alpha = attention_type2(feature, hidden, mask, w, pe_table)
    jax.block_until_ready((res, alpha))

    res_ref, alpha_ref = _reference(feature, hidden, mask, w, pe_table)
    assert jnp.allclose(res, res_ref, atol=1e-5, rtol=1e-5), "res mismatch"
    assert jnp.allclose(alpha, alpha_ref, atol=1e-5, rtol=1e-5), "alpha mismatch"

    print("KERNEL_OK")
</pallas_src>

<mosaic_0001>
module attributes {stable_mosaic.version = 11 : i64} {
  func.func @_attn_type2_kernel(%arg0: i32, %arg1: memref<8x128x128xf32, #tpu.memory_space<vmem>>, %arg2: memref<8x128xf32, #tpu.memory_space<vmem>>, %arg3: memref<8x128xf32, #tpu.memory_space<vmem>>, %arg4: memref<8x128xf32, #tpu.memory_space<vmem>>, %arg5: memref<8x128xi32, #tpu.memory_space<vmem>>, %arg6: memref<8x128xf32, #tpu.memory_space<vmem>>, %arg7: memref<8x128xf32, #tpu.memory_space<vmem>>, %arg8: memref<8x128xf32, #tpu.memory_space<vmem>>) attributes {dimension_semantics = [#tpu.dimension_semantics<parallel>], iteration_bounds = array<i64: 1>, scalar_prefetch = 0 : i64, scratch_operands = 0 : i64, tpu.core_type = #tpu.core_type<tc>, window_params = [{transform_indices = @transform_0, window_bounds = array<i64: 8, 128, 128>}, {transform_indices = @transform_1, window_bounds = array<i64: 8, 128>}, {transform_indices = @transform_2, window_bounds = array<i64: 8, 128>}, {transform_indices = @transform_3, window_bounds = array<i64: 8, 128>}, {transform_indices = @transform_4, window_bounds = array<i64: 8, 128>}, {transform_indices = @transform_5, window_bounds = array<i64: 8, 128>}, {transform_indices = @transform_6, window_bounds = array<i64: 8, 128>}, {transform_indices = @transform_7, window_bounds = array<i64: 8, 128>}]} {
    %c0 = arith.constant 0 : index
    %c0_0 = arith.constant 0 : index
    %c0_1 = arith.constant 0 : index
    %0 = vector.load %arg1[%c0, %c0_0, %c0_1] : memref<8x128x128xf32, #tpu.memory_space<vmem>>, vector<8x128x128xf32>
    %c0_2 = arith.constant 0 : index
    %c0_3 = arith.constant 0 : index
    %1 = vector.load %arg2[%c0_2, %c0_3] : memref<8x128xf32, #tpu.memory_space<vmem>>, vector<8x128xf32>
    %c0_4 = arith.constant 0 : index
    %c0_5 = arith.constant 0 : index
    %2 = vector.load %arg3[%c0_4, %c0_5] : memref<8x128xf32, #tpu.memory_space<vmem>>, vector<8x128xf32>
    %c0_6 = arith.constant 0 : index
    %c0_7 = arith.constant 0 : index
    %3 = vector.load %arg4[%c0_6, %c0_7] : memref<8x128xf32, #tpu.memory_space<vmem>>, vector<8x128xf32>
    %c0_8 = arith.constant 0 : index
    %c0_9 = arith.constant 0 : index
    %4 = vector.load %arg5[%c0_8, %c0_9] : memref<8x128xi32, #tpu.memory_space<vmem>>, vector<8x128xi32>
    %5 = tpu.iota {dimensions = array<i32: 2>} : vector<1x1x128xi32>
    %6 = vector.shape_cast %4 : vector<8x128xi32> to vector<8x128x1xi32>
    %7 = vector.broadcast %5 : vector<1x1x128xi32> to vector<8x128x128xi32>
    %8 = vector.broadcast %6 : vector<8x128x1xi32> to vector<8x128x128xi32>
    %9 = arith.cmpi eq, %7, %8 : vector<8x128x128xi32>
    %10 = arith.extui %9 : vector<8x128x128xi1> to vector<8x128x128xi32>
    %11 = arith.sitofp %10 : vector<8x128x128xi32> to vector<8x128x128xf32>
    %12 = arith.truncf %11 : vector<8x128x128xf32> to vector<8x128x128xbf16>
    %13 = vector.shape_cast %1 : vector<8x128xf32> to vector<8x1x128xf32>
    %14 = vector.broadcast %13 : vector<8x1x128xf32> to vector<8x128x128xf32>
    %15 = arith.mulf %0, %14 : vector<8x128x128xf32>
    %cst = arith.constant dense<0.000000e+00> : vector<8x128xf32>
    %16 = vector.multi_reduction <add>, %15, %cst [2] : vector<8x128x128xf32> to vector<8x128xf32>
    %17 = vector.shape_cast %2 : vector<8x128xf32> to vector<8x1x128xf32>
    %18 = arith.extf %12 : vector<8x128x128xbf16> to vector<8x128x128xf32>
    %19 = vector.broadcast %17 : vector<8x1x128xf32> to vector<8x128x128xf32>
    %20 = arith.mulf %18, %19 : vector<8x128x128xf32>
    %cst_10 = arith.constant dense<0.000000e+00> : vector<8x128xf32>
    %21 = vector.multi_reduction <add>, %20, %cst_10 [2] : vector<8x128x128xf32> to vector<8x128xf32>
    %22 = arith.addf %16, %21 : vector<8x128xf32>
    %cst_11 = arith.constant 0.000000e+00 : f32
    %23 = vector.broadcast %cst_11 : f32 to vector<8x128xf32>
    %24 = arith.cmpf one, %3, %23 : vector<8x128xf32>
    %cst_12 = arith.constant -1.000000e+30 : f32
    %25 = vector.broadcast %cst_12 : f32 to vector<8x128xf32>
    %26 = arith.select %24, %22, %25 : vector<8x128xi1>, vector<8x128xf32>
    %cst_13 = arith.constant dense<0xFF800000> : vector<8xf32>
    %27 = vector.multi_reduction <maximumf>, %26, %cst_13 [1] : vector<8x128xf32> to vector<8xf32>
    %28 = vector.shape_cast %27 : vector<8xf32> to vector<8x1xf32>
    %29 = vector.broadcast %28 : vector<8x1xf32> to vector<8x128xf32>
    %30 = arith.subf %26, %29 : vector<8x128xf32>
    %31 = math.exp %30 : vector<8x128xf32>
    %cst_14 = arith.constant dense<0.000000e+00> : vector<8xf32>
    %32 = vector.multi_reduction <add>, %31, %cst_14 [1] : vector<8x128xf32> to vector<8xf32>
    %33 = vector.shape_cast %32 : vector<8xf32> to vector<8x1xf32>
    %34 = tpu.reciprocal %33 : vector<8x1xf32> -> vector<8x1xf32>
    %35 = vector.broadcast %34 : vector<8x1xf32> to vector<8x128xf32>
    %36 = arith.mulf %31, %35 : vector<8x128xf32>
    %37 = vector.shape_cast %36 : vector<8x128xf32> to vector<8x128x1xf32>
    %38 = vector.broadcast %37 : vector<8x128x1xf32> to vector<8x128x128xf32>
    %39 = arith.mulf %38, %0 : vector<8x128x128xf32>
    %cst_15 = arith.constant dense<0.000000e+00> : vector<8x128xf32>
    %40 = vector.multi_reduction <add>, %39, %cst_15 [1] : vector<8x128x128xf32> to vector<8x128xf32>
    %c0_16 = arith.constant 0 : index
    %c0_17 = arith.constant 0 : index
    %41 = vector.load %arg6[%c0_16, %c0_17] : memref<8x128xf32, #tpu.memory_space<vmem>>, vector<8x128xf32>
    tpu.vector_store %arg6[%c0_16, %c0_17], %40 {strides = array<i32>} : memref<8x128xf32, #tpu.memory_space<vmem>>, vector<8x128xf32>,
    %42 = vector.shape_cast %36 : vector<8x128xf32> to vector<8x128x1xf32>
    %43 = arith.extf %12 : vector<8x128x128xbf16> to vector<8x128x128xf32>
    %44 = vector.broadcast %42 : vector<8x128x1xf32> to vector<8x128x128xf32>
    %45 = arith.mulf %44, %43 : vector<8x128x128xf32>
    %cst_18 = arith.constant dense<0.000000e+00> : vector<8x128xf32>
    %46 = vector.multi_reduction <add>, %45, %cst_18 [1] : vector<8x128x128xf32> to vector<8x128xf32>
    %c0_19 = arith.constant 0 : index
    %c0_20 = arith.constant 0 : index
    %47 = vector.load %arg7[%c0_19, %c0_20] : memref<8x128xf32, #tpu.memory_space<vmem>>, vector<8x128xf32>
    tpu.vector_store %arg7[%c0_19, %c0_20], %46 {strides = array<i32>} : memref<8x128xf32, #tpu.memory_space<vmem>>, vector<8x128xf32>,
    %c0_21 = arith.constant 0 : index
    %c0_22 = arith.constant 0 : index
    %48 = vector.load %arg8[%c0_21, %c0_22] : memref<8x128xf32, #tpu.memory_space<vmem>>, vector<8x128xf32>
    tpu.vector_store %arg8[%c0_21, %c0_22], %36 {strides = array<i32>} : memref<8x128xf32, #tpu.memory_space<vmem>>, vector<8x128xf32>,
    return
  }
  func.func @transform_0(%arg0: i32) -> (i32, i32, i32) {
    %c0_i32 = arith.constant 0 : i32
    %c0_i32_0 = arith.constant 0 : i32
    %c0_i32_1 = arith.constant 0 : i32
    return %arg0, %c0_i32, %c0_i32_0 : i32, i32, i32
  }
  func.func @transform_1(%arg0: i32) -> (i32, i32) {
    %c0_i32 = arith.constant 0 : i32
    %c0_i32_0 = arith.constant 0 : i32
    return %arg0, %c0_i32 : i32, i32
  }
  func.func @transform_2(%arg0: i32) -> (i32, i32) {
    %c0_i32 = arith.constant 0 : i32
    %c0_i32_0 = arith.constant 0 : i32
    return %arg0, %c0_i32 : i32, i32
  }
  func.func @transform_3(%arg0: i32) -> (i32, i32) {
    %c0_i32 = arith.constant 0 : i32
    %c0_i32_0 = arith.constant 0 : i32
    return %arg0, %c0_i32 : i32, i32
  }
  func.func @transform_4(%arg0: i32) -> (i32, i32) {
    %c0_i32 = arith.constant 0 : i32
    %c0_i32_0 = arith.constant 0 : i32
    return %arg0, %c0_i32 : i32, i32
  }
  func.func @transform_5(%arg0: i32) -> (i32, i32) {
    %c0_i32 = arith.constant 0 : i32
    %c0_i32_0 = arith.constant 0 : i32
    return %arg0, %c0_i32 : i32, i32
  }
  func.func @transform_6(%arg0: i32) -> (i32, i32) {
    %c0_i32 = arith.constant 0 : i32
    %c0_i32_0 = arith.constant 0 : i32
    return %arg0, %c0_i32 : i32, i32
  }
  func.func @transform_7(%arg0: i32) -> (i32, i32) {
    %c0_i32 = arith.constant 0 : i32
    %c0_i32_0 = arith.constant 0 : i32
    return %arg0, %c0_i32 : i32, i32
  }
}

</mosaic_0001>

<bundles_post_ra>
// kernel: tpu_custom_call.1
= control target key start
LH: loop header
LB: loop body
LE: loop exit
PB: predicated region body
PF: predicated region fallthrough
CT: control target
= control target key end

     0   :  { %13 = vsyncpa [#allocation3], 0  ;;  %s7833_s0 = inlined_call_operand.hbm [shape: f32[8,128,128], index: 0, kind: input, shape index: {}]   ;;  %s7834_s1 = inlined_call_operand.hbm [shape: f32[8,128], index: 1, kind: input, shape index: {}]   ;;  %s7835_s2 = inlined_call_operand.hbm [shape: f32[8,128], index: 2, kind: input, shape index: {}]   ;;  %s7836_s3 = inlined_call_operand.vmem [shape: f32[8,128], index: 3, kind: input, shape index: {}]   ;;  %s7837_s4 = inlined_call_operand.hbm [shape: s32[8,128], index: 4, kind: input, shape index: {}]   ;;  %s7838_s5 = inlined_call_operand.hbm [shape: f32[8,128], index: 5, kind: output, shape index: {0}]   ;;  %s7839_s6 = inlined_call_operand.hbm [shape: f32[8,128], index: 6, kind: output, shape index: {1}]   ;;  %s7840_s7 = inlined_call_operand.hbm [shape: f32[8,128], index: 7, kind: output, shape index: {2}]  }
   0x1   :  { %14 = vsyncpa [#allocation6], 0 }
   0x2   :  { %15 = vsyncpa [#allocation9], 0 }
   0x3   :  { %16 = vsyncpa [#allocation4], 0 }
   0x4   :  { %17 = vsyncpa [#allocation12], 0  ;;  %s4856_s24 = smov [#allocation5]   ;;  %s4857_s26 = smov [#allocation2]  }
   0x5   :  { %s36_s25 = sshll.u32 %s4856_s24, 4  ;;  %s23_s27 = sshll.u32 %s4857_s26, 4  ;;  %s37_s25 = int_to_ptr.vmem [resolvable:$true] %s36_s25  ;;  %s4907_s27 = int_to_ptr.vmem [resolvable:$true] %s23_s27 }
   0x6   :  { %s4692_s30 = scalar_lea.hbm %s7834_s1, 128 }
   0x7   :  { %p4693_p0 = scmp.ne.s32.totalorder %s7834_s1, %s4692_s30  ;;  %p4696_p1 = scmp.lt.u32.totalorder %s4692_s30, %s7834_s1 }
   0x9   :  { %p4698_p2 = pnand %p4696_p1, %p4693_p0 }
   0xb   :  { %4701 = shalt.err (!%p4698_p2)
}
   0xc   :  { %s4702_s12 = scalar_lea.vmem %s37_s25, 128  ;;  %p4707_p4 = scmp.lt.s32.totalorder %s37_s25, %s37_s25 }
   0xd   :  { %p4703_p3 = scmp.ne.s32.totalorder %s37_s25, %s4702_s12  ;;  %p4708_p5 = scmp.lt.s32.totalorder %s4702_s12, %s4702_s12 }
   0xf   :  { %p4709_p6 = por %p4708_p5, %p4707_p4 }
  0x11   :  { %p4710_p7 = pnand %p4709_p6, %p4703_p3 }
  0x13   :  { %4713 = shalt.err (!%p4710_p7)
}
  0x14   :  { %39 = dma.hbm_to_vmem [thread:$0]  %s7834_s1, 128, %s37_s25, [#allocation6]  }
  0x15   :  { %s4714_s17 = scalar_lea.hbm %s7833_s0, 16384 }
  0x16   :  { %p4715_p8 = scmp.ne.s32.totalorder %s7833_s0, %s4714_s17  ;;  %p4718_p9 = scmp.lt.u32.totalorder %s4714_s17, %s7833_s0 }
  0x18   :  { %p4720_p10 = pnand %p4718_p9, %p4715_p8 }
  0x1a   :  { %4723 = shalt.err (!%p4720_p10)
}
  0x1b   :  { %s4724_s22 = scalar_lea.vmem %s4907_s27, 16384  ;;  %p4729_p12 = scmp.lt.s32.totalorder %s4907_s27, %s4907_s27 }
  0x1c   :  { %p4725_p11 = scmp.ne.s32.totalorder %s4907_s27, %s4724_s22  ;;  %p4730_p13 = scmp.lt.s32.totalorder %s4724_s22, %s4724_s22 }
  0x1e   :  { %p4731_p0 = por %p4730_p13, %p4729_p12 }
  0x20   :  { %p4732_p1 = pnand %p4731_p0, %p4725_p11 }
  0x22   :  { %4735 = shalt.err (!%p4732_p1)
}
  0x23   :  { %s4858_s1 = smov 128   ;;  %s4859_s23 = smov 8  }
  0x24   :  { %29 = dma.hbm_to_vmem [thread:$0]  %s7833_s0, 16384, %s4907_s27, [#allocation3], %s4858_s1, %s4858_s1, %s4859_s23  }
  0x25   :  { %s4860_s26 = smov [#allocation7]   ;;  %s4861_s29 = smov [#allocation8]  }
  0x26   :  { %s46_s28 = sshll.u32 %s4860_s26, 4  ;;  %s58_s30 = sshll.u32 %s4861_s29, 4  ;;  %s47_s28 = int_to_ptr.vmem [resolvable:$true] %s46_s28  ;;  %s59_s30 = int_to_ptr.vmem [resolvable:$true] %s58_s30 }
  0x27   :  { %s4736_s10 = scalar_lea.hbm %s7835_s2, 128 }
  0x28   :  { %p4737_p2 = scmp.ne.s32.totalorder %s7835_s2, %s4736_s10  ;;  %p4740_p3 = scmp.lt.u32.totalorder %s4736_s10, %s7835_s2 }
  0x2a   :  { %p4742_p4 = pnand %p4740_p3, %p4737_p2 }
  0x2c   :  { %4745 = shalt.err (!%p4742_p4)
}
  0x2d   :  { %s4746_s0 = scalar_lea.vmem %s47_s28, 128  ;;  %p4751_p6 = scmp.lt.s32.totalorder %s47_s28, %s47_s28 }
  0x2e   :  { %p4747_p5 = scmp.ne.s32.totalorder %s47_s28, %s4746_s0  ;;  %p4752_p7 = scmp.lt.s32.totalorder %s4746_s0, %s4746_s0 }
  0x30   :  { %p4753_p8 = por %p4752_p7, %p4751_p6 }
  0x32   :  { %p4754_p9 = pnand %p4753_p8, %p4747_p5 }
  0x34   :  { %4757 = shalt.err (!%p4754_p9)
}
  0x35   :  { %49 = dma.hbm_to_vmem [thread:$0]  %s7835_s2, 128, %s47_s28, [#allocation6]  }
  0x36   :  { %s4758_s18 = scalar_lea.hbm %s7837_s4, 128 }
  0x37   :  { %p4759_p10 = scmp.ne.s32.totalorder %s7837_s4, %s4758_s18  ;;  %p4762_p11 = scmp.lt.u32.totalorder %s4758_s18, %s7837_s4 }
  0x39   :  { %p4764_p12 = pnand %p4762_p11, %p4759_p10 }
  0x3b   :  { %4767 = shalt.err (!%p4764_p12)
}
  0x3c   :  { %s4768_s1 = scalar_lea.vmem %s59_s30, 128  ;;  %p4773_p0 = scmp.lt.s32.totalorder %s59_s30, %s59_s30 }
  0x3d   :  { %p4769_p13 = scmp.ne.s32.totalorder %s59_s30, %s4768_s1  ;;  %p4774_p1 = scmp.lt.s32.totalorder %s4768_s1, %s4768_s1 }
  0x3f   :  { %p4775_p2 = por %p4774_p1, %p4773_p0 }
  0x41   :  { %p4776_p3 = pnand %p4775_p2, %p4769_p13 }
  0x43   :  { %4779 = shalt.err (!%p4776_p3)
}
  0x44   :  { %61 = dma.hbm_to_vmem [thread:$0]  %s7837_s4, 128, %s59_s30, [#allocation9]  }
  0x45   :  { %4846 = dma.done.wait [#allocation3], 16384  }
  0x46   :  { %4847 = vsyncadd [#allocation3], 4294950912 }
  0x47   :  { %4848 = dma.done.wait [#allocation6], 256  }
  0x48   :  { %4849 = vsyncadd [#allocation6], 4294967040 }
  0x49   :  { %4850 = dma.done.wait [#allocation9], 128  }
  0x4a   :  { %4851 = vsyncadd [#allocation9], 4294967168  ;;  %v7847_v0 = vlaneseq  ;;  %v4968_v3 = vld [vmem:[#allocation8] sm:$0xff]  ;;  %s4865_s26 = smov [#allocation10]   ;;  %s4866_s29 = smov [#allocation13]  }
  0x4b   :  { %s4381_s28 = sshll.u32 %s4865_s26, 4  ;;  %s4401_s30 = sshll.u32 %s4866_s29, 4  ;;  %s7783_s28 = int_to_ptr.vmem [resolvable:$true] %s4381_s28  ;;  %s7785_s30 = int_to_ptr.vmem [resolvable:$true] %s4401_s30 }
  0x4c   :  { %v4963_v1 = vshrl.u32 %v7847_v0, 7 }
  0x4e   :  { %8005 = vst [vmem:[#allocation19_spill] sm:$0xff] %v4963_v1  ;;  %v4966_v2 = vsub.s32 0, %v4963_v1  ;;  %v7846_v5 = vsub.s32 1, %v4963_v1  ;;  %v7845_v7 = vsub.s32 2, %v4963_v1  ;;  %v7844_v9 = vsub.s32 3, %v4963_v1 }
  0x4f   :  { %v7843_v15 = vsub.s32 4, %v4963_v1  ;;  %v7842_v33 = vsub.s32 5, %v4963_v1  ;;  %v7841_v51 = vsub.s32 6, %v4963_v1 }
  0x50   :  { %8006 = vst [vmem:[#allocation20_spill] sm:$0xff] %v4966_v2  ;;  %v211_v4 = vrot.slane %v4968_v3, %v4966_v2  ;;  %v278_v6 = vrot.slane %v4968_v3, %v7846_v5  ;;  %v345_v8 = vrot.slane %v4968_v3, %v7845_v7  ;;  %v412_v10 = vrot.slane %v4968_v3, %v7844_v9 }
  0x51   :  { %v479_v18 = vrot.slane %v4968_v3, %v7843_v15  ;;  %v546_v36 = vrot.slane %v4968_v3, %v7842_v33  ;;  %v613_v54 = vrot.slane %v4968_v3, %v7841_v51 }
  0x52   :  { %221 = vbcast.lane.b32.xlu1 %v211_v4, 272  ;;  %213 = vbcast.lane.b32.xlu0 %v211_v4, 256 }
  0x56   :  { %225 = vbcast.lane.b32.xlu1 %v211_v4, 280  ;;  %217 = vbcast.lane.b32.xlu0 %v211_v4, 264 }
  0x5a   :  { %233 = vbcast.lane.b32.xlu1 %v211_v4, 296  ;;  %229 = vbcast.lane.b32.xlu0 %v211_v4, 288 }
  0x5e   :  { %241 = vbcast.lane.b32.xlu1 %v211_v4, 312  ;;  %237 = vbcast.lane.b32.xlu0 %v211_v4, 304 }
  0x62   :  { %249 = vbcast.lane.b32.xlu1 %v211_v4, 328  ;;  %245 = vbcast.lane.b32.xlu0 %v211_v4, 320 }
  0x66   :  { %257 = vbcast.lane.b32.xlu1 %v211_v4, 344  ;;  %253 = vbcast.lane.b32.xlu0 %v211_v4, 336 }
  0x6a   :  { %265 = vbcast.lane.b32.xlu1 %v211_v4, 360  ;;  %261 = vbcast.lane.b32.xlu0 %v211_v4, 352 }
  0x6e   :  { %273 = vbcast.lane.b32.xlu1 %v211_v4, 376  ;;  %269 = vbcast.lane.b32.xlu0 %v211_v4, 368 }
  0x72   :  { %284 = vbcast.lane.b32.xlu1 %v278_v6, 264  ;;  %280 = vbcast.lane.b32.xlu0 %v278_v6, 256 }
  0x76   :  { %292 = vbcast.lane.b32.xlu1 %v278_v6, 280  ;;  %288 = vbcast.lane.b32.xlu0 %v278_v6, 272 }
  0x7a   :  { %300 = vbcast.lane.b32.xlu1 %v278_v6, 296  ;;  %296 = vbcast.lane.b32.xlu0 %v278_v6, 288 }
  0x7e   :  { %308 = vbcast.lane.b32.xlu1 %v278_v6, 312  ;;  %304 = vbcast.lane.b32.xlu0 %v278_v6, 304 }
  0x82   :  { %316 = vbcast.lane.b32.xlu1 %v278_v6, 328  ;;  %312 = vbcast.lane.b32.xlu0 %v278_v6, 320 }
  0x86   :  { %324 = vbcast.lane.b32.xlu1 %v278_v6, 344  ;;  %320 = vbcast.lane.b32.xlu0 %v278_v6, 336 }
  0x8a   :  { %332 = vbcast.lane.b32.xlu1 %v278_v6, 360  ;;  %328 = vbcast.lane.b32.xlu0 %v278_v6, 352 }
  0x8e   :  { %340 = vbcast.lane.b32.xlu1 %v278_v6, 376  ;;  %336 = vbcast.lane.b32.xlu0 %v278_v6, 368 }
  0x92   :  { %351 = vbcast.lane.b32.xlu1 %v345_v8, 264  ;;  %347 = vbcast.lane.b32.xlu0 %v345_v8, 256 }
  0x96   :  { %359 = vbcast.lane.b32.xlu1 %v345_v8, 280  ;;  %355 = vbcast.lane.b32.xlu0 %v345_v8, 272 }
  0x9a   :  { %367 = vbcast.lane.b32.xlu1 %v345_v8, 296  ;;  %363 = vbcast.lane.b32.xlu0 %v345_v8, 288 }
  0x9e   :  { %375 = vbcast.lane.b32.xlu1 %v345_v8, 312  ;;  %371 = vbcast.lane.b32.xlu0 %v345_v8, 304 }
  0xa2   :  { %383 = vbcast.lane.b32.xlu1 %v345_v8, 328  ;;  %379 = vbcast.lane.b32.xlu0 %v345_v8, 320 }
  0xa6   :  { %391 = vbcast.lane.b32.xlu1 %v345_v8, 344  ;;  %387 = vbcast.lane.b32.xlu0 %v345_v8, 336 }
  0xaa   :  { %399 = vbcast.lane.b32.xlu1 %v345_v8, 360  ;;  %395 = vbcast.lane.b32.xlu0 %v345_v8, 352 }
  0xae   :  { %407 = vbcast.lane.b32.xlu1 %v345_v8, 376  ;;  %403 = vbcast.lane.b32.xlu0 %v345_v8, 368 }
  0xb2   :  { %418 = vbcast.lane.b32.xlu1 %v412_v10, 264  ;;  %414 = vbcast.lane.b32.xlu0 %v412_v10, 256 }
  0xb6   :  { %426 = vbcast.lane.b32.xlu1 %v412_v10, 280  ;;  %422 = vbcast.lane.b32.xlu0 %v412_v10, 272 }
  0xba   :  { %434 = vbcast.lane.b32.xlu1 %v412_v10, 296  ;;  %430 = vbcast.lane.b32.xlu0 %v412_v10, 288 }
  0xbe   :  { %442 = vbcast.lane.b32.xlu1 %v412_v10, 312  ;;  %438 = vbcast.lane.b32.xlu0 %v412_v10, 304 }
  0xc2   :  { %450 = vbcast.lane.b32.xlu1 %v412_v10, 328  ;;  %446 = vbcast.lane.b32.xlu0 %v412_v10, 320 }
  0xc4   :  { %v4984_v11 = vpop.permute.xlu0 %213  ;;  %v4986_v12 = vpop.permute.xlu1 %221 }
  0xc6   :  { %458 = vbcast.lane.b32.xlu1 %v412_v10, 344  ;;  %454 = vbcast.lane.b32.xlu0 %v412_v10, 336 }
  0xc8   :  { %v4988_v13 = vpop.permute.xlu0 %217  ;;  %v4990_v14 = vpop.permute.xlu1 %225 }
  0xca   :  { %466 = vbcast.lane.b32.xlu1 %v412_v10, 360  ;;  %462 = vbcast.lane.b32.xlu0 %v412_v10, 352 }
  0xcc   :  { %v4993_v16 = vpop.permute.xlu0 %229  ;;  %v4995_v17 = vpop.permute.xlu1 %233 }
  0xce   :  { %474 = vbcast.lane.b32.xlu1 %v412_v10, 376  ;;  %470 = vbcast.lane.b32.xlu0 %v412_v10, 368 }
  0xd0   :  { %v5000_v19 = vpop.permute.xlu0 %237  ;;  %v5002_v20 = vpop.permute.xlu1 %241 }
  0xd2   :  { %485 = vbcast.lane.b32.xlu1 %v479_v18, 264  ;;  %481 = vbcast.lane.b32.xlu0 %v479_v18, 256 }
  0xd4   :  { %v5004_v21 = vpop.permute.xlu0 %245  ;;  %v5006_v22 = vpop.permute.xlu1 %249 }
  0xd6   :  { %493 = vbcast.lane.b32.xlu1 %v479_v18, 280  ;;  %489 = vbcast.lane.b32.xlu0 %v479_v18, 272 }
  0xd8   :  { %v5008_v23 = vpop.permute.xlu0 %253  ;;  %v5010_v24 = vpop.permute.xlu1 %257 }
  0xda   :  { %501 = vbcast.lane.b32.xlu1 %v479_v18, 296  ;;  %497 = vbcast.lane.b32.xlu0 %v479_v18, 288 }
  0xdc   :  { %v5012_v25 = vpop.permute.xlu0 %261  ;;  %v5014_v26 = vpop.permute.xlu1 %265 }
  0xde   :  { %509 = vbcast.lane.b32.xlu1 %v479_v18, 312  ;;  %505 = vbcast.lane.b32.xlu0 %v479_v18, 304 }
  0xe0   :  { %v5016_v27 = vpop.permute.xlu0 %269  ;;  %v5018_v28 = vpop.permute.xlu1 %273 }
  0xe2   :  { %517 = vbcast.lane.b32.xlu1 %v479_v18, 328  ;;  %513 = vbcast.lane.b32.xlu0 %v479_v18, 320 }
  0xe4   :  { %v5020_v29 = vpop.permute.xlu0 %280  ;;  %v5022_v30 = vpop.permute.xlu1 %284 }
  0xe6   :  { %525 = vbcast.lane.b32.xlu1 %v479_v18, 344  ;;  %521 = vbcast.lane.b32.xlu0 %v479_v18, 336 }
  0xe8   :  { %v5024_v31 = vpop.permute.xlu0 %288  ;;  %v5026_v32 = vpop.permute.xlu1 %292 }
  0xea   :  { %533 = vbcast.lane.b32.xlu1 %v479_v18, 360  ;;  %529 = vbcast.lane.b32.xlu0 %v479_v18, 352 }
  0xec   :  { %v5029_v34 = vpop.permute.xlu0 %296  ;;  %v5031_v35 = vpop.permute.xlu1 %300 }
  0xee   :  { %541 = vbcast.lane.b32.xlu1 %v479_v18, 376  ;;  %537 = vbcast.lane.b32.xlu0 %v479_v18, 368 }
  0xf0   :  { %v5036_v37 = vpop.permute.xlu0 %304  ;;  %v5038_v38 = vpop.permute.xlu1 %308 }
  0xf2   :  { %552 = vbcast.lane.b32.xlu1 %v546_v36, 264  ;;  %548 = vbcast.lane.b32.xlu0 %v546_v36, 256 }
  0xf4   :  { %v5040_v39 = vpop.permute.xlu0 %312  ;;  %v5042_v40 = vpop.permute.xlu1 %316 }
  0xf6   :  { %560 = vbcast.lane.b32.xlu1 %v546_v36, 280  ;;  %556 = vbcast.lane.b32.xlu0 %v546_v36, 272 }
  0xf8   :  { %v5044_v41 = vpop.permute.xlu0 %320  ;;  %v5046_v42 = vpop.permute.xlu1 %324 }
  0xfa   :  { %568 = vbcast.lane.b32.xlu1 %v546_v36, 296  ;;  %564 = vbcast.lane.b32.xlu0 %v546_v36, 288 }
  0xfc   :  { %v5048_v43 = vpop.permute.xlu0 %328  ;;  %v5050_v44 = vpop.permute.xlu1 %332 }
  0xfe   :  { %576 = vbcast.lane.b32.xlu1 %v546_v36, 312  ;;  %572 = vbcast.lane.b32.xlu0 %v546_v36, 304 }
 0x100   :  { %v5052_v45 = vpop.permute.xlu0 %336  ;;  %v5054_v46 = vpop.permute.xlu1 %340 }
 0x102   :  { %584 = vbcast.lane.b32.xlu1 %v546_v36, 328  ;;  %580 = vbcast.lane.b32.xlu0 %v546_v36, 320 }
 0x104   :  { %v5056_v47 = vpop.permute.xlu0 %347  ;;  %v5058_v48 = vpop.permute.xlu1 %351 }
 0x106   :  { %592 = vbcast.lane.b32.xlu1 %v546_v36, 344  ;;  %588 = vbcast.lane.b32.xlu0 %v546_v36, 336 }
 0x108   :  { %v5060_v49 = vpop.permute.xlu0 %355  ;;  %v5062_v50 = vpop.permute.xlu1 %359 }
 0x10a   :  { %600 = vbcast.lane.b32.xlu1 %v546_v36, 360  ;;  %596 = vbcast.lane.b32.xlu0 %v546_v36, 352 }
 0x10c   :  { %v5065_v52 = vpop.permute.xlu0 %363  ;;  %v5067_v53 = vpop.permute.xlu1 %367 }
 0x10e   :  { %608 = vbcast.lane.b32.xlu1 %v546_v36, 376  ;;  %604 = vbcast.lane.b32.xlu0 %v546_v36, 368  ;;  %v7848_v36 = vsub.s32 7, %v4963_v1 }
 0x110   :  { %v5072_v55 = vpop.permute.xlu0 %371  ;;  %v5074_v56 = vpop.permute.xlu1 %375  ;;  %v680_v15 = vrot.slane %v4968_v3, %v7848_v36 }
 0x112   :  { %619 = vbcast.lane.b32.xlu1 %v613_v54, 264  ;;  %615 = vbcast.lane.b32.xlu0 %v613_v54, 256 }
 0x114   :  { %v5076_v57 = vpop.permute.xlu0 %379  ;;  %v5078_v58 = vpop.permute.xlu1 %383 }
 0x115   :  { %8007 = vst [vmem:[#allocation21_spill] sm:$0xff] %v5078_v58 }
 0x116   :  { %627 = vbcast.lane.b32.xlu1 %v613_v54, 280  ;;  %623 = vbcast.lane.b32.xlu0 %v613_v54, 272 }
 0x118   :  { %v5080_v59 = vpop.permute.xlu0 %387  ;;  %v5082_v60 = vpop.permute.xlu1 %391 }
 0x119   :  { %8008 = vst [vmem:[#allocation22_spill] sm:$0xff] %v5080_v59  ;;  %8009 = vst [vmem:[#allocation23_spill] sm:$0xff] %v5082_v60  ;;  %v80_v60 = vld [vmem:[#allocation2 + $0x30] sm:$0xff] }
 0x11a   :  { %635 = vbcast.lane.b32.xlu1 %v613_v54, 296  ;;  %631 = vbcast.lane.b32.xlu0 %v613_v54, 288 }
 0x11c   :  { %v5084_v61 = vpop.permute.xlu0 %395  ;;  %v5086_v62 = vpop.permute.xlu1 %399 }
 0x11d   :  { %8010 = vst [vmem:[#allocation24_spill] sm:$0xff] %v5084_v61  ;;  %8011 = vst [vmem:[#allocation25_spill] sm:$0xff] %v5086_v62 }
 0x11e   :  { %643 = vbcast.lane.b32.xlu1 %v613_v54, 312  ;;  %639 = vbcast.lane.b32.xlu0 %v613_v54, 304 }
 0x120   :  { %v5088_v63 = vpop.permute.xlu0 %403  ;;  %v5090_v4 = vpop.permute.xlu1 %407 }
 0x121   :  { %8012 = vst [vmem:[#allocation26_spill] sm:$0xff] %v5088_v63  ;;  %8013 = vst [vmem:[#allocation27_spill] sm:$0xff] %v5090_v4  ;;  %v77_v4 = vld [vmem:[#allocation2 + $0x18] sm:$0xff]  ;;  %v78_v63 = vld [vmem:[#allocation2 + $0x20] sm:$0xff] }
 0x122   :  { %651 = vbcast.lane.b32.xlu1 %v613_v54, 328  ;;  %647 = vbcast.lane.b32.xlu0 %v613_v54, 320 }
 0x124   :  { %v5092_v6 = vpop.permute.xlu0 %414  ;;  %v5094_v8 = vpop.permute.xlu1 %418 }
 0x125   :  { %8014 = vst [vmem:[#allocation28_spill] sm:$0xff] %v5092_v6  ;;  %8015 = vst [vmem:[#allocation29_spill] sm:$0xff] %v5094_v8  ;;  %v75_v8 = vld [vmem:[#allocation2 + $0x8] sm:$0xff] }
 0x126   :  { %659 = vbcast.lane.b32.xlu1 %v613_v54, 344  ;;  %655 = vbcast.lane.b32.xlu0 %v613_v54, 336 }
 0x128   :  { %v5096_v10 = vpop.permute.xlu0 %422  ;;  %v5098_v18 = vpop.permute.xlu1 %426 }
 0x129   :  { %8016 = vst [vmem:[#allocation30_spill] sm:$0xff] %v5096_v10  ;;  %8017 = vst [vmem:[#allocation31_spill] sm:$0xff] %v5098_v18  ;;  %v5150_v10 = vld [vmem:[#allocation5] sm:$0xff] }
 0x12a   :  { %667 = vbcast.lane.b32.xlu1 %v613_v54, 360  ;;  %663 = vbcast.lane.b32.xlu0 %v613_v54, 352 }
 0x12c   :  { %v5101_v51 = vpop.permute.xlu0 %430  ;;  %v5103_v33 = vpop.permute.xlu1 %434 }
 0x12d   :  { %8018 = vst [vmem:[#allocation32_spill] sm:$0xff] %v5101_v51  ;;  %8019 = vst [vmem:[#allocation33_spill] sm:$0xff] %v5103_v33 }
 0x12e   :  { %675 = vbcast.lane.b32.xlu1 %v613_v54, 376  ;;  %671 = vbcast.lane.b32.xlu0 %v613_v54, 368 }
 0x130   :  { %v5108_v9 = vpop.permute.xlu0 %438  ;;  %v5110_v7 = vpop.permute.xlu1 %442 }
 0x131   :  { %8020 = vst [vmem:[#allocation34_spill] sm:$0xff] %v5108_v9  ;;  %8021 = vst [vmem:[#allocation35_spill] sm:$0xff] %v5110_v7 }
 0x132   :  { %686 = vbcast.lane.b32.xlu1 %v680_v15, 264  ;;  %682 = vbcast.lane.b32.xlu0 %v680_v15, 256 }
 0x134   :  { %v5112_v5 = vpop.permute.xlu0 %446  ;;  %v5114_v0 = vpop.permute.xlu1 %450 }
 0x135   :  { %8022 = vst [vmem:[#allocation36_spill] sm:$0xff] %v5112_v5  ;;  %8023 = vst [vmem:[#allocation37_spill] sm:$0xff] %v5114_v0 }
 0x136   :  { %694 = vbcast.lane.b32.xlu1 %v680_v15, 280  ;;  %690 = vbcast.lane.b32.xlu0 %v680_v15, 272 }
 0x138   :  { %v5116_v51 = vpop.permute.xlu0 %454  ;;  %v5118_v33 = vpop.permute.xlu1 %458 }
 0x139   :  { %8024 = vst [vmem:[#allocation38_spill] sm:$0xff] %v5116_v51  ;;  %8025 = vst [vmem:[#allocation39_spill] sm:$0xff] %v5118_v33 }
 0x13a   :  { %702 = vbcast.lane.b32.xlu1 %v680_v15, 296  ;;  %698 = vbcast.lane.b32.xlu0 %v680_v15, 288 }
 0x13c   :  { %v5120_v54 = vpop.permute.xlu0 %462  ;;  %v5122_v3 = vpop.permute.xlu1 %466 }
 0x13d   :  { %8026 = vst [vmem:[#allocation40_spill] sm:$0xff] %v5120_v54  ;;  %8027 = vst [vmem:[#allocation41_spill] sm:$0xff] %v5122_v3 }
 0x13e   :  { %710 = vbcast.lane.b32.xlu1 %v680_v15, 312  ;;  %706 = vbcast.lane.b32.xlu0 %v680_v15, 304 }
 0x140   :  { %v5124_v36 = vpop.permute.xlu0 %470  ;;  %v5126_v7 = vpop.permute.xlu1 %474 }
 0x141   :  { %8028 = vst [vmem:[#allocation42_spill] sm:$0xff] %v5124_v36  ;;  %8029 = vst [vmem:[#allocation43_spill] sm:$0xff] %v5126_v7  ;;  %v4862_v36 = vmov 1966171168  }
 0x142   :  { %718 = vbcast.lane.b32.xlu1 %v680_v15, 328  ;;  %714 = vbcast.lane.b32.xlu0 %v680_v15, 320 }
 0x144   :  { %v5128_v0 = vpop.permute.xlu0 %481  ;;  %v5130_v5 = vpop.permute.xlu1 %485 }
 0x145   :  { %8030 = vst [vmem:[#allocation44_spill] sm:$0xff] %v5128_v0  ;;  %8031 = vst [vmem:[#allocation45_spill] sm:$0xff] %v5130_v5  ;;  %v1195_v0 = vunpack.c.l.s4 %v4862_v36 }
 0x146   :  { %726 = vbcast.lane.b32.xlu1 %v680_v15, 344  ;;  %722 = vbcast.lane.b32.xlu0 %v680_v15, 336 }
 0x147   :  { %v1196_v18 = vunpack.c.0.s8 %v1195_v0 }
 0x148   :  { %v5132_v33 = vpop.permute.xlu0 %489  ;;  %v5134_v51 = vpop.permute.xlu1 %493 }
 0x149   :  { %8032 = vst [vmem:[#allocation46_spill] sm:$0xff] %v5132_v33  ;;  %8033 = vst [vmem:[#allocation47_spill] sm:$0xff] %v5134_v51 }
 0x14a   :  { %734 = vbcast.lane.b32.xlu1 %v680_v15, 360  ;;  %730 = vbcast.lane.b32.xlu0 %v680_v15, 352 }
 0x14c   :  { %v5136_v3 = vpop.permute.xlu0 %497  ;;  %v5138_v54 = vpop.permute.xlu1 %501 }
 0x14d   :  { %8034 = vst [vmem:[#allocation48_spill] sm:$0xff] %v5136_v3  ;;  %8035 = vst [vmem:[#allocation49_spill] sm:$0xff] %v5138_v54  ;;  %v5153_v3 = vsub.s32 %v1196_v18, %v4963_v1  ;;  %v76_v1 = vld [vmem:[#allocation2 + $0x10] sm:$0xff] }
 0x14e   :  { %742 = vbcast.lane.b32.xlu1 %v680_v15, 376  ;;  %738 = vbcast.lane.b32.xlu0 %v680_v15, 368 }
 0x14f   :  { %v1200_v15 = vrot.slane %v5150_v10, %v5153_v3 }
 0x150   :  { %v5140_v7 = vpop.permute.xlu0 %505  ;;  %v5142_v9 = vpop.permute.xlu1 %509 }
 0x151   :  { %8036 = vst [vmem:[#allocation50_spill] sm:$0xff] %v5140_v7  ;;  %8037 = vst [vmem:[#allocation51_spill] sm:$0xff] %v5142_v9  ;;  %v5162_v9 = vrot.slane %v1200_v15, %v5153_v3 }
 0x154   :  { %v5144_v5 = vpop.permute.xlu0 %513  ;;  %v5146_v33 = vpop.permute.xlu1 %517 }
 0x155   :  { %8038 = vst [vmem:[#allocation52_spill] sm:$0xff] %v5144_v5  ;;  %8039 = vst [vmem:[#allocation53_spill] sm:$0xff] %v5146_v33  ;;  %v74_v5 = vld [vmem:[#allocation2] sm:$0xff] }
 0x158   :  { %v5148_v51 = vpop.permute.xlu0 %521  ;;  %v5157_v7 = vpop.permute.xlu1 %525 }
 0x159   :  { %8040 = vst [vmem:[#allocation54_spill] sm:$0xff] %v5148_v51  ;;  %8041 = vst [vmem:[#allocation55_spill] sm:$0xff] %v5157_v7  ;;  %v1245_v51 = vrot.slane %v5162_v9, %v4966_v2 }
 0x15b   :  { %v1282_v18 = vmul.f32 %v1245_v51, %v74_v5  ;;  %v1283_v7 = vmul.f32 %v1245_v51, %v75_v8  ;;  %v79_v5 = vld [vmem:[#allocation2 + $0x28] sm:$0xff]  ;;  %v1288_v59 = vmul.f32 %v1245_v51, %v80_v60  ;;  %v85_v60 = vld [vmem:[#allocation2 + $0x58] sm:$0xff] }
 0x15c   :  { %v5159_v36 = vpop.permute.xlu0 %529  ;;  %v5164_v0 = vpop.permute.xlu1 %533  ;;  %v1293_v58 = vmul.f32 %v1245_v51, %v85_v60 }
 0x15d   :  { %8042 = vst [vmem:[#allocation56_spill] sm:$0xff] %v5159_v36  ;;  %8043 = vst [vmem:[#allocation57_spill] sm:$0xff] %v5164_v0  ;;  %v1284_v36 = vmul.f32 %v1245_v51, %v76_v1  ;;  %v1285_v0 = vmul.f32 %v1245_v51, %v77_v4  ;;  %v82_v1 = vld [vmem:[#allocation2 + $0x40] sm:$0xff] }
 0x15e   :  { %v1290_v4 = vmul.f32 %v1245_v51, %v82_v1 }
 0x160   :  { %v5168_v33 = vpop.permute.xlu0 %537  ;;  %v5170_v54 = vpop.permute.xlu1 %541 }
 0x161   :  { %8044 = vst [vmem:[#allocation58_spill] sm:$0xff] %v5168_v33  ;;  %8045 = vst [vmem:[#allocation59_spill] sm:$0xff] %v5170_v54  ;;  %v1286_v33 = vmul.f32 %v1245_v51, %v78_v63  ;;  %v1287_v54 = vmul.f32 %v1245_v51, %v79_v5  ;;  %v1208_v5 = vcombine.high %v1200_v15, %v1200_v15 }
 0x164   :  { %v5172_v6 = vpop.permute.xlu0 %548  ;;  %v5174_v62 = vpop.permute.xlu1 %552 }
 0x165   :  { %8046 = vst [vmem:[#allocation60_spill] sm:$0xff] %v5172_v6  ;;  %8047 = vst [vmem:[#allocation61_spill] sm:$0xff] %v5174_v62  ;;  %v81_v6 = vld [vmem:[#allocation2 + $0x38] sm:$0xff] }
 0x166   :  { %v1289_v62 = vmul.f32 %v1245_v51, %v81_v6  ;;  %v87_v6 = vld [vmem:[#allocation2 + $0x68] sm:$0xff] }
 0x168   :  { %v5176_v61 = vpop.permute.xlu0 %556 }
 0x169   :  { %8048 = vst [vmem:[#allocation62_spill] sm:$0xff] %v5176_v61  ;;  %v84_v61 = vld [vmem:[#allocation2 + $0x50] sm:$0xff] }
 0x16c   :  { %v5180_v8 = vpop.permute.xlu0 %564 }
 0x16d   :  { %1410 = vadd.xlane.f32.xlu0 %v1282_v18  ;;  %v5178_v18 = vpop.permute.xlu1 %560 }
 0x16e   :  { %8049 = vst [vmem:[#allocation63_spill] sm:$0xff] %v5178_v18  ;;  %v86_v18 = vld [vmem:[#allocation2 + $0x60] sm:$0xff] }
 0x171   :  { %1414 = vadd.xlane.f32.xlu0 %v1284_v36  ;;  %v83_v36 = vld [vmem:[#allocation2 + $0x48] sm:$0xff] }
 0x172   :  { %1412 = vadd.xlane.f32.xlu1 %v1283_v7  ;;  %v5182_v7 = vpop.permute.xlu1 %568  ;;  %v1291_v63 = vmul.f32 %v1245_v51, %v83_v36  ;;  %v1295_v36 = vmul.f32 %v1245_v51, %v87_v6  ;;  %v93_v6 = vld [vmem:[#allocation2 + $0x98] sm:$0xff] }
 0x173   :  { %8050 = vst [vmem:[#allocation64_spill] sm:$0xff] %v5182_v7  ;;  %v88_v7 = vld [vmem:[#allocation2 + $0x70] sm:$0xff] }
 0x175   :  { %1416 = vadd.xlane.f32.xlu0 %v1285_v0  ;;  %v5184_v0 = vpop.permute.xlu0 %572 }
 0x176   :  { %1418 = vadd.xlane.f32.xlu1 %v1286_v33  ;;  %8051 = vst [vmem:[#allocation65_spill] sm:$0xff] %v5184_v0  ;;  %v1292_v33 = vmul.f32 %v1245_v51, %v84_v61  ;;  %v5189_v1 = vpop.permute.xlu1 %576  ;;  %v1296_v61 = vmul.f32 %v1245_v51, %v88_v7  ;;  %v94_v0 = vld [vmem:[#allocation2 + $0xa0] sm:$0xff] }
 0x177   :  { %8052 = vst [vmem:[#allocation66_spill] sm:$0xff] %v5189_v1 }
 0x179   :  { %1420 = vadd.xlane.f32.xlu0 %v1287_v54  ;;  %v1294_v54 = vmul.f32 %v1245_v51, %v86_v18 }
 0x17a   :  { %1422 = vadd.xlane.f32.xlu1 %v1288_v59  ;;  %v5187_v59 = vrot.slane %v1208_v5, %v5153_v3  ;;  %v5197_v18 = vpop.permute.xlu1 %584 }
 0x17b   :  { %8054 = vst [vmem:[#allocation68_spill] sm:$0xff] %v5197_v18 }
 0x17c   :  { %v5195_v15 = vrot.slane %v5187_v59, %v4966_v2 }
 0x17d   :  { %1424 = vadd.xlane.f32.xlu0 %v1289_v62  ;;  %v5191_v62 = vpop.permute.xlu0 %580 }
 0x17e   :  { %1426 = vadd.xlane.f32.xlu1 %v1290_v4  ;;  %8053 = vst [vmem:[#allocation67_spill] sm:$0xff] %v5191_v62  ;;  %v89_v4 = vld [vmem:[#allocation2 + $0x78] sm:$0xff]  ;;  %v91_v62 = vld [vmem:[#allocation2 + $0x88] sm:$0xff]  ;;  %v5204_v1 = vpop.permute.xlu1 %592 }
 0x17f   :  { %v1299_v7 = vmul.f32 %v5195_v15, %v91_v62  ;;  %8056 = vst [vmem:[#allocation70_spill] sm:$0xff] %v5204_v1  ;;  %v105_v1 = vld [vmem:[#allocation2 + $0xf8] sm:$0xff] }
 0x181   :  { %1428 = vadd.xlane.f32.xlu0 %v1291_v63  ;;  %v90_v63 = vld [vmem:[#allocation2 + $0x80] sm:$0xff]  ;;  %v5199_v60 = vpop.permute.xlu0 %588 }
 0x182   :  { %1430 = vadd.xlane.f32.xlu1 %v1292_v33  ;;  %v1297_v33 = vmul.f32 %v1245_v51, %v89_v4  ;;  %8055 = vst [vmem:[#allocation69_spill] sm:$0xff] %v5199_v60  ;;  %v1298_v5 = vmul.f32 %v5195_v15, %v90_v63  ;;  %v1301_v51 = vmul.f32 %v5195_v15, %v93_v6  ;;  %v96_v4 = vld [vmem:[#allocation2 + $0xb0] sm:$0xff]  ;;  %v5210_v63 = vpop.permute.xlu1 %600 }
 0x183   :  { %8058 = vst [vmem:[#allocation72_spill] sm:$0xff] %v5210_v63  ;;  %v100_v63 = vld [vmem:[#allocation2 + $0xd0] sm:$0xff] }
 0x185   :  { %1432 = vadd.xlane.f32.xlu0 %v1293_v58  ;;  %v92_v58 = vld [vmem:[#allocation2 + $0x90] sm:$0xff]  ;;  %v5206_v18 = vpop.permute.xlu0 %596 }
 0x186   :  { %1434 = vadd.xlane.f32.xlu1 %v1294_v54  ;;  %v1300_v54 = vmul.f32 %v5195_v15, %v92_v58  ;;  %8057 = vst [vmem:[#allocation71_spill] sm:$0xff] %v5206_v18  ;;  %v97_v58 = vld [vmem:[#allocation2 + $0xb8] sm:$0xff]  ;;  %v98_v18 = vld [vmem:[#allocation2 + $0xc0] sm:$0xff]  ;;  %v5218_v6 = vpop.permute.xlu1 %608 }
 0x187   :  { %8060 = vst [vmem:[#allocation74_spill] sm:$0xff] %v5218_v6  ;;  %v103_v6 = vld [vmem:[#allocation2 + $0xe8] sm:$0xff] }
 0x189   :  { %1436 = vadd.xlane.f32.xlu0 %v1295_v36  ;;  %v1302_v36 = vmul.f32 %v5195_v15, %v94_v0  ;;  %v1306_v0 = vmul.f32 %v5195_v15, %v98_v18 }
 0x18a   :  { %1438 = vadd.xlane.f32.xlu1 %v1296_v61  ;;  %v95_v61 = vld [vmem:[#allocation2 + $0xa8] sm:$0xff] }
 0x18b   :  { %v1303_v62 = vmul.f32 %v5195_v15, %v95_v61 }
 0x18d   :  { %1440 = vadd.xlane.f32.xlu0 %v1297_v33  ;;  %v5213_v33 = vpop.permute.xlu0 %604 }
 0x18e   :  { %1442 = vadd.xlane.f32.xlu1 %v1298_v5  ;;  %8059 = vst [vmem:[#allocation73_spill] sm:$0xff] %v5213_v33  ;;  %v1304_v5 = vmul.f32 %v5195_v15, %v96_v4  ;;  %v101_v4 = vld [vmem:[#allocation2 + $0xd8] sm:$0xff]  ;;  %v102_v33 = vld [vmem:[#allocation2 + $0xe0] sm:$0xff] }
 0x191   :  { %1444 = vadd.xlane.f32.xlu0 %v1299_v7  ;;  %v1305_v7 = vmul.f32 %v5195_v15, %v97_v58  ;;  %v1310_v58 = vmul.f32 %v5195_v15, %v102_v33  ;;  %v1313_v33 = vmul.f32 %v5195_v15, %v105_v1 }
 0x192   :  { %1446 = vadd.xlane.f32.xlu1 %v1300_v54  ;;  %v99_v54 = vld [vmem:[#allocation2 + $0xc8] sm:$0xff] }
 0x193   :  { %v1307_v61 = vmul.f32 %v5195_v15, %v99_v54  ;;  %v104_v54 = vld [vmem:[#allocation2 + $0xf0] sm:$0xff] }
 0x195   :  { %1448 = vadd.xlane.f32.xlu0 %v1301_v51  ;;  %v5220_v51 = vpop.permute.xlu0 %615 }
 0x196   :  { %1450 = vadd.xlane.f32.xlu1 %v1302_v36  ;;  %v1308_v36 = vmul.f32 %v5195_v15, %v100_v63  ;;  %v1311_v63 = vmul.f32 %v5195_v15, %v103_v6  ;;  %v108_v6 = vld [vmem:[#allocation2 + $0x110] sm:$0xff] }
 0x199   :  { %1452 = vadd.xlane.f32.xlu0 %v1303_v62  ;;  %v5224_v62 = vpop.permute.xlu1 %619  ;;  %v5227_v18 = vpop.permute.xlu0 %623 }
 0x19a   :  { %1454 = vadd.xlane.f32.xlu1 %v1304_v5  ;;  %v1309_v5 = vmul.f32 %v5195_v15, %v101_v4  ;;  %8061 = vst [vmem:[#allocation75_spill] sm:$0xff] %v5227_v18  ;;  %v109_v18 = vld [vmem:[#allocation2 + $0x118] sm:$0xff] }
 0x19d   :  { %1456 = vadd.xlane.f32.xlu0 %v1305_v7  ;;  %v1238_v7 = vcombine.high %v5162_v9, %v5162_v9  ;;  %v5237_v4 = vpop.permute.xlu1 %627  ;;  %v5239_v60 = vpop.permute.xlu0 %631 }
 0x19e   :  { %1458 = vadd.xlane.f32.xlu1 %v1306_v0  ;;  %v1312_v0 = vmul.f32 %v5195_v15, %v104_v54  ;;  %8062 = vst [vmem:[#allocation76_spill] sm:$0xff] %v5237_v4  ;;  %8063 = vst [vmem:[#allocation77_spill] sm:$0xff] %v5239_v60  ;;  %v110_v60 = vld [vmem:[#allocation2 + $0x120] sm:$0xff] }
 0x1a1   :  { %1460 = vadd.xlane.f32.xlu0 %v1307_v61  ;;  %v5235_v61 = vrot.slane %v1238_v7, %v4966_v2  ;;  %v5246_v7 = vpop.permute.xlu0 %639 }
 0x1a2   :  { %1462 = vadd.xlane.f32.xlu1 %v1308_v36  ;;  %v106_v36 = vld [vmem:[#allocation2 + $0x100] sm:$0xff]  ;;  %8065 = vst [vmem:[#allocation79_spill] sm:$0xff] %v5246_v7 }
 0x1a3   :  { %v1314_v9 = vmul.f32 %v5235_v61, %v106_v36  ;;  %v1316_v4 = vmul.f32 %v5235_v61, %v108_v6  ;;  %v1317_v1 = vmul.f32 %v5235_v61, %v109_v18  ;;  %v1318_v15 = vmul.f32 %v5235_v61, %v110_v60  ;;  %v112_v36 = vld [vmem:[#allocation2 + $0x130] sm:$0xff]  ;;  %v113_v6 = vld [vmem:[#allocation2 + $0x138] sm:$0xff]  ;;  %v114_v7 = vld [vmem:[#allocation2 + $0x140] sm:$0xff] }
 0x1a4   :  { %v1321_v18 = vmul.f32 %v5235_v61, %v113_v6 }
 0x1a5   :  { %1464 = vadd.xlane.f32.xlu0 %v1309_v5  ;;  %v107_v5 = vld [vmem:[#allocation2 + $0x108] sm:$0xff] }
 0x1a6   :  { %1466 = vadd.xlane.f32.xlu1 %v1310_v58  ;;  %v5243_v58 = vpop.permute.xlu1 %635  ;;  %v1315_v54 = vmul.f32 %v5235_v61, %v107_v5 }
 0x1a7   :  { %8064 = vst [vmem:[#allocation78_spill] sm:$0xff] %v5243_v58  ;;  %v130_v58 = vld [vmem:[#allocation2 + $0x1c0] sm:$0xff] }
 0x1a9   :  { %1468 = vadd.xlane.f32.xlu0 %v1311_v63  ;;  %v111_v63 = vld [vmem:[#allocation2 + $0x128] sm:$0xff] }
 0x1aa   :  { %1470 = vadd.xlane.f32.xlu1 %v1312_v0  ;;  %v5251_v0 = vpop.permute.xlu1 %643  ;;  %v1319_v5 = vmul.f32 %v5235_v61, %v111_v63  ;;  %v117_v63 = vld [vmem:[#allocation2 + $0x158] sm:$0xff] }
 0x1ab   :  { %8066 = vst [vmem:[#allocation80_spill] sm:$0xff] %v5251_v0  ;;  %v115_v0 = vld [vmem:[#allocation2 + $0x148] sm:$0xff]  ;;  %v1325_v6 = vmul.f32 %v5235_v61, %v117_v63 }
 0x1ad   :  { %1472 = vadd.xlane.f32.xlu0 %v1313_v33  ;;  %v5253_v33 = vpop.permute.xlu0 %647 }
 0x1ae   :  { %1474 = vadd.xlane.f32.xlu1 %v1314_v9  ;;  %8067 = vst [vmem:[#allocation81_spill] sm:$0xff] %v5253_v33  ;;  %v1320_v9 = vmul.f32 %v5235_v61, %v112_v36  ;;  %v116_v33 = vld [vmem:[#allocation2 + $0x150] sm:$0xff] }
 0x1b1   :  { %1476 = vadd.xlane.f32.xlu0 %v1315_v54  ;;  %v5257_v54 = vpop.permute.xlu1 %651  ;;  %v5260_v60 = vpop.permute.xlu0 %655 }
 0x1b2   :  { %1478 = vadd.xlane.f32.xlu1 %v1316_v4  ;;  %8068 = vst [vmem:[#allocation82_spill] sm:$0xff] %v5257_v54  ;;  %8069 = vst [vmem:[#allocation83_spill] sm:$0xff] %v5260_v60  ;;  %v1322_v4 = vmul.f32 %v5235_v61, %v114_v7  ;;  %v118_v54 = vld [vmem:[#allocation2 + $0x160] sm:$0xff] }
 0x1b3   :  { %v1326_v7 = vmul.f32 %v5235_v61, %v118_v54  ;;  %v122_v54 = vld [vmem:[#allocation2 + $0x180] sm:$0xff] }
 0x1b5   :  { %1480 = vadd.xlane.f32.xlu0 %v1317_v1  ;;  %v1323_v1 = vmul.f32 %v5235_v61, %v115_v0  ;;  %v5265_v36 = vpop.permute.xlu1 %659  ;;  %v120_v0 = vld [vmem:[#allocation2 + $0x170] sm:$0xff] }
 0x1b6   :  { %1482 = vadd.xlane.f32.xlu1 %v1318_v15  ;;  %v1324_v15 = vmul.f32 %v5235_v61, %v116_v33  ;;  %8070 = vst [vmem:[#allocation84_spill] sm:$0xff] %v5265_v36 }
 0x1b9   :  { %1484 = vadd.xlane.f32.xlu0 %v1319_v5  ;;  %v5267_v5 = vpop.permute.xlu0 %663 }
 0x1ba   :  { %1486 = vadd.xlane.f32.xlu1 %v1320_v9  ;;  %8071 = vst [vmem:[#allocation85_spill] sm:$0xff] %v5267_v5  ;;  %v119_v9 = vld [vmem:[#allocation2 + $0x168] sm:$0xff]  ;;  %v121_v5 = vld [vmem:[#allocation2 + $0x178] sm:$0xff] }
 0x1bb   :  { %v1327_v33 = vmul.f32 %v5235_v61, %v119_v9  ;;  %v1329_v63 = vmul.f32 %v5235_v61, %v121_v5  ;;  %v124_v9 = vld [vmem:[#allocation2 + $0x190] sm:$0xff] }
 0x1bd   :  { %1488 = vadd.xlane.f32.xlu0 %v1321_v18  ;;  %v1240_v18 = vcombine.high %v5187_v59, %v5187_v59  ;;  %v5276_v36 = vpop.permute.xlu0 %671 }
 0x1be   :  { %1490 = vadd.xlane.f32.xlu1 %v1322_v4  ;;  %v5273_v4 = vpop.permute.xlu1 %667  ;;  %8073 = vst [vmem:[#allocation87_spill] sm:$0xff] %v5276_v36  ;;  %v126_v36 = vld [vmem:[#allocation2 + $0x1a0] sm:$0xff] }
 0x1bf   :  { %8072 = vst [vmem:[#allocation86_spill] sm:$0xff] %v5273_v4  ;;  %v123_v4 = vld [vmem:[#allocation2 + $0x188] sm:$0xff] }
 0x1c1   :  { %1492 = vadd.xlane.f32.xlu0 %v1323_v1  ;;  %v1328_v1 = vmul.f32 %v5235_v61, %v120_v0  ;;  %v5286_v60 = vpop.permute.xlu0 %682  ;;  %v125_v0 = vld [vmem:[#allocation2 + $0x198] sm:$0xff] }
 0x1c2   :  { %1494 = vadd.xlane.f32.xlu1 %v1324_v15  ;;  %v5280_v15 = vrot.slane %v1240_v18, %v4966_v2  ;;  %8075 = vst [vmem:[#allocation89_spill] sm:$0xff] %v5286_v60 }
 0x1c4   :  { %v1330_v59 = vmul.f32 %v5280_v15, %v122_v54  ;;  %v1332_v18 = vmul.f32 %v5280_v15, %v124_v9  ;;  %v1333_v61 = vmul.f32 %v5280_v15, %v125_v0  ;;  %v127_v54 = vld [vmem:[#allocation2 + $0x1a8] sm:$0xff] }
 0x1c5   :  { %1496 = vadd.xlane.f32.xlu0 %v1325_v6  ;;  %v5284_v6 = vpop.permute.xlu1 %675  ;;  %v5293_v5 = vpop.permute.xlu0 %690 }
 0x1c6   :  { %1498 = vadd.xlane.f32.xlu1 %v1326_v7  ;;  %8074 = vst [vmem:[#allocation88_spill] sm:$0xff] %v5284_v6  ;;  %v1331_v7 = vmul.f32 %v5280_v15, %v123_v4  ;;  %8077 = vst [vmem:[#allocation91_spill] sm:$0xff] %v5293_v5  ;;  %v128_v6 = vld [vmem:[#allocation2 + $0x1b0] sm:$0xff]  ;;  %v1335_v4 = vmul.f32 %v5280_v15, %v127_v54 }
 0x1c7   :  { %v132_v54 = vld [vmem:[#allocation2 + $0x1d0] sm:$0xff] }
 0x1c9   :  { %1500 = vadd.xlane.f32.xlu0 %v1327_v33  ;;  %v5290_v33 = vpop.permute.xlu1 %686 }
 0x1ca   :  { %1502 = vadd.xlane.f32.xlu1 %v1328_v1  ;;  %8076 = vst [vmem:[#allocation90_spill] sm:$0xff] %v5290_v33  ;;  %v1334_v1 = vmul.f32 %v5280_v15, %v126_v36  ;;  %v1338_v36 = vmul.f32 %v5280_v15, %v130_v58  ;;  %v134_v58 = vld [vmem:[#allocation2 + $0x1e0] sm:$0xff]  ;;  %v141_v33 = vld [vmem:[#allocation2 + $0x218] sm:$0xff] }
 0x1cd   :  { %1504 = vadd.xlane.f32.xlu0 %v1329_v63  ;;  %v1336_v63 = vmul.f32 %v5280_v15, %v128_v6  ;;  %v5298_v9 = vpop.permute.xlu1 %694 }
 0x1ce   :  { %1506 = vadd.xlane.f32.xlu1 %v1330_v59  ;;  %v129_v59 = vld [vmem:[#allocation2 + $0x1b8] sm:$0xff]  ;;  %8078 = vst [vmem:[#allocation92_spill] sm:$0xff] %v5298_v9 }
 0x1cf   :  { %v1337_v0 = vmul.f32 %v5280_v15, %v129_v59 }
 0x1d1   :  { %1508 = vadd.xlane.f32.xlu0 %v1331_v7  ;;  %v5300_v7 = vpop.permute.xlu0 %698 }
 0x1d2   :  { %1510 = vadd.xlane.f32.xlu1 %v1332_v18  ;;  %8079 = vst [vmem:[#allocation93_spill] sm:$0xff] %v5300_v7  ;;  %v131_v18 = vld [vmem:[#allocation2 + $0x1c8] sm:$0xff]  ;;  %v133_v7 = vld [vmem:[#allocation2 + $0x1d8] sm:$0xff] }
 0x1d3   :  { %v1339_v6 = vmul.f32 %v5280_v15, %v131_v18  ;;  %v1341_v59 = vmul.f32 %v5280_v15, %v133_v7  ;;  %v137_v7 = vld [vmem:[#allocation2 + $0x1f8] sm:$0xff] }
 0x1d5   :  { %1512 = vadd.xlane.f32.xlu0 %v1333_v61  ;;  %v1193_v61 = vcombine.high %v5150_v10, %v5150_v10  ;;  %v5309_v9 = vpop.permute.xlu0 %706  ;;  %v1342_v10 = vmul.f32 %v5280_v15, %v134_v58  ;;  %v138_v58 = vld [vmem:[#allocation2 + $0x200] sm:$0xff] }
 0x1d6   :  { %1514 = vadd.xlane.f32.xlu1 %v1334_v1  ;;  %v5306_v1 = vpop.permute.xlu1 %702  ;;  %8081 = vst [vmem:[#allocation95_spill] sm:$0xff] %v5309_v9 }
 0x1d7   :  { %8080 = vst [vmem:[#allocation94_spill] sm:$0xff] %v5306_v1  ;;  %v135_v1 = vld [vmem:[#allocation2 + $0x1e8] sm:$0xff] }
 0x1d9   :  { %1516 = vadd.xlane.f32.xlu0 %v1335_v4  ;;  %v1340_v4 = vmul.f32 %v5280_v15, %v132_v54  ;;  %v5323_v54 = vpop.permute.xlu0 %714 }
 0x1da   :  { %1518 = vadd.xlane.f32.xlu1 %v1336_v63  ;;  %v5313_v63 = vrot.slane %v1193_v61, %v5153_v3  ;;  %v5321_v18 = vpop.permute.xlu1 %710  ;;  %8083 = vst [vmem:[#allocation97_spill] sm:$0xff] %v5323_v54  ;;  %v1343_v61 = vmul.f32 %v5280_v15, %v135_v1  ;;  %v139_v1 = vld [vmem:[#allocation2 + $0x208] sm:$0xff] }
 0x1db   :  { %8082 = vst [vmem:[#allocation96_spill] sm:$0xff] %v5321_v18  ;;  %v1345_v18 = vmul.f32 %v5280_v15, %v137_v7  ;;  %v143_v7 = vld [vmem:[#allocation2 + $0x228] sm:$0xff] }
 0x1dd   :  { %1520 = vadd.xlane.f32.xlu0 %v1337_v0  ;;  %v5319_v0 = vrot.slane %v5313_v63, %v5153_v3  ;;  %v5334_v5 = vpop.permute.xlu0 %722 }
 0x1de   :  { %1522 = vadd.xlane.f32.xlu1 %v1338_v36  ;;  %v136_v36 = vld [vmem:[#allocation2 + $0x1f0] sm:$0xff]  ;;  %v5331_v9 = vpop.permute.xlu1 %718  ;;  %8085 = vst [vmem:[#allocation99_spill] sm:$0xff] %v5334_v5 }
 0x1df   :  { %8084 = vst [vmem:[#allocation98_spill] sm:$0xff] %v5331_v9  ;;  %v142_v9 = vld [vmem:[#allocation2 + $0x220] sm:$0xff]  ;;  %v152_v5 = vld [vmem:[#allocation2 + $0x270] sm:$0xff] }
 0x1e1   :  { %1524 = vadd.xlane.f32.xlu0 %v1339_v6  ;;  %v1344_v6 = vmul.f32 %v5280_v15, %v136_v36 }
 0x1e2   :  { %1526 = vadd.xlane.f32.xlu1 %v1340_v4  ;;  %v5329_v4 = vrot.slane %v5319_v0, %v4966_v2  ;;  %v5339_v60 = vpop.permute.xlu1 %726 }
 0x1e3   :  { %8086 = vst [vmem:[#allocation100_spill] sm:$0xff] %v5339_v60  ;;  %v145_v60 = vld [vmem:[#allocation2 + $0x238] sm:$0xff] }
 0x1e4   :  { %v1347_v36 = vmul.f32 %v5329_v4, %v139_v1  ;;  %v1349_v15 = vmul.f32 %v5329_v4, %v141_v33  ;;  %v1353_v33 = vmul.f32 %v5329_v4, %v145_v60  ;;  %v1209_v60 = vcombine.high %v5313_v63, %v5313_v63 }
 0x1e5   :  { %1528 = vadd.xlane.f32.xlu0 %v1341_v59  ;;  %v1346_v59 = vmul.f32 %v5329_v4, %v138_v58  ;;  %v144_v58 = vld [vmem:[#allocation2 + $0x230] sm:$0xff] }
 0x1e6   :  { %1530 = vadd.xlane.f32.xlu1 %v1342_v10  ;;  %v140_v10 = vld [vmem:[#allocation2 + $0x210] sm:$0xff] }
 0x1e7   :  { %v1348_v54 = vmul.f32 %v5329_v4, %v140_v10  ;;  %v1352_v10 = vmul.f32 %v5329_v4, %v144_v58 }
 0x1e9   :  { %1532 = vadd.xlane.f32.xlu0 %v1343_v61  ;;  %v5341_v61 = vpop.permute.xlu0 %730 }
 0x1ea   :  { %1534 = vadd.xlane.f32.xlu1 %v1344_v6  ;;  %8087 = vst [vmem:[#allocation101_spill] sm:$0xff] %v5341_v61  ;;  %v1350_v6 = vmul.f32 %v5329_v4, %v142_v9  ;;  %v146_v61 = vld [vmem:[#allocation2 + $0x240] sm:$0xff] }
 0x1eb   :  { %v1354_v9 = vmul.f32 %v5329_v4, %v146_v61 }
 0x1ed   :  { %1536 = vadd.xlane.f32.xlu0 %v1345_v18  ;;  %v5345_v18 = vpop.permute.xlu1 %734  ;;  %v5348_v1 = vpop.permute.xlu0 %738 }
 0x1ee   :  { %1538 = vadd.xlane.f32.xlu1 %v1346_v59  ;;  %8088 = vst [vmem:[#allocation102_spill] sm:$0xff] %v5345_v18  ;;  %v1351_v59 = vmul.f32 %v5329_v4, %v143_v7  ;;  %8089 = vst [vmem:[#allocation103_spill] sm:$0xff] %v5348_v1  ;;  %v150_v1 = vld [vmem:[#allocation2 + $0x260] sm:$0xff] }
 0x1f1   :  { %1540 = vadd.xlane.f32.xlu0 %v1347_v36  ;;  %v147_v36 = vld [vmem:[#allocation2 + $0x248] sm:$0xff]  ;;  %v5355_v18 = vpop.permute.xlu1 %742 }
 0x1f2   :  { %1542 = vadd.xlane.f32.xlu1 %v1348_v54  ;;  %8091 = vst [vmem:[#allocation105_spill] sm:$0xff] %v5355_v18  ;;  %v1355_v7 = vmul.f32 %v5329_v4, %v147_v36  ;;  %v5370_v36 = vrot.slane %v1209_v60, %v5153_v3  ;;  %v154_v60 = vld [vmem:[#allocation2 + $0x280] sm:$0xff] }
 0x1f5   :  { %1544 = vadd.xlane.f32.xlu0 %v1349_v15  ;;  %v148_v15 = vld [vmem:[#allocation2 + $0x250] sm:$0xff] }
 0x1f6   :  { %1546 = vadd.xlane.f32.xlu1 %v1350_v6  ;;  %v1356_v58 = vmul.f32 %v5329_v4, %v148_v15 }
 0x1f9   :  { %1548 = vadd.xlane.f32.xlu0 %v1351_v59  ;;  %v149_v59 = vld [vmem:[#allocation2 + $0x258] sm:$0xff] }
 0x1fa   :  { %1550 = vadd.xlane.f32.xlu1 %v1352_v10  ;;  %v5352_v54 = vpop.xlane.xlu0 %1410  ;;  %v1357_v61 = vmul.f32 %v5329_v4, %v149_v59  ;;  %v5380_v59 = vrot.slane %v5370_v36, %v4966_v2 }
 0x1fb   :  { %8090 = vst [vmem:[#allocation104_spill] sm:$0xff] %v5352_v54 }
 0x1fd   :  { %1552 = vadd.xlane.f32.xlu0 %v1353_v33  ;;  %v1358_v33 = vmul.f32 %v5329_v4, %v150_v1 }
 0x1fe   :  { %1554 = vadd.xlane.f32.xlu1 %v1354_v9  ;;  %v5358_v6 = vpop.xlane.xlu0 %1414  ;;  %v151_v9 = vld [vmem:[#allocation2 + $0x268] sm:$0xff] }
 0x1ff   :  { %8092 = vst [vmem:[#allocation106_spill] sm:$0xff] %v5358_v6  ;;  %v5363_v10 = vpop.xlane.xlu1 %1412  ;;  %v1359_v63 = vmul.f32 %v5329_v4, %v151_v9  ;;  %v155_v9 = vld [vmem:[#allocation2 + $0x288] sm:$0xff] }
 0x200   :  { %8093 = vst [vmem:[#allocation107_spill] sm:$0xff] %v5363_v10 }
 0x201   :  { %1556 = vadd.xlane.f32.xlu0 %v1355_v7  ;;  %v1360_v7 = vmul.f32 %v5329_v4, %v152_v5  ;;  %v156_v5 = vld [vmem:[#allocation2 + $0x290] sm:$0xff] }
 0x202   :  { %1558 = vadd.xlane.f32.xlu1 %v1356_v58  ;;  %v5366_v18 = vpop.xlane.xlu0 %1416  ;;  %v153_v58 = vld [vmem:[#allocation2 + $0x278] sm:$0xff] }
 0x203   :  { %8094 = vst [vmem:[#allocation108_spill] sm:$0xff] %v5366_v18  ;;  %v5372_v15 = vpop.xlane.xlu1 %1418  ;;  %v1363_v18 = vmul.f32 %v5380_v59, %v155_v9 }
 0x204   :  { %8095 = vst [vmem:[#allocation109_spill] sm:$0xff] %v5372_v15  ;;  %v1361_v15 = vmul.f32 %v5329_v4, %v153_v58  ;;  %v158_v4 = vld [vmem:[#allocation2 + $0x2a0] sm:$0xff] }
 0x205   :  { %1560 = vadd.xlane.f32.xlu0 %v1357_v61 }
 0x206   :  { %1562 = vadd.xlane.f32.xlu1 %v1358_v33  ;;  %v5375_v6 = vpop.xlane.xlu0 %1420  ;;  %v1362_v33 = vmul.f32 %v5380_v59, %v154_v60  ;;  %v1366_v60 = vmul.f32 %v5380_v59, %v158_v4 }
 0x207   :  { %8096 = vst [vmem:[#allocation110_spill] sm:$0xff] %v5375_v6  ;;  %v5382_v1 = vpop.xlane.xlu1 %1422 }
 0x208   :  { %8097 = vst [vmem:[#allocation111_spill] sm:$0xff] %v5382_v1  ;;  %v1364_v1 = vmul.f32 %v5380_v59, %v156_v5 }
 0x209   :  { %1564 = vadd.xlane.f32.xlu0 %v1359_v63  ;;  %v157_v63 = vld [vmem:[#allocation2 + $0x298] sm:$0xff] }
 0x20a   :  { %1566 = vadd.xlane.f32.xlu1 %v1360_v7  ;;  %v5385_v61 = vpop.xlane.xlu0 %1424  ;;  %v1365_v7 = vmul.f32 %v5380_v59, %v157_v63 }
 0x20b   :  { %v5388_v6 = vpop.xlane.xlu1 %1426 }
 0x20c   :  { %8098 = vst [vmem:[#allocation112_spill] sm:$0xff] %v5388_v6 }
 0x20d   :  { %1568 = vadd.xlane.f32.xlu0 %v1361_v15  ;;  %v159_v15 = vld [vmem:[#allocation2 + $0x2a8] sm:$0xff] }
 0x20e   :  { %1570 = vadd.xlane.f32.xlu1 %v1362_v33  ;;  %v5391_v10 = vpop.xlane.xlu0 %1428  ;;  %v160_v33 = vld [vmem:[#allocation2 + $0x2b0] sm:$0xff]  ;;  %v1367_v9 = vmul.f32 %v5380_v59, %v159_v15 }
 0x20f   :  { %8099 = vst [vmem:[#allocation113_spill] sm:$0xff] %v5391_v10  ;;  %v5394_v54 = vpop.xlane.xlu1 %1430 }
 0x210   :  { %8100 = vst [vmem:[#allocation114_spill] sm:$0xff] %v5394_v54  ;;  %v1368_v54 = vmul.f32 %v5380_v59, %v160_v33 }
 0x211   :  { %1572 = vadd.xlane.f32.xlu0 %v1363_v18  ;;  %v161_v18 = vld [vmem:[#allocation2 + $0x2b8] sm:$0xff] }
 0x212   :  { %1574 = vadd.xlane.f32.xlu1 %v1364_v1  ;;  %v5397_v58 = vpop.xlane.xlu0 %1432  ;;  %v162_v1 = vld [vmem:[#allocation2 + $0x2c0] sm:$0xff]  ;;  %v1369_v63 = vmul.f32 %v5380_v59, %v161_v18 }
 0x213   :  { %8101 = vst [vmem:[#allocation115_spill] sm:$0xff] %v5397_v58  ;;  %v5400_v6 = vpop.xlane.xlu1 %1434 }
 0x214   :  { %8102 = vst [vmem:[#allocation116_spill] sm:$0xff] %v5400_v6  ;;  %v1370_v6 = vmul.f32 %v5380_v59, %v162_v1 }
 0x215   :  { %1576 = vadd.xlane.f32.xlu0 %v1365_v7  ;;  %v163_v7 = vld [vmem:[#allocation2 + $0x2c8] sm:$0xff] }
 0x216   :  { %1578 = vadd.xlane.f32.xlu1 %v1366_v60  ;;  %v5403_v5 = vpop.xlane.xlu0 %1436  ;;  %v164_v60 = vld [vmem:[#allocation2 + $0x2d0] sm:$0xff]  ;;  %v1371_v15 = vmul.f32 %v5380_v59, %v163_v7 }
 0x217   :  { %8103 = vst [vmem:[#allocation117_spill] sm:$0xff] %v5403_v5  ;;  %v5406_v10 = vpop.xlane.xlu1 %1438 }
 0x218   :  { %8104 = vst [vmem:[#allocation118_spill] sm:$0xff] %v5406_v10  ;;  %v1372_v10 = vmul.f32 %v5380_v59, %v164_v60 }
 0x219   :  { %1580 = vadd.xlane.f32.xlu0 %v1367_v9  ;;  %v165_v9 = vld [vmem:[#allocation2 + $0x2d8] sm:$0xff] }
 0x21a   :  { %1582 = vadd.xlane.f32.xlu1 %v1368_v54  ;;  %v5409_v4 = vpop.xlane.xlu0 %1440  ;;  %v166_v54 = vld [vmem:[#allocation2 + $0x2e0] sm:$0xff]  ;;  %v1373_v18 = vmul.f32 %v5380_v59, %v165_v9 }
 0x21b   :  { %8105 = vst [vmem:[#allocation119_spill] sm:$0xff] %v5409_v4  ;;  %v5412_v58 = vpop.xlane.xlu1 %1442 }
 0x21c   :  { %8106 = vst [vmem:[#allocation120_spill] sm:$0xff] %v5412_v58  ;;  %v1374_v58 = vmul.f32 %v5380_v59, %v166_v54 }
 0x21d   :  { %1584 = vadd.xlane.f32.xlu0 %v1369_v63  ;;  %v167_v63 = vld [vmem:[#allocation2 + $0x2e8] sm:$0xff] }
 0x21e   :  { %1586 = vadd.xlane.f32.xlu1 %v1370_v6  ;;  %v5415_v33 = vpop.xlane.xlu0 %1444  ;;  %v1239_v6 = vcombine.high %v5319_v0, %v5319_v0  ;;  %v1375_v60 = vmul.f32 %v5380_v59, %v167_v63 }
 0x21f   :  { %8107 = vst [vmem:[#allocation121_spill] sm:$0xff] %v5415_v33  ;;  %v5418_v5 = vpop.xlane.xlu1 %1446  ;;  %v168_v33 = vld [vmem:[#allocation2 + $0x2f0] sm:$0xff] }
 0x220   :  { %8108 = vst [vmem:[#allocation122_spill] sm:$0xff] %v5418_v5  ;;  %v5433_v9 = vrot.slane %v1239_v6, %v4966_v2 }
 0x221   :  { %1588 = vadd.xlane.f32.xlu0 %v1371_v15  ;;  %v1376_v15 = vmul.f32 %v5380_v59, %v168_v33 }
 0x222   :  { %1590 = vadd.xlane.f32.xlu1 %v1372_v10  ;;  %v5421_v1 = vpop.xlane.xlu0 %1448  ;;  %v169_v10 = vld [vmem:[#allocation2 + $0x2f8] sm:$0xff] }
 0x223   :  { %8109 = vst [vmem:[#allocation123_spill] sm:$0xff] %v5421_v1  ;;  %v5426_v7 = vpop.xlane.xlu1 %1450  ;;  %v170_v1 = vld [vmem:[#allocation2 + $0x300] sm:$0xff]  ;;  %v1377_v0 = vmul.f32 %v5380_v59, %v169_v10 }
 0x224   :  { %8110 = vst [vmem:[#allocation124_spill] sm:$0xff] %v5426_v7  ;;  %v174_v59 = vld [vmem:[#allocation2 + $0x320] sm:$0xff] }
 0x225   :  { %1592 = vadd.xlane.f32.xlu0 %v1373_v18  ;;  %v1378_v18 = vmul.f32 %v5433_v9, %v170_v1  ;;  %v1382_v10 = vmul.f32 %v5433_v9, %v174_v59 }
 0x226   :  { %1594 = vadd.xlane.f32.xlu1 %v1374_v58  ;;  %v5429_v5 = vpop.xlane.xlu0 %1452  ;;  %v171_v58 = vld [vmem:[#allocation2 + $0x308] sm:$0xff] }
 0x227   :  { %8111 = vst [vmem:[#allocation125_spill] sm:$0xff] %v5429_v5  ;;  %v5435_v54 = vpop.xlane.xlu1 %1454  ;;  %v172_v5 = vld [vmem:[#allocation2 + $0x310] sm:$0xff]  ;;  %v1379_v33 = vmul.f32 %v5433_v9, %v171_v58 }
 0x228   :  { %8112 = vst [vmem:[#allocation126_spill] sm:$0xff] %v5435_v54  ;;  %v1380_v54 = vmul.f32 %v5433_v9, %v172_v5 }
 0x229   :  { %1596 = vadd.xlane.f32.xlu0 %v1375_v60  ;;  %v173_v60 = vld [vmem:[#allocation2 + $0x318] sm:$0xff] }
 0x22a   :  { %1598 = vadd.xlane.f32.xlu1 %v1376_v15  ;;  %v5438_v7 = vpop.xlane.xlu0 %1456  ;;  %v1381_v15 = vmul.f32 %v5433_v9, %v173_v60 }
 0x22b   :  { %v5441_v63 = vpop.xlane.xlu1 %1458 }
 0x22c   :  { %8113 = vst [vmem:[#allocation127_spill] sm:$0xff] %v5441_v63 }
 0x22d   :  { %1600 = vadd.xlane.f32.xlu0 %v1377_v0  ;;  %v175_v0 = vld [vmem:[#allocation2 + $0x328] sm:$0xff] }
 0x22e   :  { %1602 = vadd.xlane.f32.xlu1 %v1378_v18  ;;  %v5444_v6 = vpop.xlane.xlu0 %1460  ;;  %v176_v18 = vld [vmem:[#allocation2 + $0x330] sm:$0xff]  ;;  %v1383_v58 = vmul.f32 %v5433_v9, %v175_v0 }
 0x22f   :  { %8114 = vst [vmem:[#allocation128_spill] sm:$0xff] %v5444_v6  ;;  %v5447_v4 = vpop.xlane.xlu1 %1462 }
 0x230   :  { %8115 = vst [vmem:[#allocation129_spill] sm:$0xff] %v5447_v4  ;;  %v1384_v4 = vmul.f32 %v5433_v9, %v176_v18 }
 0x231   :  { %1604 = vadd.xlane.f32.xlu0 %v1379_v33  ;;  %v177_v33 = vld [vmem:[#allocation2 + $0x338] sm:$0xff] }
 0x232   :  { %1606 = vadd.xlane.f32.xlu1 %v1380_v54  ;;  %v5450_v1 = vpop.xlane.xlu0 %1464  ;;  %v178_v54 = vld [vmem:[#allocation2 + $0x340] sm:$0xff]  ;;  %v1385_v60 = vmul.f32 %v5433_v9, %v177_v33 }
 0x233   :  { %8116 = vst [vmem:[#allocation130_spill] sm:$0xff] %v5450_v1  ;;  %v5453_v63 = vpop.xlane.xlu1 %1466 }
 0x234   :  { %8117 = vst [vmem:[#allocation131_spill] sm:$0xff] %v5453_v63  ;;  %v1386_v63 = vmul.f32 %v5433_v9, %v178_v54 }
 0x235   :  { %1608 = vadd.xlane.f32.xlu0 %v1381_v15  ;;  %v179_v15 = vld [vmem:[#allocation2 + $0x348] sm:$0xff] }
 0x236   :  { %1610 = vadd.xlane.f32.xlu1 %v1382_v10  ;;  %v5456_v5 = vpop.xlane.xlu0 %1468  ;;  %v180_v10 = vld [vmem:[#allocation2 + $0x350] sm:$0xff]  ;;  %v1387_v0 = vmul.f32 %v5433_v9, %v179_v15 }
 0x237   :  { %8118 = vst [vmem:[#allocation132_spill] sm:$0xff] %v5456_v5  ;;  %v5459_v6 = vpop.xlane.xlu1 %1470 }
 0x238   :  { %8119 = vst [vmem:[#allocation133_spill] sm:$0xff] %v5459_v6  ;;  %v1388_v6 = vmul.f32 %v5433_v9, %v180_v10 }
 0x239   :  { %1612 = vadd.xlane.f32.xlu0 %v1383_v58  ;;  %v181_v58 = vld [vmem:[#allocation2 + $0x358] sm:$0xff] }
 0x23a   :  { %1614 = vadd.xlane.f32.xlu1 %v1384_v4  ;;  %v5462_v59 = vpop.xlane.xlu0 %1472  ;;  %v182_v4 = vld [vmem:[#allocation2 + $0x360] sm:$0xff]  ;;  %v1389_v33 = vmul.f32 %v5433_v9, %v181_v58 }
 0x23b   :  { %8120 = vst [vmem:[#allocation134_spill] sm:$0xff] %v5462_v59  ;;  %v5465_v1 = vpop.xlane.xlu1 %1474 }
 0x23c   :  { %8121 = vst [vmem:[#allocation135_spill] sm:$0xff] %v5465_v1  ;;  %v1390_v1 = vmul.f32 %v5433_v9, %v182_v4 }
 0x23d   :  { %1616 = vadd.xlane.f32.xlu0 %v1385_v60  ;;  %v183_v60 = vld [vmem:[#allocation2 + $0x368] sm:$0xff] }
 0x23e   :  { %1618 = vadd.xlane.f32.xlu1 %v1386_v63  ;;  %v5468_v18 = vpop.xlane.xlu0 %1476  ;;  %v1241_v63 = vcombine.high %v5370_v36, %v5370_v36  ;;  %v1391_v10 = vmul.f32 %v5433_v9, %v183_v60 }
 0x23f   :  { %8122 = vst [vmem:[#allocation136_spill] sm:$0xff] %v5468_v18  ;;  %v5471_v5 = vpop.xlane.xlu1 %1478  ;;  %v184_v18 = vld [vmem:[#allocation2 + $0x370] sm:$0xff] }
 0x240   :  { %8123 = vst [vmem:[#allocation137_spill] sm:$0xff] %v5471_v5  ;;  %v5486_v58 = vrot.slane %v1241_v63, %v4966_v2 }
 0x241   :  { %1620 = vadd.xlane.f32.xlu0 %v1387_v0  ;;  %v1392_v0 = vmul.f32 %v5433_v9, %v184_v18 }
 0x242   :  { %1622 = vadd.xlane.f32.xlu1 %v1388_v6  ;;  %v5474_v54 = vpop.xlane.xlu0 %1480  ;;  %v185_v6 = vld [vmem:[#allocation2 + $0x378] sm:$0xff] }
 0x243   :  { %8124 = vst [vmem:[#allocation138_spill] sm:$0xff] %v5474_v54  ;;  %v5479_v15 = vpop.xlane.xlu1 %1482  ;;  %v186_v54 = vld [vmem:[#allocation2 + $0x380] sm:$0xff]  ;;  %v1393_v36 = vmul.f32 %v5433_v9, %v185_v6 }
 0x244   :  { %8125 = vst [vmem:[#allocation139_spill] sm:$0xff] %v5479_v15  ;;  %v190_v9 = vld [vmem:[#allocation2 + $0x3a0] sm:$0xff] }
 0x245   :  { %1624 = vadd.xlane.f32.xlu0 %v1389_v33  ;;  %v1394_v33 = vmul.f32 %v5486_v58, %v186_v54  ;;  %v1398_v6 = vmul.f32 %v5486_v58, %v190_v9 }
 0x246   :  { %1626 = vadd.xlane.f32.xlu1 %v1390_v1  ;;  %v5482_v5 = vpop.xlane.xlu0 %1484  ;;  %v187_v1 = vld [vmem:[#allocation2 + $0x388] sm:$0xff] }
 0x247   :  { %8126 = vst [vmem:[#allocation140_spill] sm:$0xff] %v5482_v5  ;;  %v5488_v4 = vpop.xlane.xlu1 %1486  ;;  %v188_v5 = vld [vmem:[#allocation2 + $0x390] sm:$0xff]  ;;  %v1395_v18 = vmul.f32 %v5486_v58, %v187_v1 }
 0x248   :  { %8127 = vst [vmem:[#allocation141_spill] sm:$0xff] %v5488_v4  ;;  %v1396_v4 = vmul.f32 %v5486_v58, %v188_v5 }
 0x249   :  { %1628 = vadd.xlane.f32.xlu0 %v1391_v10  ;;  %v189_v10 = vld [vmem:[#allocation2 + $0x398] sm:$0xff] }
 0x24a   :  { %1630 = vadd.xlane.f32.xlu1 %v1392_v0  ;;  %v5491_v15 = vpop.xlane.xlu0 %1488  ;;  %v1397_v0 = vmul.f32 %v5486_v58, %v189_v10 }
 0x24b   :  { %8128 = vst [vmem:[#allocation142_spill] sm:$0xff] %v5491_v15  ;;  %v5494_v60 = vpop.xlane.xlu1 %1490  ;;  %v8140_v15 = vlaneseq }
 0x24c   :  { %8129 = vst [vmem:[#allocation143_spill] sm:$0xff] %v5494_v60 }
 0x24d   :  { %1632 = vadd.xlane.f32.xlu0 %v1393_v36  ;;  %v191_v36 = vld [vmem:[#allocation2 + $0x3a8] sm:$0xff] }
 0x24e   :  { %1634 = vadd.xlane.f32.xlu1 %v1394_v33  ;;  %v5497_v63 = vpop.xlane.xlu0 %1492  ;;  %v192_v33 = vld [vmem:[#allocation2 + $0x3b0] sm:$0xff]  ;;  %v1399_v1 = vmul.f32 %v5486_v58, %v191_v36  ;;  %v5520_v36 = vld [vmem:[#allocation7] sm:$0xff] }
 0x24f   :  { %8130 = vst [vmem:[#allocation144_spill] sm:$0xff] %v5497_v63  ;;  %v5500_v59 = vpop.xlane.xlu1 %1494 }
 0x250   :  { %8131 = vst [vmem:[#allocation145_spill] sm:$0xff] %v5500_v59  ;;  %v1400_v59 = vmul.f32 %v5486_v58, %v192_v33 }
 0x251   :  { %1636 = vadd.xlane.f32.xlu0 %v1395_v18  ;;  %v193_v18 = vld [vmem:[#allocation2 + $0x3b8] sm:$0xff] }
 0x252   :  { %1638 = vadd.xlane.f32.xlu1 %v1396_v4  ;;  %v5503_v54 = vpop.xlane.xlu0 %1496  ;;  %v194_v4 = vld [vmem:[#allocation2 + $0x3c0] sm:$0xff]  ;;  %v1401_v10 = vmul.f32 %v5486_v58, %v193_v18  ;;  %v197_v18 = vld [vmem:[#allocation2 + $0x3d8] sm:$0xff] }
 0x253   :  { %8132 = vst [vmem:[#allocation146_spill] sm:$0xff] %v5503_v54  ;;  %v5506_v60 = vpop.xlane.xlu1 %1498 }
 0x254   :  { %8133 = vst [vmem:[#allocation147_spill] sm:$0xff] %v5506_v60  ;;  %v1402_v60 = vmul.f32 %v5486_v58, %v194_v4  ;;  %v5530_v4 = vrot.slane %v5520_v36, %v5153_v3 }
 0x255   :  { %1640 = vadd.xlane.f32.xlu0 %v1397_v0  ;;  %v195_v0 = vld [vmem:[#allocation2 + $0x3c8] sm:$0xff] }
 0x256   :  { %1642 = vadd.xlane.f32.xlu1 %v1398_v6  ;;  %v5509_v5 = vpop.xlane.xlu0 %1500  ;;  %v196_v6 = vld [vmem:[#allocation2 + $0x3d0] sm:$0xff]  ;;  %v1403_v33 = vmul.f32 %v5486_v58, %v195_v0 }
 0x257   :  { %8134 = vst [vmem:[#allocation148_spill] sm:$0xff] %v5509_v5  ;;  %v5512_v63 = vpop.xlane.xlu1 %1502  ;;  %v1405_v5 = vmul.f32 %v5486_v58, %v197_v18 }
 0x258   :  { %8135 = vst [vmem:[#allocation149_spill] sm:$0xff] %v5512_v63 }
 0x259   :  { %1644 = vadd.xlane.f32.xlu0 %v1399_v1  ;;  %v1404_v1 = vmul.f32 %v5486_v58, %v196_v6  ;;  %v199_v6 = vld [vmem:[#allocation2 + $0x3e8] sm:$0xff] }
 0x25a   :  { %1646 = vadd.xlane.f32.xlu1 %v1400_v59  ;;  %v5515_v9 = vpop.xlane.xlu0 %1504 }
 0x25b   :  { %8136 = vst [vmem:[#allocation150_spill] sm:$0xff] %v5515_v9  ;;  %v5518_v54 = vpop.xlane.xlu1 %1506  ;;  %v198_v9 = vld [vmem:[#allocation2 + $0x3e0] sm:$0xff] }
 0x25c   :  { %8137 = vst [vmem:[#allocation151_spill] sm:$0xff] %v5518_v54  ;;  %v1406_v0 = vmul.f32 %v5486_v58, %v198_v9  ;;  %v201_v9 = vld [vmem:[#allocation2 + $0x3f8] sm:$0xff] }
 0x25d   :  { %1648 = vadd.xlane.f32.xlu0 %v1401_v10  ;;  %v5534_v10 = vand.u32 127, %v8140_v15 }
 0x25e   :  { %1650 = vadd.xlane.f32.xlu1 %v1402_v60  ;;  %v5523_v63 = vpop.xlane.xlu0 %1508 }
 0x25f   :  { %8138 = vst [vmem:[#allocation152_spill] sm:$0xff] %v5523_v63  ;;  %v5526_v59 = vpop.xlane.xlu1 %1510  ;;  %v5543_v63 = vrot.slane %v5530_v4, %v5153_v3  ;;  %vm744_vm0 = vcmp.eq.s32.totalorder %v5534_v10, %v4984_v11  ;;  %vm745_vm1 = vcmp.eq.s32.totalorder %v5534_v10, %v4988_v13  ;;  %v1409_v11 = vmul.f32 %v5486_v58, %v201_v9 }
 0x260   :  { %8139 = vst [vmem:[#allocation153_spill] sm:$0xff] %v5526_v59  ;;  %v200_v59 = vld [vmem:[#allocation2 + $0x3f0] sm:$0xff]  ;;  %vm746_vm2 = vcmp.eq.s32.totalorder %v5534_v10, %v4986_v12  ;;  %vm747_vm3 = vcmp.eq.s32.totalorder %v5534_v10, %v4990_v14  ;;  %vm748_vm4 = vcmp.eq.s32.totalorder %v5534_v10, %v4993_v16  ;;  %vm749_vm5 = vcmp.eq.s32.totalorder %v5534_v10, %v4995_v17 }
 0x261   :  { %1652 = vadd.xlane.f32.xlu0 %v1403_v33  ;;  %v1407_v33 = vmul.f32 %v5486_v58, %v199_v6  ;;  %vm750_vm6 = vcmp.eq.s32.totalorder %v5534_v10, %v5000_v19  ;;  %vm751_vm7 = vcmp.eq.s32.totalorder %v5534_v10, %v5002_v20  ;;  %vm752_vm8 = vcmp.eq.s32.totalorder %v5534_v10, %v5004_v21 }
 0x262   :  { %1654 = vadd.xlane.f32.xlu1 %v1404_v1  ;;  %v5536_v60 = vpop.xlane.xlu0 %1512  ;;  %v1408_v1 = vmul.f32 %v5486_v58, %v200_v59  ;;  %vm753_vm9 = vcmp.eq.s32.totalorder %v5534_v10, %v5006_v22  ;;  %vm754_vm10 = vcmp.eq.s32.totalorder %v5534_v10, %v5008_v23  ;;  %vm755_vm11 = vcmp.eq.s32.totalorder %v5534_v10, %v5010_v24 }
 0x263   :  { %8141 = vst [vmem:[#allocation154_spill] sm:$0xff] %v5536_v60  ;;  %v5539_v54 = vpop.xlane.xlu1 %1514  ;;  %v7924_v60 = vmov 0.0   ;;  %vm756_vm12 = vcmp.eq.s32.totalorder %v5534_v10, %v5012_v25  ;;  %v1682_v24 = vcombine.high %v5530_v4, %v5530_v4  ;;  %vm757_vm13 = vcmp.eq.s32.totalorder %v5534_v10, %v5014_v26 }
 0x264   :  { %8142 = vst [vmem:[#allocation155_spill] sm:$0xff] %v5539_v54  ;;  %v5555_v54 = vrot.slane %v5543_v63, %v4966_v2  ;;  %v5593_v14 = vsel %vm748_vm4, 1.0, %v7924_v60  ;;  %v5611_v17 = vsel %vm750_vm6, 1.0, %v7924_v60  ;;  %v5629_v20 = vsel %vm752_vm8, 1.0, %v7924_v60 }
 0x265   :  { %1656 = vadd.xlane.f32.xlu0 %v1405_v5  ;;  %v5558_v5 = vsel %vm744_vm0, 1.0, %v7924_v60  ;;  %8149 = vst [vmem:[#allocation162_spill] sm:$0xff] %v5593_v14  ;;  %8152 = vst [vmem:[#allocation165_spill] sm:$0xff] %v5611_v17  ;;  %v5647_v22 = vsel %vm754_vm10, 1.0, %v7924_v60  ;;  %vm758_vm14 = vcmp.eq.s32.totalorder %v5534_v10, %v5016_v27  ;;  %v5685_v26 = vrot.slane %v1682_v24, %v5153_v3 }
 0x266   :  { %1658 = vadd.xlane.f32.xlu1 %v1406_v0  ;;  %v5548_v15 = vpop.xlane.xlu0 %1516  ;;  %8145 = vst [vmem:[#allocation158_spill] sm:$0xff] %v5558_v5  ;;  %v1884_v6 = vmul.f32 %v5558_v5, %v5555_v54  ;;  %8156 = vst [vmem:[#allocation169_spill] sm:$0xff] %v5629_v20  ;;  %vm759_vm15 = vcmp.eq.s32.totalorder %v5534_v10, %v5018_v28  ;;  %vm760_vm0 = vcmp.eq.s32.totalorder %v5534_v10, %v5020_v29 }
 0x267   :  { %8143 = vst [vmem:[#allocation156_spill] sm:$0xff] %v5548_v15  ;;  %v5551_v18 = vpop.xlane.xlu1 %1518  ;;  %v5575_v15 = vsel %vm746_vm2, 1.0, %v7924_v60  ;;  %8159 = vst [vmem:[#allocation172_spill] sm:$0xff] %v5647_v22  ;;  %v5707_v28 = vrot.slane %v5685_v26, %v4966_v2  ;;  %v5710_v29 = vsel %vm760_vm0, 1.0, %v7924_v60  ;;  %vm762_vm2 = vcmp.eq.s32.totalorder %v5534_v10, %v5024_v31 }
 0x268   :  { %8144 = vst [vmem:[#allocation157_spill] sm:$0xff] %v5551_v18  ;;  %v5572_v18 = vsel %vm745_vm1, 1.0, %v7924_v60  ;;  %8147 = vst [vmem:[#allocation160_spill] sm:$0xff] %v5575_v15  ;;  %vm761_vm1 = vcmp.eq.s32.totalorder %v5534_v10, %v5022_v30  ;;  %v5728_v30 = vsel %vm762_vm2, 1.0, %v7924_v60  ;;  %vm764_vm4 = vcmp.eq.s32.totalorder %v5534_v10, %v5029_v34 }
 0x269   :  { %1660 = vadd.xlane.f32.xlu0 %v1407_v33  ;;  %8146 = vst [vmem:[#allocation159_spill] sm:$0xff] %v5572_v18  ;;  %v1885_v13 = vmul.f32 %v5572_v18, %v5555_v54  ;;  %v1886_v33 = vmul.f32 %v5575_v15, %v5555_v54  ;;  %v5608_v15 = vsel %vm749_vm5, 1.0, %v7924_v60  ;;  %8168 = vst [vmem:[#allocation181_spill] sm:$0xff] %v5710_v29  ;;  %v5725_v5 = vsel %vm761_vm1, 1.0, %v7924_v60 }
 0x26a   :  { %1662 = vadd.xlane.f32.xlu1 %v1408_v1  ;;  %v5565_v59 = vpop.xlane.xlu0 %1520  ;;  %v5590_v1 = vsel %vm747_vm3, 1.0, %v7924_v60  ;;  %8151 = vst [vmem:[#allocation164_spill] sm:$0xff] %v5608_v15  ;;  %8171 = vst [vmem:[#allocation184_spill] sm:$0xff] %v5725_v5  ;;  %vm763_vm3 = vcmp.eq.s32.totalorder %v5534_v10, %v5026_v32  ;;  %v5746_v32 = vsel %vm764_vm4, 1.0, %v7924_v60  ;;  %vm765_vm5 = vcmp.eq.s32.totalorder %v5534_v10, %v5031_v35 }
 0x26b   :  { %v5567_v0 = vpop.xlane.xlu1 %1522  ;;  %8148 = vst [vmem:[#allocation161_spill] sm:$0xff] %v5590_v1  ;;  %v1887_v9 = vmul.f32 %v5590_v1, %v5555_v54  ;;  %v5626_v1 = vsel %vm751_vm7, 1.0, %v7924_v60  ;;  %8172 = vst [vmem:[#allocation185_spill] sm:$0xff] %v5728_v30  ;;  %vm766_vm6 = vcmp.eq.s32.totalorder %v5534_v10, %v5036_v37  ;;  %vm767_vm7 = vcmp.eq.s32.totalorder %v5534_v10, %v5038_v38 }
 0x26c   :  { %8155 = vst [vmem:[#allocation168_spill] sm:$0xff] %v5626_v1  ;;  %8176 = vst [vmem:[#allocation189_spill] sm:$0xff] %v5746_v32  ;;  %v5764_v35 = vsel %vm766_vm6, 1.0, %v7924_v60  ;;  %vm768_vm8 = vcmp.eq.s32.totalorder %v5534_v10, %v5040_v39  ;;  %vm770_vm10 = vcmp.eq.s32.totalorder %v5534_v10, %v5044_v41  ;;  %vm776_vm0 = vcmp.eq.s32.totalorder %v5534_v10, %v5056_v47 }
 0x26d   :  { %1664 = vadd.xlane.f32.xlu0 %v1409_v11  ;;  %8180 = vst [vmem:[#allocation193_spill] sm:$0xff] %v5764_v35  ;;  %v5782_v38 = vsel %vm768_vm8, 1.0, %v7924_v60  ;;  %vm777_vm1 = vcmp.eq.s32.totalorder %v5534_v10, %v5058_v48  ;;  %vm778_vm2 = vcmp.eq.s32.totalorder %v5534_v10, %v5060_v49  ;;  %vm780_vm4 = vcmp.eq.s32.totalorder %v5534_v10, %v5065_v52 }
 0x26e   :  { %2012 = vadd.xlane.f32.xlu1 %v1884_v6  ;;  %v5581_v12 = vpop.xlane.xlu0 %1524  ;;  %v1888_v6 = vmul.f32 %v5593_v14, %v5555_v54  ;;  %v1890_v14 = vmul.f32 %v5611_v17, %v5555_v54  ;;  %v1892_v17 = vmul.f32 %v5629_v20, %v5555_v54  ;;  %v1894_v20 = vmul.f32 %v5647_v22, %v5555_v54 }
 0x26f   :  { %v5585_v58 = vpop.xlane.xlu1 %1526  ;;  %8184 = vst [vmem:[#allocation197_spill] sm:$0xff] %v5782_v38  ;;  %v5877_v48 = vsel %vm778_vm2, 1.0, %v7924_v60  ;;  %vm782_vm6 = vcmp.eq.s32.totalorder %v5534_v10, %v5072_v55  ;;  %vm784_vm8 = vcmp.eq.s32.totalorder %v5534_v10, %v5076_v57  ;;  %v8218_v57 = vld [vmem:[#allocation22_spill] sm:$0xff] }
 0x270   :  { %8204 = vst [vmem:[#allocation217_spill] sm:$0xff] %v5877_v48 }
 0x271   :  { %2014 = vadd.xlane.f32.xlu0 %v1885_v13  ;;  %v1889_v13 = vmul.f32 %v5608_v15, %v5555_v54  ;;  %v5644_v15 = vsel %vm753_vm9, 1.0, %v7924_v60  ;;  %vm769_vm9 = vcmp.eq.s32.totalorder %v5534_v10, %v5042_v40  ;;  %v5800_v40 = vsel %vm770_vm10, 1.0, %v7924_v60 }
 0x272   :  { %2016 = vadd.xlane.f32.xlu1 %v1886_v33  ;;  %v5599_v16 = vpop.xlane.xlu0 %1528  ;;  %8158 = vst [vmem:[#allocation171_spill] sm:$0xff] %v5644_v15  ;;  %8188 = vst [vmem:[#allocation201_spill] sm:$0xff] %v5800_v40  ;;  %vm786_vm10 = vcmp.eq.s32.totalorder %v5534_v10, %v8218_v57 }
 0x273   :  { %v5603_v11 = vpop.xlane.xlu1 %1530 }
 0x274   :  { %8150 = vst [vmem:[#allocation163_spill] sm:$0xff] %v5603_v11 }
 0x275   :  { %2018 = vadd.xlane.f32.xlu0 %v1887_v9  ;;  %v1891_v9 = vmul.f32 %v5626_v1, %v5555_v54  ;;  %v5662_v1 = vsel %vm755_vm11, 1.0, %v7924_v60  ;;  %vm771_vm11 = vcmp.eq.s32.totalorder %v5534_v10, %v5046_v42 }
 0x276   :  { %2020 = vadd.xlane.f32.xlu1 %v1888_v6  ;;  %v5617_v19 = vpop.xlane.xlu0 %1532  ;;  %8160 = vst [vmem:[#allocation173_spill] sm:$0xff] %v5662_v1 }
 0x277   :  { %8153 = vst [vmem:[#allocation166_spill] sm:$0xff] %v5617_v19  ;;  %v5621_v33 = vpop.xlane.xlu1 %1534 }
 0x278   :  { %8154 = vst [vmem:[#allocation167_spill] sm:$0xff] %v5621_v33 }
 0x279   :  { %2022 = vadd.xlane.f32.xlu0 %v1889_v13 }
 0x27a   :  { %2024 = vadd.xlane.f32.xlu1 %v1890_v14  ;;  %v5635_v21 = vpop.xlane.xlu0 %1536  ;;  %v1893_v14 = vmul.f32 %v5644_v15, %v5555_v54  ;;  %v5682_v15 = vsel %vm757_vm13, 1.0, %v7924_v60  ;;  %vm773_vm13 = vcmp.eq.s32.totalorder %v5534_v10, %v5050_v44  ;;  %v1712_v44 = vcombine.high %v5543_v63, %v5543_v63 }
 0x27b   :  { %8157 = vst [vmem:[#allocation170_spill] sm:$0xff] %v5635_v21  ;;  %v5639_v6 = vpop.xlane.xlu1 %1538  ;;  %8163 = vst [vmem:[#allocation176_spill] sm:$0xff] %v5682_v15 }
 0x27d   :  { %2026 = vadd.xlane.f32.xlu0 %v1891_v9  ;;  %v5667_v9 = vsel %vm756_vm12, 1.0, %v7924_v60  ;;  %vm772_vm12 = vcmp.eq.s32.totalorder %v5534_v10, %v5048_v43 }
 0x27e   :  { %2028 = vadd.xlane.f32.xlu1 %v1892_v17  ;;  %v5653_v23 = vpop.xlane.xlu0 %1540  ;;  %8161 = vst [vmem:[#allocation174_spill] sm:$0xff] %v5667_v9  ;;  %v1895_v17 = vmul.f32 %v5662_v1, %v5555_v54  ;;  %v1896_v4 = vmul.f32 %v5667_v9, %v5555_v54  ;;  %v5703_v1 = vsel %vm759_vm15, 1.0, %v7924_v60  ;;  %v5818_v42 = vsel %vm772_vm12, 1.0, %v7924_v60 }
 0x27f   :  { %v5657_v13 = vpop.xlane.xlu1 %1542  ;;  %8167 = vst [vmem:[#allocation180_spill] sm:$0xff] %v5703_v1  ;;  %8192 = vst [vmem:[#allocation205_spill] sm:$0xff] %v5818_v42  ;;  %vm775_vm15 = vcmp.eq.s32.totalorder %v5534_v10, %v5054_v46  ;;  %v5856_v46 = vrot.slane %v1712_v44, %v4966_v2 }
 0x281   :  { %2030 = vadd.xlane.f32.xlu0 %v1893_v14  ;;  %v5688_v14 = vsel %vm758_vm14, 1.0, %v7924_v60  ;;  %vm774_vm14 = vcmp.eq.s32.totalorder %v5534_v10, %v5052_v45 }
 0x282   :  { %2032 = vadd.xlane.f32.xlu1 %v1894_v20  ;;  %v5673_v25 = vpop.xlane.xlu0 %1544  ;;  %8164 = vst [vmem:[#allocation177_spill] sm:$0xff] %v5688_v14  ;;  %v1897_v20 = vmul.f32 %v5682_v15, %v5555_v54  ;;  %v1898_v24 = vmul.f32 %v5688_v14, %v5555_v54  ;;  %v1900_v15 = vmul.f32 %v5710_v29, %v5707_v28 }
 0x283   :  { %v5677_v22 = vpop.xlane.xlu1 %1546 }
 0x284   :  { %8162 = vst [vmem:[#allocation175_spill] sm:$0xff] %v5677_v22  ;;  %v8490_v22 = vld [vmem:[#allocation137_spill] sm:$0xff] }
 0x285   :  { %2034 = vadd.xlane.f32.xlu0 %v1895_v17 }
 0x286   :  { %2036 = vadd.xlane.f32.xlu1 %v1896_v4  ;;  %v5694_v27 = vpop.xlane.xlu0 %1548  ;;  %v1899_v4 = vmul.f32 %v5703_v1, %v5555_v54  ;;  %v1901_v54 = vmul.f32 %v5725_v5, %v5707_v28  ;;  %v5743_v1 = vsel %vm763_vm3, 1.0, %v7924_v60  ;;  %v5761_v5 = vsel %vm765_vm5, 1.0, %v7924_v60 }
 0x287   :  { %8165 = vst [vmem:[#allocation178_spill] sm:$0xff] %v5694_v27  ;;  %v5698_v9 = vpop.xlane.xlu1 %1550  ;;  %8175 = vst [vmem:[#allocation188_spill] sm:$0xff] %v5743_v1  ;;  %vm779_vm3 = vcmp.eq.s32.totalorder %v5534_v10, %v5062_v50  ;;  %v5895_v50 = vsel %vm780_vm4, 1.0, %v7924_v60  ;;  %vm781_vm5 = vcmp.eq.s32.totalorder %v5534_v10, %v5067_v53  ;;  %v5913_v53 = vsel %vm782_vm6, 1.0, %v7924_v60 }
 0x288   :  { %8166 = vst [vmem:[#allocation179_spill] sm:$0xff] %v5698_v9  ;;  %8179 = vst [vmem:[#allocation192_spill] sm:$0xff] %v5761_v5 }
 0x289   :  { %2038 = vadd.xlane.f32.xlu0 %v1897_v20  ;;  %8208 = vst [vmem:[#allocation221_spill] sm:$0xff] %v5895_v50  ;;  %8212 = vst [vmem:[#allocation225_spill] sm:$0xff] %v5913_v53 }
 0x28a   :  { %2040 = vadd.xlane.f32.xlu1 %v1898_v24  ;;  %v5716_v17 = vpop.xlane.xlu0 %1552  ;;  %v1902_v24 = vmul.f32 %v5728_v30, %v5707_v28  ;;  %v1904_v30 = vmul.f32 %v5746_v32, %v5707_v28  ;;  %v1906_v32 = vmul.f32 %v5764_v35, %v5707_v28  ;;  %v1908_v35 = vmul.f32 %v5782_v38, %v5707_v28 }
 0x28b   :  { %8169 = vst [vmem:[#allocation182_spill] sm:$0xff] %v5716_v17  ;;  %v5720_v14 = vpop.xlane.xlu1 %1554  ;;  %v1910_v38 = vmul.f32 %v5800_v40, %v5707_v28  ;;  %v1912_v40 = vmul.f32 %v5818_v42, %v5707_v28 }
 0x28c   :  { %8170 = vst [vmem:[#allocation183_spill] sm:$0xff] %v5720_v14 }
 0x28d   :  { %2042 = vadd.xlane.f32.xlu0 %v1899_v4 }
 0x28e   :  { %2044 = vadd.xlane.f32.xlu1 %v1900_v15  ;;  %v5734_v31 = vpop.xlane.xlu0 %1556  ;;  %v1903_v15 = vmul.f32 %v5743_v1, %v5707_v28  ;;  %v5779_v1 = vsel %vm767_vm7, 1.0, %v7924_v60  ;;  %vm783_vm7 = vcmp.eq.s32.totalorder %v5534_v10, %v5074_v56  ;;  %v5931_v56 = vsel %vm784_vm8, 1.0, %v7924_v60 }
 0x28f   :  { %8173 = vst [vmem:[#allocation186_spill] sm:$0xff] %v5734_v31  ;;  %v5738_v20 = vpop.xlane.xlu1 %1558  ;;  %8183 = vst [vmem:[#allocation196_spill] sm:$0xff] %v5779_v1 }
 0x290   :  { %8174 = vst [vmem:[#allocation187_spill] sm:$0xff] %v5738_v20  ;;  %8216 = vst [vmem:[#allocation229_spill] sm:$0xff] %v5931_v56 }
 0x291   :  { %2046 = vadd.xlane.f32.xlu0 %v1901_v54  ;;  %v1905_v54 = vmul.f32 %v5761_v5, %v5707_v28  ;;  %v5797_v5 = vsel %vm769_vm9, 1.0, %v7924_v60 }
 0x292   :  { %2048 = vadd.xlane.f32.xlu1 %v1902_v24  ;;  %v5752_v34 = vpop.xlane.xlu0 %1560  ;;  %8187 = vst [vmem:[#allocation200_spill] sm:$0xff] %v5797_v5 }
 0x293   :  { %8177 = vst [vmem:[#allocation190_spill] sm:$0xff] %v5752_v34  ;;  %v5756_v4 = vpop.xlane.xlu1 %1562 }
 0x294   :  { %8178 = vst [vmem:[#allocation191_spill] sm:$0xff] %v5756_v4 }
 0x295   :  { %2050 = vadd.xlane.f32.xlu0 %v1903_v15 }
 0x296   :  { %2052 = vadd.xlane.f32.xlu1 %v1904_v30  ;;  %v5770_v37 = vpop.xlane.xlu0 %1564  ;;  %v1907_v30 = vmul.f32 %v5779_v1, %v5707_v28  ;;  %v5815_v1 = vsel %vm771_vm11, 1.0, %v7924_v60 }
 0x297   :  { %8181 = vst [vmem:[#allocation194_spill] sm:$0xff] %v5770_v37  ;;  %v5774_v24 = vpop.xlane.xlu1 %1566  ;;  %8191 = vst [vmem:[#allocation204_spill] sm:$0xff] %v5815_v1 }
 0x298   :  { %8182 = vst [vmem:[#allocation195_spill] sm:$0xff] %v5774_v24 }
 0x299   :  { %2054 = vadd.xlane.f32.xlu0 %v1905_v54 }
 0x29a   :  { %2056 = vadd.xlane.f32.xlu1 %v1906_v32  ;;  %v5788_v39 = vpop.xlane.xlu0 %1568  ;;  %v1909_v32 = vmul.f32 %v5797_v5, %v5707_v28  ;;  %v5833_v5 = vsel %vm773_vm13, 1.0, %v7924_v60 }
 0x29b   :  { %8185 = vst [vmem:[#allocation198_spill] sm:$0xff] %v5788_v39  ;;  %v5792_v15 = vpop.xlane.xlu1 %1570  ;;  %8195 = vst [vmem:[#allocation208_spill] sm:$0xff] %v5833_v5 }
 0x29c   :  { %8186 = vst [vmem:[#allocation199_spill] sm:$0xff] %v5792_v15 }
 0x29d   :  { %2058 = vadd.xlane.f32.xlu0 %v1907_v30 }
 0x29e   :  { %2060 = vadd.xlane.f32.xlu1 %v1908_v35  ;;  %v5806_v41 = vpop.xlane.xlu0 %1572  ;;  %v1911_v35 = vmul.f32 %v5815_v1, %v5707_v28  ;;  %v5853_v1 = vsel %vm775_vm15, 1.0, %v7924_v60 }
 0x29f   :  { %8189 = vst [vmem:[#allocation202_spill] sm:$0xff] %v5806_v41  ;;  %v5810_v54 = vpop.xlane.xlu1 %1574  ;;  %8199 = vst [vmem:[#allocation212_spill] sm:$0xff] %v5853_v1 }
 0x2a0   :  { %8190 = vst [vmem:[#allocation203_spill] sm:$0xff] %v5810_v54 }
 0x2a1   :  { %2062 = vadd.xlane.f32.xlu0 %v1909_v32  ;;  %v5838_v32 = vsel %vm774_vm14, 1.0, %v7924_v60 }
 0x2a2   :  { %2064 = vadd.xlane.f32.xlu1 %v1910_v38  ;;  %v5824_v43 = vpop.xlane.xlu0 %1576  ;;  %8196 = vst [vmem:[#allocation209_spill] sm:$0xff] %v5838_v32  ;;  %v1913_v38 = vmul.f32 %v5833_v5, %v5707_v28  ;;  %v1914_v63 = vmul.f32 %v5838_v32, %v5707_v28  ;;  %v5874_v5 = vsel %vm777_vm1, 1.0, %v7924_v60 }
 0x2a3   :  { %8193 = vst [vmem:[#allocation206_spill] sm:$0xff] %v5824_v43  ;;  %v5828_v30 = vpop.xlane.xlu1 %1578  ;;  %8203 = vst [vmem:[#allocation216_spill] sm:$0xff] %v5874_v5 }
 0x2a4   :  { %8194 = vst [vmem:[#allocation207_spill] sm:$0xff] %v5828_v30 }
 0x2a5   :  { %2066 = vadd.xlane.f32.xlu0 %v1911_v35  ;;  %v5859_v35 = vsel %vm776_vm0, 1.0, %v7924_v60 }
 0x2a6   :  { %2068 = vadd.xlane.f32.xlu1 %v1912_v40  ;;  %v5844_v45 = vpop.xlane.xlu0 %1580  ;;  %8200 = vst [vmem:[#allocation213_spill] sm:$0xff] %v5859_v35  ;;  %v1915_v40 = vmul.f32 %v5853_v1, %v5707_v28  ;;  %v1916_v44 = vmul.f32 %v5859_v35, %v5856_v46  ;;  %v1917_v28 = vmul.f32 %v5874_v5, %v5856_v46  ;;  %v5892_v35 = vsel %vm779_vm3, 1.0, %v7924_v60 }
 0x2a7   :  { %8197 = vst [vmem:[#allocation210_spill] sm:$0xff] %v5844_v45  ;;  %v5848_v42 = vpop.xlane.xlu1 %1582  ;;  %8207 = vst [vmem:[#allocation220_spill] sm:$0xff] %v5892_v35  ;;  %v5910_v5 = vsel %vm781_vm5, 1.0, %v7924_v60  ;;  %v1924_v1 = vmul.f32 %v5931_v56, %v5856_v46 }
 0x2a8   :  { %8198 = vst [vmem:[#allocation211_spill] sm:$0xff] %v5848_v42  ;;  %8211 = vst [vmem:[#allocation224_spill] sm:$0xff] %v5910_v5 }
 0x2a9   :  { %2070 = vadd.xlane.f32.xlu0 %v1913_v38 }
 0x2aa   :  { %2072 = vadd.xlane.f32.xlu1 %v1914_v63  ;;  %v5865_v47 = vpop.xlane.xlu0 %1584  ;;  %v1918_v63 = vmul.f32 %v5877_v48, %v5856_v46  ;;  %v1920_v48 = vmul.f32 %v5895_v50, %v5856_v46  ;;  %v1922_v50 = vmul.f32 %v5913_v53, %v5856_v46 }
 0x2ab   :  { %8201 = vst [vmem:[#allocation214_spill] sm:$0xff] %v5865_v47  ;;  %v5869_v32 = vpop.xlane.xlu1 %1586 }
 0x2ac   :  { %8202 = vst [vmem:[#allocation215_spill] sm:$0xff] %v5869_v32 }
 0x2ad   :  { %2074 = vadd.xlane.f32.xlu0 %v1915_v40  ;;  %v1919_v40 = vmul.f32 %v5892_v35, %v5856_v46  ;;  %v5928_v35 = vsel %vm783_vm7, 1.0, %v7924_v60 }
 0x2ae   :  { %2076 = vadd.xlane.f32.xlu1 %v1916_v44  ;;  %v5883_v49 = vpop.xlane.xlu0 %1588  ;;  %8215 = vst [vmem:[#allocation228_spill] sm:$0xff] %v5928_v35 }
 0x2af   :  { %8205 = vst [vmem:[#allocation218_spill] sm:$0xff] %v5883_v49  ;;  %v5887_v38 = vpop.xlane.xlu1 %1590 }
 0x2b0   :  { %8206 = vst [vmem:[#allocation219_spill] sm:$0xff] %v5887_v38 }
 0x2b1   :  { %2078 = vadd.xlane.f32.xlu0 %v1917_v28  ;;  %v1921_v28 = vmul.f32 %v5910_v5, %v5856_v46  ;;  %v1923_v5 = vmul.f32 %v5928_v35, %v5856_v46 }
 0x2b2   :  { %2080 = vadd.xlane.f32.xlu1 %v1918_v63  ;;  %v5901_v52 = vpop.xlane.xlu0 %1592 }
 0x2b3   :  { %8209 = vst [vmem:[#allocation222_spill] sm:$0xff] %v5901_v52  ;;  %v5905_v44 = vpop.xlane.xlu1 %1594 }
 0x2b4   :  { %8210 = vst [vmem:[#allocation223_spill] sm:$0xff] %v5905_v44 }
 0x2b5   :  { %2082 = vadd.xlane.f32.xlu0 %v1919_v40  ;;  %v8217_v40 = vld [vmem:[#allocation21_spill] sm:$0xff] }
 0x2b6   :  { %2084 = vadd.xlane.f32.xlu1 %v1920_v48  ;;  %v5919_v55 = vpop.xlane.xlu0 %1596  ;;  %vm785_vm9 = vcmp.eq.s32.totalorder %v5534_v10, %v8217_v40  ;;  %v5949_v40 = vsel %vm786_vm10, 1.0, %v7924_v60 }
 0x2b7   :  { %8213 = vst [vmem:[#allocation226_spill] sm:$0xff] %v5919_v55  ;;  %v5923_v63 = vpop.xlane.xlu1 %1598  ;;  %v5946_v29 = vsel %vm785_vm9, 1.0, %v7924_v60  ;;  %8222 = vst [vmem:[#allocation231_spill] sm:$0xff] %v5949_v40  ;;  %v1926_v18 = vmul.f32 %v5949_v40, %v5856_v46 }
 0x2b8   :  { %8214 = vst [vmem:[#allocation227_spill] sm:$0xff] %v5923_v63  ;;  %8221 = vst [vmem:[#allocation230_spill] sm:$0xff] %v5946_v29  ;;  %v1925_v35 = vmul.f32 %v5946_v29, %v5856_v46 }
 0x2b9   :  { %2086 = vadd.xlane.f32.xlu0 %v1921_v28  ;;  %v8223_v28 = vld [vmem:[#allocation23_spill] sm:$0xff] }
 0x2ba   :  { %2088 = vadd.xlane.f32.xlu1 %v1922_v50  ;;  %v5937_v48 = vpop.xlane.xlu0 %1600  ;;  %vm787_vm11 = vcmp.eq.s32.totalorder %v5534_v10, %v8223_v28  ;;  %v8224_v50 = vld [vmem:[#allocation24_spill] sm:$0xff] }
 0x2bb   :  { %8219 = vst [vmem:[#allocation21_spill] sm:$0xff] %v5937_v48  ;;  %v5941_v53 = vpop.xlane.xlu1 %1602  ;;  %vm788_vm12 = vcmp.eq.s32.totalorder %v5534_v10, %v8224_v50  ;;  %v5964_v48 = vsel %vm787_vm11, 1.0, %v7924_v60 }
 0x2bc   :  { %8220 = vst [vmem:[#allocation22_spill] sm:$0xff] %v5941_v53  ;;  %8227 = vst [vmem:[#allocation232_spill] sm:$0xff] %v5964_v48  ;;  %v5967_v28 = vsel %vm788_vm12, 1.0, %v7924_v60  ;;  %v1927_v29 = vmul.f32 %v5964_v48, %v5856_v46 }
 0x2bd   :  { %2090 = vadd.xlane.f32.xlu0 %v1923_v5  ;;  %8228 = vst [vmem:[#allocation233_spill] sm:$0xff] %v5967_v28  ;;  %v8229_v5 = vld [vmem:[#allocation25_spill] sm:$0xff]  ;;  %v1928_v63 = vmul.f32 %v5967_v28, %v5856_v46 }
 0x2be   :  { %2092 = vadd.xlane.f32.xlu1 %v1924_v1  ;;  %v5955_v57 = vpop.xlane.xlu0 %1604  ;;  %vm789_vm13 = vcmp.eq.s32.totalorder %v5534_v10, %v8229_v5  ;;  %v8230_v1 = vld [vmem:[#allocation26_spill] sm:$0xff] }
 0x2bf   :  { %8225 = vst [vmem:[#allocation23_spill] sm:$0xff] %v5955_v57  ;;  %v5959_v56 = vpop.xlane.xlu1 %1606  ;;  %vm790_vm14 = vcmp.eq.s32.totalorder %v5534_v10, %v8230_v1  ;;  %v5982_v39 = vsel %vm789_vm13, 1.0, %v7924_v60  ;;  %v8236_v1 = vld [vmem:[#allocation28_spill] sm:$0xff] }
 0x2c0   :  { %8226 = vst [vmem:[#allocation24_spill] sm:$0xff] %v5959_v56  ;;  %8233 = vst [vmem:[#allocation234_spill] sm:$0xff] %v5982_v39  ;;  %v5987_v5 = vsel %vm790_vm14, 1.0, %v7924_v60  ;;  %vm792_vm0 = vcmp.eq.s32.totalorder %v5534_v10, %v8236_v1  ;;  %v1929_v28 = vmul.f32 %v5982_v39, %v5856_v46  ;;  %v8242_v1 = vld [vmem:[#allocation30_spill] sm:$0xff] }
 0x2c1   :  { %2094 = vadd.xlane.f32.xlu0 %v1925_v35  ;;  %v1714_v35 = vcombine.high %v5685_v26, %v5685_v26  ;;  %8234 = vst [vmem:[#allocation235_spill] sm:$0xff] %v5987_v5  ;;  %v1930_v26 = vmul.f32 %v5987_v5, %v5856_v46  ;;  %vm794_vm2 = vcmp.eq.s32.totalorder %v5534_v10, %v8242_v1 }
 0x2c2   :  { %2096 = vadd.xlane.f32.xlu1 %v1926_v18  ;;  %v5973_v50 = vpop.xlane.xlu0 %1608  ;;  %v8235_v18 = vld [vmem:[#allocation27_spill] sm:$0xff] }
 0x2c3   :  { %8231 = vst [vmem:[#allocation25_spill] sm:$0xff] %v5973_v50  ;;  %v5977_v40 = vpop.xlane.xlu1 %1610  ;;  %vm791_vm15 = vcmp.eq.s32.totalorder %v5534_v10, %v8235_v18  ;;  %v6005_v18 = vrot.slane %v1714_v35, %v4966_v2  ;;  %v8334_v50 = vld [vmem:[#allocation89_spill] sm:$0xff] }
 0x2c4   :  { %8232 = vst [vmem:[#allocation26_spill] sm:$0xff] %v5977_v40  ;;  %v6002_v24 = vsel %vm791_vm15, 1.0, %v7924_v60 }
 0x2c5   :  { %2098 = vadd.xlane.f32.xlu0 %v1927_v29  ;;  %8239 = vst [vmem:[#allocation236_spill] sm:$0xff] %v6002_v24  ;;  %v6008_v29 = vsel %vm792_vm0, 1.0, %v7924_v60  ;;  %v1931_v5 = vmul.f32 %v6002_v24, %v5856_v46 }
 0x2c6   :  { %2100 = vadd.xlane.f32.xlu1 %v1928_v63  ;;  %v5993_v48 = vpop.xlane.xlu0 %1612  ;;  %8240 = vst [vmem:[#allocation237_spill] sm:$0xff] %v6008_v29  ;;  %v8241_v63 = vld [vmem:[#allocation29_spill] sm:$0xff]  ;;  %v1932_v35 = vmul.f32 %v6008_v29, %v6005_v18 }
 0x2c7   :  { %8237 = vst [vmem:[#allocation27_spill] sm:$0xff] %v5993_v48  ;;  %v5997_v55 = vpop.xlane.xlu1 %1614  ;;  %vm793_vm1 = vcmp.eq.s32.totalorder %v5534_v10, %v8241_v63  ;;  %v6026_v63 = vsel %vm794_vm2, 1.0, %v7924_v60  ;;  %v2550_v48 = vadd.s32 4294967264, %v5534_v10 }
 0x2c8   :  { %8238 = vst [vmem:[#allocation28_spill] sm:$0xff] %v5997_v55  ;;  %v6023_v37 = vsel %vm793_vm1, 1.0, %v7924_v60  ;;  %8246 = vst [vmem:[#allocation239_spill] sm:$0xff] %v6026_v63  ;;  %v1934_v24 = vmul.f32 %v6026_v63, %v6005_v18  ;;  %v2543_v55 = vadd.s32 4294967272, %v5534_v10 }
 0x2c9   :  { %2102 = vadd.xlane.f32.xlu0 %v1929_v28  ;;  %8245 = vst [vmem:[#allocation238_spill] sm:$0xff] %v6023_v37  ;;  %v8247_v28 = vld [vmem:[#allocation31_spill] sm:$0xff]  ;;  %v1933_v1 = vmul.f32 %v6023_v37, %v6005_v18 }
 0x2ca   :  { %2104 = vadd.xlane.f32.xlu1 %v1930_v26  ;;  %v6014_v39 = vpop.xlane.xlu0 %1616  ;;  %vm795_vm3 = vcmp.eq.s32.totalorder %v5534_v10, %v8247_v28  ;;  %v8248_v26 = vld [vmem:[#allocation32_spill] sm:$0xff] }
 0x2cb   :  { %8243 = vst [vmem:[#allocation29_spill] sm:$0xff] %v6014_v39  ;;  %v6018_v44 = vpop.xlane.xlu1 %1618  ;;  %vm796_vm4 = vcmp.eq.s32.totalorder %v5534_v10, %v8248_v26  ;;  %v6041_v52 = vsel %vm795_vm3, 1.0, %v7924_v60 }
 0x2cc   :  { %8244 = vst [vmem:[#allocation30_spill] sm:$0xff] %v6018_v44  ;;  %8251 = vst [vmem:[#allocation240_spill] sm:$0xff] %v6041_v52  ;;  %v6044_v28 = vsel %vm796_vm4, 1.0, %v7924_v60  ;;  %v1935_v37 = vmul.f32 %v6041_v52, %v6005_v18 }
 0x2cd   :  { %2106 = vadd.xlane.f32.xlu0 %v1931_v5  ;;  %8252 = vst [vmem:[#allocation241_spill] sm:$0xff] %v6044_v28  ;;  %v8253_v5 = vld [vmem:[#allocation33_spill] sm:$0xff] }
 0x2ce   :  { %2108 = vadd.xlane.f32.xlu1 %v1932_v35  ;;  %v6032_v46 = vpop.xlane.xlu0 %1620  ;;  %vm797_vm5 = vcmp.eq.s32.totalorder %v5534_v10, %v8253_v5  ;;  %v8254_v35 = vld [vmem:[#allocation34_spill] sm:$0xff] }
 0x2cf   :  { %8249 = vst [vmem:[#allocation31_spill] sm:$0xff] %v6032_v46  ;;  %v6036_v29 = vpop.xlane.xlu1 %1622  ;;  %vm798_vm6 = vcmp.eq.s32.totalorder %v5534_v10, %v8254_v35  ;;  %v6059_v4 = vsel %vm797_vm5, 1.0, %v7924_v60 }
 0x2d0   :  { %8250 = vst [vmem:[#allocation32_spill] sm:$0xff] %v6036_v29  ;;  %v1936_v29 = vmul.f32 %v6044_v28, %v6005_v18  ;;  %8257 = vst [vmem:[#allocation242_spill] sm:$0xff] %v6059_v4  ;;  %v6062_v5 = vsel %vm798_vm6, 1.0, %v7924_v60  ;;  %v1937_v52 = vmul.f32 %v6059_v4, %v6005_v18 }
 0x2d1   :  { %2110 = vadd.xlane.f32.xlu0 %v1933_v1  ;;  %8258 = vst [vmem:[#allocation243_spill] sm:$0xff] %v6062_v5  ;;  %v8259_v1 = vld [vmem:[#allocation35_spill] sm:$0xff] }
 0x2d2   :  { %2112 = vadd.xlane.f32.xlu1 %v1934_v24  ;;  %v6050_v26 = vpop.xlane.xlu0 %1624  ;;  %vm799_vm7 = vcmp.eq.s32.totalorder %v5534_v10, %v8259_v1  ;;  %v8260_v24 = vld [vmem:[#allocation36_spill] sm:$0xff] }
 0x2d3   :  { %8255 = vst [vmem:[#allocation33_spill] sm:$0xff] %v6050_v26  ;;  %v6054_v63 = vpop.xlane.xlu1 %1626  ;;  %vm800_vm8 = vcmp.eq.s32.totalorder %v5534_v10, %v8260_v24  ;;  %v6077_v26 = vsel %vm799_vm7, 1.0, %v7924_v60 }
 0x2d4   :  { %8256 = vst [vmem:[#allocation34_spill] sm:$0xff] %v6054_v63  ;;  %v1938_v63 = vmul.f32 %v6062_v5, %v6005_v18  ;;  %8263 = vst [vmem:[#allocation244_spill] sm:$0xff] %v6077_v26  ;;  %v6080_v1 = vsel %vm800_vm8, 1.0, %v7924_v60  ;;  %v1939_v4 = vmul.f32 %v6077_v26, %v6005_v18 }
 0x2d5   :  { %2114 = vadd.xlane.f32.xlu0 %v1935_v37  ;;  %8264 = vst [vmem:[#allocation245_spill] sm:$0xff] %v6080_v1  ;;  %v8265_v37 = vld [vmem:[#allocation37_spill] sm:$0xff] }
 0x2d6   :  { %2116 = vadd.xlane.f32.xlu1 %v1936_v29  ;;  %v6068_v35 = vpop.xlane.xlu0 %1628  ;;  %vm801_vm9 = vcmp.eq.s32.totalorder %v5534_v10, %v8265_v37  ;;  %v8266_v29 = vld [vmem:[#allocation38_spill] sm:$0xff] }
 0x2d7   :  { %8261 = vst [vmem:[#allocation35_spill] sm:$0xff] %v6068_v35  ;;  %v6072_v28 = vpop.xlane.xlu1 %1630  ;;  %vm802_vm10 = vcmp.eq.s32.totalorder %v5534_v10, %v8266_v29  ;;  %v6095_v35 = vsel %vm801_vm9, 1.0, %v7924_v60  ;;  %v8272_v29 = vld [vmem:[#allocation40_spill] sm:$0xff] }
 0x2d8   :  { %8262 = vst [vmem:[#allocation36_spill] sm:$0xff] %v6072_v28  ;;  %v1940_v28 = vmul.f32 %v6080_v1, %v6005_v18  ;;  %8269 = vst [vmem:[#allocation246_spill] sm:$0xff] %v6095_v35  ;;  %v6100_v37 = vsel %vm802_vm10, 1.0, %v7924_v60  ;;  %vm804_vm12 = vcmp.eq.s32.totalorder %v5534_v10, %v8272_v29  ;;  %v1941_v1 = vmul.f32 %v6095_v35, %v6005_v18  ;;  %v8277_v29 = vld [vmem:[#allocation41_spill] sm:$0xff] }
 0x2d9   :  { %2118 = vadd.xlane.f32.xlu0 %v1937_v52  ;;  %v1667_v52 = vcombine.high %v5520_v36, %v5520_v36  ;;  %8270 = vst [vmem:[#allocation247_spill] sm:$0xff] %v6100_v37  ;;  %v1942_v36 = vmul.f32 %v6100_v37, %v6005_v18  ;;  %vm805_vm13 = vcmp.eq.s32.totalorder %v5534_v10, %v8277_v29 }
 0x2da   :  { %2120 = vadd.xlane.f32.xlu1 %v1938_v63  ;;  %v6086_v24 = vpop.xlane.xlu0 %1632  ;;  %v8271_v63 = vld [vmem:[#allocation39_spill] sm:$0xff]  ;;  %v6134_v34 = vsel %vm805_vm13, 1.0, %v7924_v60  ;;  %vm828_vm13 = vcmp.eq.s32.totalorder %v5534_v10, %v5180_v8  ;;  %v2536_v8 = vadd.s32 4294967280, %v5534_v10 }
 0x2db   :  { %8267 = vst [vmem:[#allocation37_spill] sm:$0xff] %v6086_v24  ;;  %v6090_v5 = vpop.xlane.xlu1 %1634  ;;  %vm803_vm11 = vcmp.eq.s32.totalorder %v5534_v10, %v8271_v63  ;;  %v1681_v63 = vrot.slane %v1667_v52, %v5153_v3  ;;  %8281 = vst [vmem:[#allocation250_spill] sm:$0xff] %v6134_v34 }
 0x2dc   :  { %8268 = vst [vmem:[#allocation38_spill] sm:$0xff] %v6090_v5  ;;  %v6115_v46 = vsel %vm803_vm11, 1.0, %v7924_v60 }
 0x2dd   :  { %2122 = vadd.xlane.f32.xlu0 %v1939_v4  ;;  %8275 = vst [vmem:[#allocation248_spill] sm:$0xff] %v6115_v46  ;;  %v6119_v4 = vsel %vm804_vm12, 1.0, %v7924_v60  ;;  %v1943_v37 = vmul.f32 %v6115_v46, %v6005_v18  ;;  %v6137_v29 = vrot.slane %v1681_v63, %v5153_v3 }
 0x2de   :  { %2124 = vadd.xlane.f32.xlu1 %v1940_v28  ;;  %v6106_v26 = vpop.xlane.xlu0 %1636  ;;  %8276 = vst [vmem:[#allocation249_spill] sm:$0xff] %v6119_v4  ;;  %v8278_v28 = vld [vmem:[#allocation42_spill] sm:$0xff]  ;;  %v1944_v52 = vmul.f32 %v6119_v4, %v6005_v18  ;;  %v1945_v4 = vmul.f32 %v6134_v34, %v6005_v18 }
 0x2df   :  { %8273 = vst [vmem:[#allocation39_spill] sm:$0xff] %v6106_v26  ;;  %v6110_v24 = vpop.xlane.xlu1 %1638  ;;  %vm806_vm14 = vcmp.eq.s32.totalorder %v5534_v10, %v8278_v28  ;;  %v8284_v28 = vld [vmem:[#allocation44_spill] sm:$0xff] }
 0x2e0   :  { %8274 = vst [vmem:[#allocation40_spill] sm:$0xff] %v6110_v24  ;;  %vm808_vm0 = vcmp.eq.s32.totalorder %v5534_v10, %v8284_v28  ;;  %v8290_v28 = vld [vmem:[#allocation46_spill] sm:$0xff] }
 0x2e1   :  { %2126 = vadd.xlane.f32.xlu0 %v1941_v1  ;;  %v6140_v1 = vsel %vm806_vm14, 1.0, %v7924_v60  ;;  %vm810_vm2 = vcmp.eq.s32.totalorder %v5534_v10, %v8290_v28  ;;  %v1683_v28 = vcombine.high %v1681_v63, %v1681_v63 }
 0x2e2   :  { %2128 = vadd.xlane.f32.xlu1 %v1942_v36  ;;  %v6125_v35 = vpop.xlane.xlu0 %1640  ;;  %8282 = vst [vmem:[#allocation251_spill] sm:$0xff] %v6140_v1  ;;  %v8283_v36 = vld [vmem:[#allocation43_spill] sm:$0xff]  ;;  %v1946_v49 = vmul.f32 %v6140_v1, %v6005_v18 }
 0x2e3   :  { %8279 = vst [vmem:[#allocation41_spill] sm:$0xff] %v6125_v35  ;;  %v6129_v38 = vpop.xlane.xlu1 %1642  ;;  %vm807_vm15 = vcmp.eq.s32.totalorder %v5534_v10, %v8283_v36  ;;  %v6162_v36 = vsel %vm808_vm0, 1.0, %v7924_v60  ;;  %v1711_v63 = vrot.slane %v1683_v28, %v5153_v3  ;;  %v8309_v3 = vld [vmem:[#allocation52_spill] sm:$0xff]  ;;  %v8311_v28 = vld [vmem:[#allocation61_spill] sm:$0xff]  ;;  %vm841_vm0 = vcmp.eq.s32.totalorder %v5534_v10, %v5224_v62 }
 0x2e4   :  { %8280 = vst [vmem:[#allocation42_spill] sm:$0xff] %v6129_v38  ;;  %v6155_v20 = vsel %vm807_vm15, 1.0, %v7924_v60  ;;  %8288 = vst [vmem:[#allocation253_spill] sm:$0xff] %v6162_v36  ;;  %vm816_vm8 = vcmp.eq.s32.totalorder %v5534_v10, %v8309_v3  ;;  %vm825_vm10 = vcmp.eq.s32.totalorder %v5534_v10, %v8311_v28  ;;  %vm840_vm15 = vcmp.eq.s32.totalorder %v5534_v10, %v5220_v51 }
 0x2e5   :  { %2130 = vadd.xlane.f32.xlu0 %v1943_v37  ;;  %8287 = vst [vmem:[#allocation252_spill] sm:$0xff] %v6155_v20  ;;  %v6159_v37 = vrot.slane %v6137_v29, %v4966_v2  ;;  %v1947_v1 = vmul.f32 %v6155_v20, %v6005_v18 }
 0x2e6   :  { %2132 = vadd.xlane.f32.xlu1 %v1944_v52  ;;  %v6146_v46 = vpop.xlane.xlu0 %1644  ;;  %v8289_v52 = vld [vmem:[#allocation45_spill] sm:$0xff] }
 0x2e7   :  { %8285 = vst [vmem:[#allocation43_spill] sm:$0xff] %v6146_v46  ;;  %v6150_v44 = vpop.xlane.xlu1 %1646  ;;  %vm809_vm1 = vcmp.eq.s32.totalorder %v5534_v10, %v8289_v52  ;;  %v1948_v39 = vmul.f32 %v6162_v36, %v6159_v37  ;;  %v6180_v52 = vsel %vm810_vm2, 1.0, %v7924_v60  ;;  %vm2541_vm2 = vcmask 195712  }
 0x2e8   :  { %8286 = vst [vmem:[#allocation44_spill] sm:$0xff] %v6150_v44  ;;  %v6177_v32 = vsel %vm809_vm1, 1.0, %v7924_v60  ;;  %8294 = vst [vmem:[#allocation255_spill] sm:$0xff] %v6180_v52  ;;  %v1950_v60 = vmul.f32 %v6180_v52, %v6159_v37  ;;  %vm2534_vm1 = vcmask 130112  }
 0x2e9   :  { %2134 = vadd.xlane.f32.xlu0 %v1945_v4  ;;  %8293 = vst [vmem:[#allocation254_spill] sm:$0xff] %v6177_v32  ;;  %v8295_v4 = vld [vmem:[#allocation47_spill] sm:$0xff]  ;;  %v1949_v36 = vmul.f32 %v6177_v32, %v6159_v37 }
 0x2ea   :  { %2136 = vadd.xlane.f32.xlu1 %v1946_v49  ;;  %v6168_v34 = vpop.xlane.xlu0 %1648  ;;  %vm811_vm3 = vcmp.eq.s32.totalorder %v5534_v10, %v8295_v4  ;;  %v8296_v49 = vld [vmem:[#allocation48_spill] sm:$0xff]  ;;  %v8301_v4 = vld [vmem:[#allocation49_spill] sm:$0xff] }
 0x2eb   :  { %8291 = vst [vmem:[#allocation45_spill] sm:$0xff] %v6168_v34  ;;  %v6172_v44 = vpop.xlane.xlu1 %1650  ;;  %vm812_vm4 = vcmp.eq.s32.totalorder %v5534_v10, %v8296_v49  ;;  %vm813_vm5 = vcmp.eq.s32.totalorder %v5534_v10, %v8301_v4 }
 0x2ec   :  { %8292 = vst [vmem:[#allocation46_spill] sm:$0xff] %v6172_v44  ;;  %v8299_v44 = vmov 0.0  }
 0x2ed   :  { %2138 = vadd.xlane.f32.xlu0 %v1947_v1  ;;  %v6195_v34 = vsel %vm811_vm3, 1.0, %v8299_v44  ;;  %v6200_v1 = vsel %vm812_vm4, 1.0, %v8299_v44  ;;  %v6210_v32 = vsel %vm813_vm5, 1.0, %v8299_v44  ;;  %v6242_v28 = vsel %vm816_vm8, 1.0, %v8299_v44 }
 0x2ee   :  { %2140 = vadd.xlane.f32.xlu1 %v1948_v39  ;;  %v6186_v18 = vpop.xlane.xlu0 %1652  ;;  %8300 = vst [vmem:[#allocation256_spill] sm:$0xff] %v6195_v34  ;;  %8302 = vst [vmem:[#allocation49_spill] sm:$0xff] %v6200_v1  ;;  %v8303_v39 = vld [vmem:[#allocation50_spill] sm:$0xff]  ;;  %v1951_v52 = vmul.f32 %v6195_v34, %v6159_v37  ;;  %v1952_v4 = vmul.f32 %v6200_v1, %v6159_v37  ;;  %v6230_v1 = vrot.slane %v1711_v63, %v4966_v2  ;;  %vm2548_vm5 = vcmask 261312  }
 0x2ef   :  { %8297 = vst [vmem:[#allocation47_spill] sm:$0xff] %v6186_v18  ;;  %v6190_v20 = vpop.xlane.xlu1 %1654  ;;  %vm814_vm6 = vcmp.eq.s32.totalorder %v5534_v10, %v8303_v39  ;;  %8305 = vst [vmem:[#allocation257_spill] sm:$0xff] %v6210_v32  ;;  %v1713_v39 = vcombine.high %v6137_v29, %v6137_v29  ;;  %v1715_v34 = vcombine.high %v1711_v63, %v1711_v63  ;;  %v6250_v63 = vsel %vm825_vm10, 1.0, %v8299_v44 }
 0x2f0   :  { %8298 = vst [vmem:[#allocation48_spill] sm:$0xff] %v6190_v20  ;;  %v6217_v18 = vsel %vm814_vm6, 1.0, %v8299_v44  ;;  %8317 = vst [vmem:[#allocation261_spill] sm:$0xff] %v6250_v63  ;;  %vm856_vm4 = vcmp.eq.s32.totalorder %v5534_v10, %v8334_v50  ;;  %vm2555_vm6 = vcmask 326912   ;;  %vm2569_vm10 = vcmask 458112  }
 0x2f1   :  { %2142 = vadd.xlane.f32.xlu0 %v1949_v36  ;;  %8307 = vst [vmem:[#allocation259_spill] sm:$0xff] %v6217_v18  ;;  %v8308_v36 = vld [vmem:[#allocation51_spill] sm:$0xff]  ;;  %v1954_v3 = vmul.f32 %v6217_v18, %v6159_v37  ;;  %v6259_v18 = vrot.slane %v1713_v39, %v4966_v2 }
 0x2f2   :  { %2144 = vadd.xlane.f32.xlu1 %v1950_v60  ;;  %v6205_v49 = vpop.xlane.xlu0 %1656  ;;  %vm815_vm7 = vcmp.eq.s32.totalorder %v5534_v10, %v8308_v36  ;;  %v8310_v60 = vld [vmem:[#allocation60_spill] sm:$0xff]  ;;  %v1953_v36 = vmul.f32 %v6210_v32, %v6159_v37  ;;  %v8319_v32 = vld [vmem:[#allocation63_spill] sm:$0xff] }
 0x2f3   :  { %8304 = vst [vmem:[#allocation50_spill] sm:$0xff] %v6205_v49  ;;  %v6212_v20 = vpop.xlane.xlu1 %1658  ;;  %vm824_vm9 = vcmp.eq.s32.totalorder %v5534_v10, %v8310_v60  ;;  %v6239_v60 = vsel %vm815_vm7, 1.0, %v8299_v44  ;;  %8314 = vst [vmem:[#allocation60_spill] sm:$0xff] %v6242_v28  ;;  %vm827_vm12 = vcmp.eq.s32.totalorder %v5534_v10, %v8319_v32  ;;  %v1956_v49 = vmul.f32 %v6242_v28, %v6159_v37 }
 0x2f4   :  { %8306 = vst [vmem:[#allocation258_spill] sm:$0xff] %v6212_v20  ;;  %8313 = vst [vmem:[#allocation52_spill] sm:$0xff] %v6239_v60 }
 0x2f5   :  { %2146 = vadd.xlane.f32.xlu0 %v1951_v52  ;;  %v6247_v52 = vsel %vm824_vm9, 1.0, %v8299_v44  ;;  %vm2562_vm9 = vcmask 392512  }
 0x2f6   :  { %2148 = vadd.xlane.f32.xlu1 %v1952_v4  ;;  %v6232_v20 = vpop.xlane.xlu0 %1660  ;;  %8316 = vst [vmem:[#allocation260_spill] sm:$0xff] %v6247_v52  ;;  %v8318_v4 = vld [vmem:[#allocation62_spill] sm:$0xff]  ;;  %v1964_v39 = vmul.f32 %v6247_v52, %v6230_v1  ;;  %v8325_v52 = vld [vmem:[#allocation19_spill] sm:$0xff] }
 0x2f7   :  { %8312 = vst [vmem:[#allocation51_spill] sm:$0xff] %v6232_v20  ;;  %v6244_v29 = vpop.xlane.xlu1 %1662  ;;  %vm826_vm11 = vcmp.eq.s32.totalorder %v5534_v10, %v8318_v4  ;;  %v1955_v20 = vmul.f32 %v6239_v60, %v6159_v37  ;;  %v6267_v4 = vrot.slane %v1715_v34, %v4966_v2  ;;  %v6280_v60 = vsel %vm827_vm12, 1.0, %v8299_v44  ;;  %v8326_v2 = vld [vmem:[#allocation104_spill] sm:$0xff] }
 0x2f8   :  { %8315 = vst [vmem:[#allocation61_spill] sm:$0xff] %v6244_v29  ;;  %v2529_v29 = vadd.s32 4294967288, %v5534_v10  ;;  %v6277_v31 = vsel %vm826_vm11, 1.0, %v8299_v44  ;;  %8322 = vst [vmem:[#allocation262_spill] sm:$0xff] %v6280_v60  ;;  %v6283_v34 = vsel %vm828_vm13, 1.0, %v8299_v44  ;;  %v1967_v51 = vmul.f32 %v6280_v60, %v6230_v1 }
 0x2f9   :  { %2150 = vadd.xlane.f32.xlu0 %v1953_v36  ;;  %v1965_v36 = vmul.f32 %v6250_v63, %v6230_v1  ;;  %8321 = vst [vmem:[#allocation63_spill] sm:$0xff] %v6277_v31  ;;  %8323 = vst [vmem:[#allocation263_spill] sm:$0xff] %v6283_v34  ;;  %v6293_v63 = vsub.s32 %v5534_v10, %v8325_v52  ;;  %v6305_v38 = vsub.s32 %v2536_v8, %v8325_v52  ;;  %v8331_v8 = vld [vmem:[#allocation106_spill] sm:$0xff]  ;;  %vm2576_vm13 = vcmask 523712  }
 0x2fa   :  { %2152 = vadd.xlane.f32.xlu1 %v1954_v3  ;;  %v6269_v32 = vpop.xlane.xlu0 %1664  ;;  %v8324_v3 = vld [vmem:[#allocation64_spill] sm:$0xff]  ;;  %v6297_v46 = vsub.s32 %v2529_v29, %v8325_v52  ;;  %v8329_v29 = vld [vmem:[#allocation107_spill] sm:$0xff]  ;;  %v6329_v40 = vsub.s32 %v2543_v55, %v8325_v52  ;;  %v6336_v24 = vsub.s32 %v2550_v48, %v8325_v52  ;;  %v8335_v48 = vld [vmem:[#allocation109_spill] sm:$0xff] }
 0x2fb   :  { %8320 = vst [vmem:[#allocation62_spill] sm:$0xff] %v6269_v32  ;;  %v2013_v28 = vpop.xlane.xlu1 %2012  ;;  %vm829_vm14 = vcmp.eq.s32.totalorder %v5534_v10, %v8324_v3  ;;  %v1966_v3 = vmul.f32 %v6277_v31, %v6230_v1 }
 0x2fc   :  { %v2268_v32 = vadd.f32 %v2013_v28, %v8326_v2  ;;  %v6310_v2 = vmul.f32 %v6283_v34, %v6230_v1  ;;  %v6316_v28 = vsel %vm840_vm15, 1.0, %v8299_v44 }
 0x2fd   :  { %2154 = vadd.xlane.f32.xlu0 %v1955_v20  ;;  %v6313_v20 = vsel %vm829_vm14, 1.0, %v8299_v44  ;;  %8328 = vst [vmem:[#allocation104_spill] sm:$0xff] %v6316_v28  ;;  %vm2583_vm14 = vcmask 589312  }
 0x2fe   :  { %2156 = vadd.xlane.f32.xlu1 %v1956_v49  ;;  %v2015_v47 = vpop.xlane.xlu0 %2014  ;;  %8327 = vst [vmem:[#allocation64_spill] sm:$0xff] %v6313_v20  ;;  %v6323_v49 = vsel %vm841_vm0, 1.0, %v8299_v44  ;;  %v2528_v42 = vrot.slane %v2268_v32, %v6293_v63  ;;  %v8332_v32 = vld [vmem:[#allocation75_spill] sm:$0xff]  ;;  %vm2590_vm0 = vcmask 654912  }
 0x2ff   :  { %v2269_v31 = vadd.f32 %v2015_v47, %v8329_v29  ;;  %v2017_v60 = vpop.xlane.xlu1 %2016  ;;  %8330 = vst [vmem:[#allocation107_spill] sm:$0xff] %v6323_v49  ;;  %v2557_v47 = vadd.s32 4294967256, %v5534_v10  ;;  %v1980_v29 = vmul.f32 %v6316_v28, %v6259_v18  ;;  %vm842_vm3 = vcmp.eq.s32.totalorder %v5534_v10, %v8332_v32  ;;  %v8341_v32 = vld [vmem:[#allocation111_spill] sm:$0xff] }
 0x300   :  { %v2270_v34 = vadd.f32 %v2017_v60, %v8331_v8  ;;  %v2564_v60 = vadd.s32 4294967248, %v5534_v10 }
 0x301   :  { %v2533_v35 = vrot.slane %v2269_v31, %v6297_v46  ;;  %2172 = vadd.xlane.f32.xlu0 %v1964_v39  ;;  %v1981_v31 = vmul.f32 %v6323_v49, %v6259_v18  ;;  %v8333_v39 = vld [vmem:[#allocation108_spill] sm:$0xff]  ;;  %v6351_v49 = vsub.s32 %v2557_v47, %v8325_v52  ;;  %v8338_v47 = vld [vmem:[#allocation90_spill] sm:$0xff] }
 0x302   :  { %v2540_v62 = vrot.slane %v2270_v34, %v6305_v38  ;;  %2174 = vadd.xlane.f32.xlu1 %v1965_v36  ;;  %v2019_v45 = vpop.xlane.xlu0 %2018  ;;  %vm857_vm8 = vcmp.eq.s32.totalorder %v5534_v10, %v8338_v47 }
 0x303   :  { %v2535_v55 = vsel %vm2534_vm1, %v2533_v35, %v2528_v42  ;;  %v2271_v8 = vadd.f32 %v2019_v45, %v8333_v39  ;;  %v2021_v28 = vpop.xlane.xlu1 %2020  ;;  %v2571_v42 = vadd.s32 4294967240, %v5534_v10  ;;  %v8336_v35 = vld [vmem:[#allocation76_spill] sm:$0xff] }
 0x304   :  { %v2542_v36 = vsel %vm2541_vm2, %v2540_v62, %v2535_v55  ;;  %v2272_v34 = vadd.f32 %v2021_v28, %v8335_v48  ;;  %vm843_vm7 = vcmp.eq.s32.totalorder %v5534_v10, %v8336_v35  ;;  %v6358_v62 = vsub.s32 %v2564_v60, %v8325_v52  ;;  %v8348_v35 = vld [vmem:[#allocation113_spill] sm:$0xff] }
 0x305   :  { %v2547_v5 = vrot.slane %v2271_v8, %v6329_v40  ;;  %2176 = vadd.xlane.f32.xlu0 %v1966_v3  ;;  %v2578_v28 = vadd.s32 4294967232, %v5534_v10  ;;  %v6365_v3 = vsel %vm842_vm3, 1.0, %v8299_v44  ;;  %v8339_v8 = vld [vmem:[#allocation110_spill] sm:$0xff]  ;;  %v6375_v60 = vsel %vm856_vm4, 1.0, %v8299_v44 }
 0x306   :  { %v2554_v45 = vrot.slane %v2272_v34, %v6336_v24  ;;  %2204 = vadd.xlane.f32.xlu1 %v1980_v29  ;;  %v2023_v39 = vpop.xlane.xlu0 %2022  ;;  %8337 = vst [vmem:[#allocation106_spill] sm:$0xff] %v6365_v3  ;;  %8340 = vst [vmem:[#allocation75_spill] sm:$0xff] %v6375_v60  ;;  %vm7965_vm3 = vcmask 720512  }
 0x307   :  { %v2549_v55 = vsel %vm2548_vm5, %v2547_v5, %v2542_v36  ;;  %v2273_v48 = vadd.f32 %v2023_v39, %v8339_v8  ;;  %v2025_v29 = vpop.xlane.xlu1 %2024  ;;  %v6381_v5 = vsub.s32 %v2571_v42, %v8325_v52  ;;  %v2585_v36 = vadd.s32 4294967224, %v5534_v10 }
 0x308   :  { %v2556_v34 = vsel %vm2555_vm6, %v2554_v45, %v2549_v55  ;;  %v2274_v30 = vadd.f32 %v2025_v29, %v8341_v32  ;;  %v1982_v39 = vmul.f32 %v6365_v3, %v6259_v18  ;;  %v6388_v45 = vsub.s32 %v2578_v28, %v8325_v52  ;;  %v8343_v29 = vld [vmem:[#allocation65_spill] sm:$0xff]  ;;  %v8344_v28 = vld [vmem:[#allocation91_spill] sm:$0xff]  ;;  %v8345_v3 = vld [vmem:[#allocation112_spill] sm:$0xff] }
 0x309   :  { %v2561_v26 = vrot.slane %v2273_v48, %v6351_v49  ;;  %2206 = vadd.xlane.f32.xlu0 %v1981_v31  ;;  %v2592_v55 = vadd.s32 4294967216, %v5534_v10  ;;  %v1996_v31 = vmul.f32 %v6375_v60, %v6267_v4  ;;  %v6397_v42 = vsel %vm857_vm8, 1.0, %v8299_v44 }
 0x30a   :  { %v2568_v50 = vrot.slane %v2274_v30, %v6358_v62  ;;  %2178 = vadd.xlane.f32.xlu1 %v1967_v51  ;;  %v2027_v8 = vpop.xlane.xlu0 %2026  ;;  %8342 = vst [vmem:[#allocation108_spill] sm:$0xff] %v6397_v42  ;;  %vm830_vm11 = vcmp.eq.s32.totalorder %v5534_v10, %v8343_v29  ;;  %vm858_vm12 = vcmp.eq.s32.totalorder %v5534_v10, %v8344_v28  ;;  %vm7949_vm8 = vcmask 851712   ;;  %v8361_v29 = vld [vmem:[#allocation118_spill] sm:$0xff] }
 0x30b   :  { %v2563_v48 = vsel %vm2562_vm9, %v2561_v26, %v2556_v34  ;;  %v2275_v30 = vadd.f32 %v2027_v8, %v5385_v61  ;;  %v2029_v51 = vpop.xlane.xlu1 %2028  ;;  %v6409_v26 = vsub.s32 %v2585_v36, %v8325_v52  ;;  %v2599_v61 = vadd.s32 4294967208, %v5534_v10 }
 0x30c   :  { %v2570_v32 = vsel %vm2569_vm10, %v2568_v50, %v2563_v48  ;;  %v2276_v60 = vadd.f32 %v2029_v51, %v8345_v3  ;;  %v6416_v34 = vsel %vm843_vm7, 1.0, %v8299_v44  ;;  %v6420_v3 = vsub.s32 %v2592_v55, %v8325_v52  ;;  %v8347_v48 = vld [vmem:[#allocation77_spill] sm:$0xff] }
 0x30d   :  { %v2575_v47 = vrot.slane %v2275_v30, %v6381_v5  ;;  %2208 = vadd.xlane.f32.xlu0 %v1982_v39  ;;  %8346 = vst [vmem:[#allocation89_spill] sm:$0xff] %v6416_v34  ;;  %v2606_v39 = vadd.s32 4294967200, %v5534_v10  ;;  %vm844_vm15 = vcmp.eq.s32.totalorder %v5534_v10, %v8347_v48  ;;  %v1997_v36 = vmul.f32 %v6397_v42, %v6267_v4 }
 0x30e   :  { %v2582_v50 = vrot.slane %v2276_v60, %v6388_v45  ;;  %2236 = vadd.xlane.f32.xlu1 %v1996_v31  ;;  %v2031_v8 = vpop.xlane.xlu0 %2030  ;;  %v6433_v60 = vsel %vm858_vm12, 1.0, %v8299_v44  ;;  %v8350_v31 = vld [vmem:[#allocation114_spill] sm:$0xff]  ;;  %vm7948_vm7 = vcmask 786112   ;;  %vm7950_vm12 = vcmask 917312  }
 0x30f   :  { %v2577_v30 = vsel %vm2576_vm13, %v2575_v47, %v2570_v32  ;;  %v2277_v51 = vadd.f32 %v2031_v8, %v8348_v35  ;;  %v2033_v56 = vpop.xlane.xlu1 %2032  ;;  %8349 = vst [vmem:[#allocation109_spill] sm:$0xff] %v6433_v60  ;;  %v6439_v32 = vsub.s32 %v2599_v61, %v8325_v52  ;;  %v2613_v47 = vadd.s32 4294967192, %v5534_v10 }
 0x310   :  { %v2584_v55 = vsel %vm2583_vm14, %v2582_v50, %v2577_v30  ;;  %v2278_v43 = vadd.f32 %v2033_v56, %v8350_v31  ;;  %v1983_v8 = vmul.f32 %v6416_v34, %v6259_v18  ;;  %v6447_v30 = vsub.s32 %v2606_v39, %v8325_v52  ;;  %v8355_v34 = vld [vmem:[#allocation116_spill] sm:$0xff] }
 0x311   :  { %v2589_v53 = vrot.slane %v2277_v51, %v6409_v26  ;;  %2238 = vadd.xlane.f32.xlu0 %v1997_v36  ;;  %v2620_v56 = vadd.s32 4294967184, %v5534_v10  ;;  %v6454_v61 = vsel %vm844_vm15, 1.0, %v8299_v44  ;;  %v8353_v36 = vld [vmem:[#allocation92_spill] sm:$0xff]  ;;  %v1998_v39 = vmul.f32 %v6433_v60, %v6267_v4  ;;  %v8381_v60 = vld [vmem:[#allocation67_spill] sm:$0xff] }
 0x312   :  { %v2596_v28 = vrot.slane %v2278_v43, %v6420_v3  ;;  %2180 = vadd.xlane.f32.xlu1 %v6310_v2  ;;  %v2035_v50 = vpop.xlane.xlu0 %2034  ;;  %8351 = vst [vmem:[#allocation76_spill] sm:$0xff] %v6447_v30  ;;  %8352 = vst [vmem:[#allocation90_spill] sm:$0xff] %v6454_v61  ;;  %vm859_vm4 = vcmp.eq.s32.totalorder %v5534_v10, %v8353_v36  ;;  %v8354_v43 = vld [vmem:[#allocation115_spill] sm:$0xff]  ;;  %v6466_v57 = vsub.s32 %v2613_v47, %v8325_v52  ;;  %vm2625_vm15 = vcmask 982912  }
 0x313   :  { %v2591_v35 = vsel %vm2590_vm0, %v2589_v53, %v2584_v55  ;;  %v2279_v51 = vadd.f32 %v2035_v50, %v8354_v43  ;;  %v2037_v2 = vpop.xlane.xlu1 %2036  ;;  %v2627_v53 = vadd.s32 4294967176, %v5534_v10  ;;  %v1969_v55 = vmul.f32 %v6313_v20, %v6230_v1  ;;  %v8362_v20 = vld [vmem:[#allocation78_spill] sm:$0xff] }
 0x314   :  { %v2598_v31 = vsel %vm7965_vm3, %v2596_v28, %v2591_v35  ;;  %v2280_v42 = vadd.f32 %v2037_v2, %v8355_v34  ;;  %8356 = vst [vmem:[#allocation110_spill] sm:$0xff] %v6466_v57  ;;  %v6473_v28 = vsub.s32 %v2620_v56, %v8325_v52  ;;  %v6479_v34 = vsel %vm830_vm11, 1.0, %v8299_v44  ;;  %v8359_v35 = vld [vmem:[#allocation117_spill] sm:$0xff] }
 0x315   :  { %v2603_v48 = vrot.slane %v2279_v51, %v6439_v32  ;;  %2210 = vadd.xlane.f32.xlu0 %v1983_v8  ;;  %8358 = vst [vmem:[#allocation65_spill] sm:$0xff] %v6479_v34  ;;  %v1984_v47 = vmul.f32 %v6454_v61, %v6259_v18  ;;  %vm845_vm11 = vcmp.eq.s32.totalorder %v5534_v10, %v8362_v20  ;;  %v8365_v20 = vld [vmem:[#allocation119_spill] sm:$0xff] }
 0x316   :  { %v2610_v50 = vrot.slane %v2280_v42, %v6447_v30  ;;  %2240 = vadd.xlane.f32.xlu1 %v1998_v39  ;;  %v2039_v43 = vpop.xlane.xlu0 %2038  ;;  %8357 = vst [vmem:[#allocation111_spill] sm:$0xff] %v6473_v28  ;;  %v6489_v42 = vsel %vm859_vm4, 1.0, %v8299_v44  ;;  %vm2632_vm4 = vcmask 1048512  }
 0x317   :  { %v2605_v8 = vsel %vm7948_vm7, %v2603_v48, %v2598_v31  ;;  %v2281_v51 = vadd.f32 %v2039_v43, %v8359_v35  ;;  %v2041_v2 = vpop.xlane.xlu1 %2040  ;;  %8360 = vst [vmem:[#allocation91_spill] sm:$0xff] %v6489_v42  ;;  %v6497_v31 = vsub.s32 %v2627_v53, %v8325_v52  ;;  %v8364_v48 = vld [vmem:[#allocation93_spill] sm:$0xff]  ;;  %v1999_v43 = vmul.f32 %v6489_v42, %v6267_v4 }
 0x318   :  { %v2612_v56 = vsel %vm7949_vm8, %v2610_v50, %v2605_v8  ;;  %v2282_v39 = vadd.f32 %v2041_v2, %v8361_v29  ;;  %vm860_vm7 = vcmp.eq.s32.totalorder %v5534_v10, %v8364_v48  ;;  %v6509_v53 = vsel %vm845_vm11, 1.0, %v8299_v44  ;;  %v8367_v29 = vld [vmem:[#allocation66_spill] sm:$0xff]  ;;  %v8370_v48 = vld [vmem:[#allocation79_spill] sm:$0xff] }
 0x319   :  { %v2617_v61 = vrot.slane %v2281_v51, %v6466_v57  ;;  %2182 = vadd.xlane.f32.xlu0 %v1969_v55  ;;  %8363 = vst [vmem:[#allocation112_spill] sm:$0xff] %v6497_v31  ;;  %v1970_v55 = vmul.f32 %v6479_v34, %v6230_v1  ;;  %8366 = vst [vmem:[#allocation77_spill] sm:$0xff] %v6509_v53  ;;  %vm831_vm8 = vcmp.eq.s32.totalorder %v5534_v10, %v8367_v29 }
 0x31a   :  { %v2624_v36 = vrot.slane %v2282_v39, %v6473_v28  ;;  %2212 = vadd.xlane.f32.xlu1 %v1984_v47  ;;  %v2043_v50 = vpop.xlane.xlu0 %2042  ;;  %v6515_v47 = vsel %vm860_vm7, 1.0, %v8299_v44  ;;  %v6528_v42 = vsel %vm831_vm8, 1.0, %v8299_v44 }
 0x31b   :  { %v2619_v8 = vsel %vm7950_vm12, %v2617_v61, %v2612_v56  ;;  %v2283_v35 = vadd.f32 %v2043_v50, %v8365_v20  ;;  %v2045_v51 = vpop.xlane.xlu1 %2044  ;;  %8368 = vst [vmem:[#allocation113_spill] sm:$0xff] %v6515_v47  ;;  %v8369_v56 = vld [vmem:[#allocation120_spill] sm:$0xff]  ;;  %vm846_vm12 = vcmp.eq.s32.totalorder %v5534_v10, %v8370_v48  ;;  %v8371_v20 = vld [vmem:[#allocation121_spill] sm:$0xff]  ;;  %8372 = vst [vmem:[#allocation114_spill] sm:$0xff] %v6528_v42 }
 0x31c   :  { %v2626_v2 = vsel %vm2625_vm15, %v2624_v36, %v2619_v8  ;;  %v2284_v39 = vadd.f32 %v2045_v51, %v8369_v56  ;;  %v1985_v36 = vmul.f32 %v6509_v53, %v6259_v18  ;;  %v8375_v56 = vld [vmem:[#allocation94_spill] sm:$0xff]  ;;  %v8376_v48 = vld [vmem:[#allocation53_spill] sm:$0xff] }
 0x31d   :  { %v2631_v61 = vrot.slane %v2283_v35, %v6497_v31  ;;  %2242 = vadd.xlane.f32.xlu0 %v1999_v43  ;;  %v2000_v43 = vmul.f32 %v6515_v47, %v6267_v4  ;;  %v8373_v35 = vld [vmem:[#allocation122_spill] sm:$0xff]  ;;  %vm861_vm7 = vcmp.eq.s32.totalorder %v5534_v10, %v8375_v56  ;;  %vm817_vm8 = vcmp.eq.s32.totalorder %v5534_v10, %v8376_v48  ;;  %v8377_v47 = vld [vmem:[#allocation123_spill] sm:$0xff]  ;;  %v8379_v48 = vld [vmem:[#allocation124_spill] sm:$0xff] }
 0x31e   :  { %2184 = vadd.xlane.f32.xlu1 %v1970_v55  ;;  %v2047_v50 = vpop.xlane.xlu0 %2046  ;;  %v6534_v55 = vsel %vm846_vm12, 1.0, %v8299_v44  ;;  %vm832_vm12 = vcmp.eq.s32.totalorder %v5534_v10, %v8381_v60 }
 0x31f   :  { %v6524_v8 = vsel %vm2632_vm4, %v2631_v61, %v2626_v2  ;;  %v2285_v29 = vadd.f32 %v2047_v50, %v8371_v20  ;;  %v2049_v34 = vpop.xlane.xlu1 %2048  ;;  %8374 = vst [vmem:[#allocation92_spill] sm:$0xff] %v6534_v55  ;;  %v2637_v2 = vrot.slane %v2284_v39, %v6293_v63  ;;  %v1986_v39 = vmul.f32 %v6534_v55, %v6259_v18 }
 0x320   :  { %v2286_v51 = vadd.f32 %v2049_v34, %v8373_v35  ;;  %v1971_v34 = vmul.f32 %v6528_v42, %v6230_v1  ;;  %v8387_v42 = vld [vmem:[#allocation95_spill] sm:$0xff] }
 0x321   :  { %v2641_v61 = vrot.slane %v2285_v29, %v6297_v46  ;;  %2214 = vadd.xlane.f32.xlu0 %v1985_v36  ;;  %v6550_v36 = vsel %vm861_vm7, 1.0, %v8299_v44  ;;  %vm862_vm7 = vcmp.eq.s32.totalorder %v5534_v10, %v8387_v42 }
 0x322   :  { %v2646_v50 = vrot.slane %v2286_v51, %v6305_v38  ;;  %2244 = vadd.xlane.f32.xlu1 %v2000_v43  ;;  %v2051_v20 = vpop.xlane.xlu0 %2050  ;;  %8378 = vst [vmem:[#allocation115_spill] sm:$0xff] %v6550_v36  ;;  %v6555_v43 = vsel %vm817_vm8, 1.0, %v8299_v44 }
 0x323   :  { %v2642_v35 = vsel %vm2534_vm1, %v2641_v61, %v2637_v2  ;;  %v2287_v53 = vadd.f32 %v2051_v20, %v8377_v47  ;;  %v2053_v56 = vpop.xlane.xlu1 %2052  ;;  %8380 = vst [vmem:[#allocation116_spill] sm:$0xff] %v6555_v43  ;;  %v8382_v47 = vld [vmem:[#allocation80_spill] sm:$0xff]  ;;  %v1957_v60 = vmul.f32 %v6555_v43, %v6159_v37 }
 0x324   :  { %v2647_v29 = vsel %vm2541_vm2, %v2646_v50, %v2642_v35  ;;  %v2288_v51 = vadd.f32 %v2053_v56, %v8379_v48  ;;  %vm847_vm11 = vcmp.eq.s32.totalorder %v5534_v10, %v8382_v47  ;;  %v2001_v50 = vmul.f32 %v6550_v36, %v6267_v4  ;;  %v8383_v56 = vld [vmem:[#allocation125_spill] sm:$0xff]  ;;  %v8385_v47 = vld [vmem:[#allocation126_spill] sm:$0xff]  ;;  %v8392_v36 = vld [vmem:[#allocation68_spill] sm:$0xff] }
 0x325   :  { %v2651_v2 = vrot.slane %v2287_v53, %v6329_v40  ;;  %2186 = vadd.xlane.f32.xlu0 %v1971_v34  ;;  %v6570_v53 = vsel %vm832_vm12, 1.0, %v8299_v44  ;;  %vm833_vm12 = vcmp.eq.s32.totalorder %v5534_v10, %v8392_v36 }
 0x326   :  { %v2656_v61 = vrot.slane %v2288_v51, %v6336_v24  ;;  %2216 = vadd.xlane.f32.xlu1 %v1986_v39  ;;  %v2055_v20 = vpop.xlane.xlu0 %2054  ;;  %8384 = vst [vmem:[#allocation117_spill] sm:$0xff] %v6570_v53  ;;  %v6575_v39 = vsel %vm847_vm11, 1.0, %v8299_v44 }
 0x327   :  { %v2652_v35 = vsel %vm2548_vm5, %v2651_v2, %v2647_v29  ;;  %v2289_v48 = vadd.f32 %v2055_v20, %v8383_v56  ;;  %v2057_v55 = vpop.xlane.xlu1 %2056  ;;  %8386 = vst [vmem:[#allocation118_spill] sm:$0xff] %v6575_v39  ;;  %v8388_v2 = vld [vmem:[#allocation54_spill] sm:$0xff]  ;;  %v1987_v42 = vmul.f32 %v6575_v39, %v6259_v18  ;;  %v8398_v39 = vld [vmem:[#allocation96_spill] sm:$0xff] }
 0x328   :  { %v2657_v34 = vsel %vm2555_vm6, %v2656_v61, %v2652_v35  ;;  %v2290_v51 = vadd.f32 %v2057_v55, %v8385_v47  ;;  %vm818_vm8 = vcmp.eq.s32.totalorder %v5534_v10, %v8388_v2  ;;  %v1972_v61 = vmul.f32 %v6570_v53, %v6230_v1  ;;  %v8390_v2 = vld [vmem:[#allocation127_spill] sm:$0xff] }
 0x329   :  { %v2661_v29 = vrot.slane %v2289_v48, %v6351_v49  ;;  %2246 = vadd.xlane.f32.xlu0 %v2001_v50  ;;  %v6590_v50 = vsel %vm862_vm7, 1.0, %v8299_v44  ;;  %vm863_vm7 = vcmp.eq.s32.totalorder %v5534_v10, %v8398_v39 }
 0x32a   :  { %v2666_v20 = vrot.slane %v2290_v51, %v6358_v62  ;;  %2158 = vadd.xlane.f32.xlu1 %v1957_v60  ;;  %v2059_v56 = vpop.xlane.xlu0 %2058  ;;  %8389 = vst [vmem:[#allocation78_spill] sm:$0xff] %v6590_v50  ;;  %v6595_v60 = vsel %vm818_vm8, 1.0, %v8299_v44 }
 0x32b   :  { %v2662_v55 = vsel %vm2562_vm9, %v2661_v29, %v2657_v34  ;;  %v2291_v35 = vadd.f32 %v2059_v56, %v5438_v7  ;;  %v2061_v47 = vpop.xlane.xlu1 %2060  ;;  %8391 = vst [vmem:[#allocation93_spill] sm:$0xff] %v6595_v60  ;;  %v8393_v7 = vld [vmem:[#allocation81_spill] sm:$0xff]  ;;  %v1958_v36 = vmul.f32 %v6595_v60, %v6159_v37 }
 0x32c   :  { %v2667_v48 = vsel %vm2569_vm10, %v2666_v20, %v2662_v55  ;;  %v2292_v51 = vadd.f32 %v2061_v47, %v8390_v2  ;;  %vm848_vm11 = vcmp.eq.s32.totalorder %v5534_v10, %v8393_v7  ;;  %v2002_v20 = vmul.f32 %v6590_v50, %v6267_v4  ;;  %v8394_v47 = vld [vmem:[#allocation128_spill] sm:$0xff]  ;;  %v8396_v7 = vld [vmem:[#allocation129_spill] sm:$0xff] }
 0x32d   :  { %v2671_v34 = vrot.slane %v2291_v35, %v6381_v5  ;;  %2188 = vadd.xlane.f32.xlu0 %v1972_v61  ;;  %v6610_v61 = vsel %vm833_vm12, 1.0, %v8299_v44  ;;  %v8404_v60 = vld [vmem:[#allocation69_spill] sm:$0xff] }
 0x32e   :  { %v2676_v29 = vrot.slane %v2292_v51, %v6388_v45  ;;  %2218 = vadd.xlane.f32.xlu1 %v1987_v42  ;;  %v2063_v56 = vpop.xlane.xlu0 %2062  ;;  %8395 = vst [vmem:[#allocation119_spill] sm:$0xff] %v6610_v61  ;;  %v6615_v42 = vsel %vm848_vm11, 1.0, %v8299_v44  ;;  %vm834_vm12 = vcmp.eq.s32.totalorder %v5534_v10, %v8404_v60 }
 0x32f   :  { %v2672_v55 = vsel %vm2576_vm13, %v2671_v34, %v2667_v48  ;;  %v2293_v2 = vadd.f32 %v2063_v56, %v8394_v47  ;;  %v2065_v53 = vpop.xlane.xlu1 %2064  ;;  %8397 = vst [vmem:[#allocation66_spill] sm:$0xff] %v6615_v42  ;;  %v8399_v34 = vld [vmem:[#allocation55_spill] sm:$0xff]  ;;  %v1988_v39 = vmul.f32 %v6615_v42, %v6259_v18 }
 0x330   :  { %v2677_v35 = vsel %vm2583_vm14, %v2676_v29, %v2672_v55  ;;  %v2294_v51 = vadd.f32 %v2065_v53, %v8396_v7  ;;  %vm819_vm8 = vcmp.eq.s32.totalorder %v5534_v10, %v8399_v34  ;;  %v1973_v29 = vmul.f32 %v6610_v61, %v6230_v1  ;;  %v8400_v55 = vld [vmem:[#allocation130_spill] sm:$0xff]  ;;  %v8402_v34 = vld [vmem:[#allocation131_spill] sm:$0xff]  ;;  %v8412_v61 = vld [vmem:[#allocation97_spill] sm:$0xff] }
 0x331   :  { %v2681_v48 = vrot.slane %v2293_v2, %v6409_v26  ;;  %2248 = vadd.xlane.f32.xlu0 %v2002_v20  ;;  %v6630_v20 = vsel %vm863_vm7, 1.0, %v8299_v44  ;;  %vm8406_vm7 = vcmask 786112  }
 0x332   :  { %v2686_v56 = vrot.slane %v2294_v51, %v6420_v3  ;;  %2160 = vadd.xlane.f32.xlu1 %v1958_v36  ;;  %v2067_v47 = vpop.xlane.xlu0 %2066  ;;  %8401 = vst [vmem:[#allocation120_spill] sm:$0xff] %v6630_v20  ;;  %v6635_v36 = vsel %vm819_vm8, 1.0, %v8299_v44  ;;  %vm8409_vm8 = vcmask 851712  }
 0x333   :  { %v2682_v53 = vsel %vm2590_vm0, %v2681_v48, %v2677_v35  ;;  %v2295_v7 = vadd.f32 %v2067_v47, %v8400_v55  ;;  %v2069_v50 = vpop.xlane.xlu1 %2068  ;;  %8403 = vst [vmem:[#allocation79_spill] sm:$0xff] %v6635_v36  ;;  %v8405_v48 = vld [vmem:[#allocation82_spill] sm:$0xff]  ;;  %v1959_v60 = vmul.f32 %v6635_v36, %v6159_v37 }
 0x334   :  { %v2687_v2 = vsel %vm7965_vm3, %v2686_v56, %v2682_v53  ;;  %v2296_v51 = vadd.f32 %v2069_v50, %v8402_v34  ;;  %vm849_vm11 = vcmp.eq.s32.totalorder %v5534_v10, %v8405_v48  ;;  %v2003_v56 = vmul.f32 %v6630_v20, %v6267_v4  ;;  %v8407_v53 = vld [vmem:[#allocation132_spill] sm:$0xff]  ;;  %v8410_v48 = vld [vmem:[#allocation133_spill] sm:$0xff] }
 0x335   :  { %v2691_v35 = vrot.slane %v2295_v7, %v6439_v32  ;;  %2190 = vadd.xlane.f32.xlu0 %v1973_v29  ;;  %v6650_v29 = vsel %vm834_vm12, 1.0, %v8299_v44  ;;  %vm864_vm3 = vcmp.eq.s32.totalorder %v5534_v10, %v8412_v61  ;;  %vm8414_vm12 = vcmask 917312  }
 0x336   :  { %v2696_v47 = vrot.slane %v2296_v51, %v6447_v30  ;;  %2220 = vadd.xlane.f32.xlu1 %v1988_v39  ;;  %v2071_v55 = vpop.xlane.xlu0 %2070  ;;  %8408 = vst [vmem:[#allocation121_spill] sm:$0xff] %v6650_v29  ;;  %v6655_v39 = vsel %vm849_vm11, 1.0, %v8299_v44 }
 0x337   :  { %v2692_v50 = vsel %vm8406_vm7, %v2691_v35, %v2687_v2  ;;  %v2297_v34 = vadd.f32 %v2071_v55, %v8407_v53  ;;  %v2073_v42 = vpop.xlane.xlu1 %2072  ;;  %8411 = vst [vmem:[#allocation122_spill] sm:$0xff] %v6655_v39  ;;  %v8413_v35 = vld [vmem:[#allocation56_spill] sm:$0xff]  ;;  %v1989_v61 = vmul.f32 %v6655_v39, %v6259_v18 }
 0x338   :  { %v2697_v7 = vsel %vm8409_vm8, %v2696_v47, %v2692_v50  ;;  %v2298_v51 = vadd.f32 %v2073_v42, %v8410_v48  ;;  %vm820_vm7 = vcmp.eq.s32.totalorder %v5534_v10, %v8413_v35  ;;  %v1974_v47 = vmul.f32 %v6650_v29, %v6230_v1  ;;  %v8415_v50 = vld [vmem:[#allocation134_spill] sm:$0xff] }
 0x339   :  { %v2701_v2 = vrot.slane %v2297_v34, %v6466_v57  ;;  %2250 = vadd.xlane.f32.xlu0 %v2003_v56  ;;  %v6672_v56 = vsel %vm864_vm3, 1.0, %v8299_v44  ;;  %v6675_v34 = vsel %vm820_vm7, 1.0, %v8299_v44  ;;  %vm3187_vm8 = vcmask 1041409  }
 0x33a   :  { %v2706_v55 = vrot.slane %v2298_v51, %v6473_v28  ;;  %2162 = vadd.xlane.f32.xlu1 %v1959_v60  ;;  %v2075_v53 = vpop.xlane.xlu0 %2074  ;;  %8416 = vst [vmem:[#allocation94_spill] sm:$0xff] %v6672_v56  ;;  %8417 = vst [vmem:[#allocation53_spill] sm:$0xff] %v6675_v34  ;;  %v8418_v60 = vld [vmem:[#allocation70_spill] sm:$0xff] }
 0x33b   :  { %v2702_v42 = vsel %vm8414_vm12, %v2701_v2, %v2697_v7  ;;  %v2299_v48 = vadd.f32 %v2075_v53, %v8415_v50  ;;  %v6667_v36 = vpop.xlane.xlu1 %2076  ;;  %vm835_vm11 = vcmp.eq.s32.totalorder %v5534_v10, %v8418_v60  ;;  %v8419_v7 = vld [vmem:[#allocation83_spill] sm:$0xff]  ;;  %v2004_v53 = vmul.f32 %v6672_v56, %v6267_v4 }
 0x33c   :  { %vm850_vm12 = vcmp.eq.s32.totalorder %v5534_v10, %v8419_v7  ;;  %v2707_v2 = vsel %vm2625_vm15, %v2706_v55, %v2702_v42  ;;  %v1960_v60 = vmul.f32 %v6675_v34, %v6159_v37  ;;  %v8423_v42 = vld [vmem:[#allocation98_spill] sm:$0xff] }
 0x33d   :  { %v2711_v51 = vrot.slane %v2299_v48, %v6497_v31  ;;  %2192 = vadd.xlane.f32.xlu0 %v1974_v47  ;;  %v6693_v47 = vsel %vm835_vm11, 1.0, %v8299_v44  ;;  %v6700_v55 = vsel %vm850_vm12, 1.0, %v8299_v44  ;;  %vm865_vm3 = vcmp.eq.s32.totalorder %v5534_v10, %v8423_v42  ;;  %v8456_v31 = vld [vmem:[#allocation88_spill] sm:$0xff] }
 0x33e   :  { %2222 = vadd.xlane.f32.xlu1 %v1989_v61  ;;  %v6683_v35 = vpop.xlane.xlu0 %2078  ;;  %8420 = vst [vmem:[#allocation123_spill] sm:$0xff] %v6693_v47  ;;  %8422 = vst [vmem:[#allocation67_spill] sm:$0xff] %v6700_v55  ;;  %v8424_v61 = vld [vmem:[#allocation57_spill] sm:$0xff]  ;;  %v1975_v7 = vmul.f32 %v6693_v47, %v6230_v1 }
 0x33f   :  { %v2712_v50 = vsel %vm2632_vm4, %v2711_v51, %v2707_v2  ;;  %v6688_v29 = vpop.xlane.xlu1 %2080  ;;  %vm821_vm7 = vcmp.eq.s32.totalorder %v5534_v10, %v8424_v61 }
 0x340   :  { %v6697_v48 = vsel %vm3187_vm8, %v2712_v50, %v6524_v8  ;;  %v1990_v8 = vmul.f32 %v6700_v55, %v6259_v18  ;;  %v6715_v50 = vsel %vm865_vm3, 1.0, %v8299_v44  ;;  %v6718_v42 = vsel %vm821_vm7, 1.0, %v8299_v44 }
 0x341   :  { %8421 = vst [vmem:[#allocation124_spill] sm:$0xff] %v6697_v48  ;;  %2252 = vadd.xlane.f32.xlu0 %v2004_v53  ;;  %8425 = vst [vmem:[#allocation80_spill] sm:$0xff] %v6715_v50  ;;  %v8427_v53 = vld [vmem:[#allocation71_spill] sm:$0xff]  ;;  %v2005_v34 = vmul.f32 %v6715_v50, %v6267_v4  ;;  %v1961_v47 = vmul.f32 %v6718_v42, %v6159_v37 }
 0x342   :  { %2164 = vadd.xlane.f32.xlu1 %v1960_v60  ;;  %v6706_v51 = vpop.xlane.xlu0 %2082  ;;  %8426 = vst [vmem:[#allocation125_spill] sm:$0xff] %v6718_v42  ;;  %vm836_vm11 = vcmp.eq.s32.totalorder %v5534_v10, %v8427_v53  ;;  %v8428_v60 = vld [vmem:[#allocation84_spill] sm:$0xff] }
 0x343   :  { %v6710_v2 = vpop.xlane.xlu1 %2084  ;;  %vm851_vm12 = vcmp.eq.s32.totalorder %v5534_v10, %v8428_v60  ;;  %v6733_v39 = vsel %vm836_vm11, 1.0, %v8299_v44 }
 0x344   :  { %8429 = vst [vmem:[#allocation126_spill] sm:$0xff] %v6733_v39  ;;  %v6736_v53 = vsel %vm851_vm12, 1.0, %v8299_v44  ;;  %v1976_v50 = vmul.f32 %v6733_v39, %v6230_v1 }
 0x345   :  { %2194 = vadd.xlane.f32.xlu0 %v1975_v7  ;;  %8430 = vst [vmem:[#allocation95_spill] sm:$0xff] %v6736_v53  ;;  %v8431_v7 = vld [vmem:[#allocation99_spill] sm:$0xff]  ;;  %v1991_v56 = vmul.f32 %v6736_v53, %v6259_v18 }
 0x346   :  { %2224 = vadd.xlane.f32.xlu1 %v1990_v8  ;;  %v6724_v61 = vpop.xlane.xlu0 %2086  ;;  %vm866_vm3 = vcmp.eq.s32.totalorder %v5534_v10, %v8431_v7  ;;  %v8432_v8 = vld [vmem:[#allocation58_spill] sm:$0xff] }
 0x347   :  { %v6728_v55 = vpop.xlane.xlu1 %2088  ;;  %vm822_vm7 = vcmp.eq.s32.totalorder %v5534_v10, %v8432_v8  ;;  %v6751_v20 = vsel %vm866_vm3, 1.0, %v8299_v44 }
 0x348   :  { %8433 = vst [vmem:[#allocation54_spill] sm:$0xff] %v6751_v20  ;;  %v6754_v7 = vsel %vm822_vm7, 1.0, %v8299_v44  ;;  %v2006_v39 = vmul.f32 %v6751_v20, %v6267_v4 }
 0x349   :  { %2254 = vadd.xlane.f32.xlu0 %v2005_v34  ;;  %8434 = vst [vmem:[#allocation127_spill] sm:$0xff] %v6754_v7  ;;  %v8435_v34 = vld [vmem:[#allocation72_spill] sm:$0xff]  ;;  %v1962_v43 = vmul.f32 %v6754_v7, %v6159_v37 }
 0x34a   :  { %2166 = vadd.xlane.f32.xlu1 %v1961_v47  ;;  %v6742_v60 = vpop.xlane.xlu0 %2090  ;;  %vm837_vm11 = vcmp.eq.s32.totalorder %v5534_v10, %v8435_v34  ;;  %v8436_v47 = vld [vmem:[#allocation85_spill] sm:$0xff] }
 0x34b   :  { %v6746_v42 = vpop.xlane.xlu1 %2092  ;;  %vm852_vm12 = vcmp.eq.s32.totalorder %v5534_v10, %v8436_v47  ;;  %v6769_v52 = vsel %vm837_vm11, 1.0, %v8299_v44 }
 0x34c   :  { %8437 = vst [vmem:[#allocation68_spill] sm:$0xff] %v6769_v52  ;;  %v6772_v34 = vsel %vm852_vm12, 1.0, %v8299_v44  ;;  %v1977_v20 = vmul.f32 %v6769_v52, %v6230_v1 }
 0x34d   :  { %2196 = vadd.xlane.f32.xlu0 %v1976_v50  ;;  %8438 = vst [vmem:[#allocation81_spill] sm:$0xff] %v6772_v34  ;;  %v8439_v50 = vld [vmem:[#allocation100_spill] sm:$0xff]  ;;  %v1992_v48 = vmul.f32 %v6772_v34, %v6259_v18 }
 0x34e   :  { %2226 = vadd.xlane.f32.xlu1 %v1991_v56  ;;  %v6760_v8 = vpop.xlane.xlu0 %2094  ;;  %vm867_vm3 = vcmp.eq.s32.totalorder %v5534_v10, %v8439_v50  ;;  %v8440_v56 = vld [vmem:[#allocation59_spill] sm:$0xff] }
 0x34f   :  { %v6764_v53 = vpop.xlane.xlu1 %2096  ;;  %vm823_vm7 = vcmp.eq.s32.totalorder %v5534_v10, %v8440_v56  ;;  %v6787_v54 = vsel %vm867_vm3, 1.0, %v8299_v44 }
 0x350   :  { %8441 = vst [vmem:[#allocation128_spill] sm:$0xff] %v6787_v54  ;;  %v6790_v50 = vsel %vm823_vm7, 1.0, %v8299_v44  ;;  %v2007_v52 = vmul.f32 %v6787_v54, %v6267_v4 }
 0x351   :  { %2256 = vadd.xlane.f32.xlu0 %v2006_v39  ;;  %8442 = vst [vmem:[#allocation129_spill] sm:$0xff] %v6790_v50  ;;  %v8443_v39 = vld [vmem:[#allocation73_spill] sm:$0xff]  ;;  %v1963_v41 = vmul.f32 %v6790_v50, %v6159_v37 }
 0x352   :  { %2168 = vadd.xlane.f32.xlu1 %v1962_v43  ;;  %v6778_v47 = vpop.xlane.xlu0 %2098  ;;  %vm838_vm11 = vcmp.eq.s32.totalorder %v5534_v10, %v8443_v39  ;;  %v8444_v43 = vld [vmem:[#allocation86_spill] sm:$0xff] }
 0x353   :  { %v6782_v7 = vpop.xlane.xlu1 %2100  ;;  %vm853_vm12 = vcmp.eq.s32.totalorder %v5534_v10, %v8444_v43  ;;  %v6805_v15 = vsel %vm838_vm11, 1.0, %v8299_v44 }
 0x354   :  { %8446 = vst [vmem:[#allocation55_spill] sm:$0xff] %v6805_v15  ;;  %v6808_v39 = vsel %vm853_vm12, 1.0, %v8299_v44  ;;  %v1978_v54 = vmul.f32 %v6805_v15, %v6230_v1 }
 0x355   :  { %2198 = vadd.xlane.f32.xlu0 %v1977_v20  ;;  %8447 = vst [vmem:[#allocation130_spill] sm:$0xff] %v6808_v39  ;;  %v8448_v20 = vld [vmem:[#allocation101_spill] sm:$0xff]  ;;  %v1993_v50 = vmul.f32 %v6808_v39, %v6259_v18 }
 0x356   :  { %2228 = vadd.xlane.f32.xlu1 %v1992_v48  ;;  %v6796_v56 = vpop.xlane.xlu0 %2102  ;;  %vm868_vm3 = vcmp.eq.s32.totalorder %v5534_v10, %v8448_v20  ;;  %v8449_v48 = vld [vmem:[#allocation74_spill] sm:$0xff] }
 0x357   :  { %v6800_v34 = vpop.xlane.xlu1 %2104  ;;  %vm839_vm7 = vcmp.eq.s32.totalorder %v5534_v10, %v8449_v48  ;;  %v6823_v14 = vsel %vm868_vm3, 1.0, %v8299_v44  ;;  %vm855_vm3 = vcmp.eq.s32.totalorder %v5534_v10, %v8456_v31 }
 0x358   :  { %8445 = vst [vmem:[#allocation96_spill] sm:$0xff] %v6800_v34  ;;  %8451 = vst [vmem:[#allocation69_spill] sm:$0xff] %v6823_v14  ;;  %v6826_v20 = vsel %vm839_vm7, 1.0, %v8299_v44  ;;  %v2008_v15 = vmul.f32 %v6823_v14, %v6267_v4 }
 0x359   :  { %2258 = vadd.xlane.f32.xlu0 %v2007_v52  ;;  %8452 = vst [vmem:[#allocation82_spill] sm:$0xff] %v6826_v20  ;;  %v8453_v52 = vld [vmem:[#allocation87_spill] sm:$0xff]  ;;  %v1979_v21 = vmul.f32 %v6826_v20, %v6230_v1  ;;  %v6857_v20 = vsel %vm855_vm3, 1.0, %v8299_v44  ;;  %vm8516_vm3 = vcmask 786112  }
 0x35a   :  { %2170 = vadd.xlane.f32.xlu1 %v1963_v41  ;;  %v6814_v43 = vpop.xlane.xlu0 %2106  ;;  %vm854_vm11 = vcmp.eq.s32.totalorder %v5534_v10, %v8453_v52  ;;  %v8454_v41 = vld [vmem:[#allocation102_spill] sm:$0xff]  ;;  %8459 = vst [vmem:[#allocation97_spill] sm:$0xff] %v6857_v20 }
 0x35b   :  { %8450 = vst [vmem:[#allocation131_spill] sm:$0xff] %v6814_v43  ;;  %v6818_v37 = vpop.xlane.xlu1 %2108  ;;  %vm869_vm12 = vcmp.eq.s32.totalorder %v5534_v10, %v8454_v41  ;;  %v6841_v33 = vsel %vm854_vm11, 1.0, %v8299_v44 }
 0x35c   :  { %8455 = vst [vmem:[#allocation132_spill] sm:$0xff] %v6841_v33  ;;  %v1994_v41 = vmul.f32 %v6841_v33, %v6259_v18 }
 0x35d   :  { %2200 = vadd.xlane.f32.xlu0 %v1978_v54  ;;  %v6846_v54 = vsel %vm869_vm12, 1.0, %v8299_v44  ;;  %vm8512_vm12 = vcmask 720512  }
 0x35e   :  { %2230 = vadd.xlane.f32.xlu1 %v1993_v50  ;;  %v6832_v48 = vpop.xlane.xlu0 %2110  ;;  %8457 = vst [vmem:[#allocation133_spill] sm:$0xff] %v6846_v54  ;;  %v8458_v50 = vld [vmem:[#allocation103_spill] sm:$0xff]  ;;  %v2009_v31 = vmul.f32 %v6846_v54, %v6267_v4 }
 0x35f   :  { %v6836_v39 = vpop.xlane.xlu1 %2112  ;;  %vm870_vm7 = vcmp.eq.s32.totalorder %v5534_v10, %v8458_v50  ;;  %v1995_v50 = vmul.f32 %v6857_v20, %v6259_v18 }
 0x360   :  { %v6862_v14 = vsel %vm870_vm7, 1.0, %v8299_v44  ;;  %vm8530_vm7 = vcmask 851712  }
 0x361   :  { %2260 = vadd.xlane.f32.xlu0 %v2008_v15  ;;  %8460 = vst [vmem:[#allocation56_spill] sm:$0xff] %v6862_v14  ;;  %v8461_v15 = vld [vmem:[#allocation105_spill] sm:$0xff]  ;;  %v2010_v17 = vmul.f32 %v6862_v14, %v6267_v4 }
 0x362   :  { %2202 = vadd.xlane.f32.xlu1 %v1979_v21  ;;  %v6850_v52 = vpop.xlane.xlu0 %2114  ;;  %vm871_vm11 = vcmp.eq.s32.totalorder %v5534_v10, %v8461_v15 }
 0x363   :  { %v6854_v1 = vpop.xlane.xlu1 %2116  ;;  %v6875_v54 = vsel %vm871_vm11, 1.0, %v8299_v44  ;;  %vm8531_vm11 = vcmask 917312  }
 0x364   :  { %8462 = vst [vmem:[#allocation134_spill] sm:$0xff] %v6875_v54  ;;  %v2011_v10 = vmul.f32 %v6875_v54, %v6267_v4 }
 0x365   :  { %2232 = vadd.xlane.f32.xlu0 %v1994_v41 }
 0x366   :  { %2262 = vadd.xlane.f32.xlu1 %v2009_v31  ;;  %v6866_v21 = vpop.xlane.xlu0 %2118 }
 0x367   :  { %v6870_v33 = vpop.xlane.xlu1 %2120 }
 0x369   :  { %2234 = vadd.xlane.f32.xlu0 %v1995_v50 }
 0x36a   :  { %2264 = vadd.xlane.f32.xlu1 %v2010_v17  ;;  %v6877_v28 = vpop.xlane.xlu0 %2122 }
 0x36b   :  { %v6881_v41 = vpop.xlane.xlu1 %2124 }
 0x36d   :  { %2266 = vadd.xlane.f32.xlu0 %v2011_v10 }
 0x36e   :  { %v6883_v31 = vpop.xlane.xlu0 %2126 }
 0x36f   :  { %v6885_v18 = vpop.xlane.xlu1 %2128 }
 0x372   :  { %v6887_v15 = vpop.xlane.xlu0 %2130 }
 0x373   :  { %v6889_v14 = vpop.xlane.xlu1 %2132 }
 0x374   :  { %8463 = vst [vmem:[#allocation70_spill] sm:$0xff] %v6889_v14 }
 0x376   :  { %v6891_v44 = vpop.xlane.xlu0 %2134 }
 0x377   :  { %8464 = vst [vmem:[#allocation83_spill] sm:$0xff] %v6891_v44  ;;  %v6893_v50 = vpop.xlane.xlu1 %2136 }
 0x378   :  { %8465 = vst [vmem:[#allocation98_spill] sm:$0xff] %v6893_v50 }
 0x37a   :  { %v6895_v17 = vpop.xlane.xlu0 %2138 }
 0x37b   :  { %8466 = vst [vmem:[#allocation57_spill] sm:$0xff] %v6895_v17  ;;  %v6897_v20 = vpop.xlane.xlu1 %2140 }
 0x37e   :  { %v6899_v4 = vpop.xlane.xlu0 %2142 }
 0x37f   :  { %v6901_v54 = vpop.xlane.xlu1 %2144 }
 0x382   :  { %v6903_v10 = vpop.xlane.xlu0 %2146 }
 0x383   :  { %v6905_v9 = vpop.xlane.xlu1 %2148 }
 0x384   :  { %8467 = vst [vmem:[#allocation71_spill] sm:$0xff] %v6905_v9 }
 0x386   :  { %v6907_v19 = vpop.xlane.xlu0 %2150 }
 0x387   :  { %8468 = vst [vmem:[#allocation84_spill] sm:$0xff] %v6907_v19  ;;  %v6909_v11 = vpop.xlane.xlu1 %2152 }
 0x388   :  { %8469 = vst [vmem:[#allocation99_spill] sm:$0xff] %v6909_v11 }
 0x38a   :  { %v6911_v14 = vpop.xlane.xlu0 %2154 }
 0x38b   :  { %8470 = vst [vmem:[#allocation58_spill] sm:$0xff] %v6911_v14  ;;  %v6913_v44 = vpop.xlane.xlu1 %2156 }
 0x38c   :  { %8471 = vst [vmem:[#allocation72_spill] sm:$0xff] %v6913_v44 }
 0x38e   :  { %v6915_v50 = vpop.xlane.xlu0 %2172 }
 0x38f   :  { %8472 = vst [vmem:[#allocation85_spill] sm:$0xff] %v6915_v50  ;;  %v6917_v17 = vpop.xlane.xlu1 %2174 }
 0x390   :  { %8473 = vst [vmem:[#allocation100_spill] sm:$0xff] %v6917_v17 }
 0x392   :  { %v6919_v43 = vpop.xlane.xlu0 %2176 }
 0x393   :  { %8474 = vst [vmem:[#allocation59_spill] sm:$0xff] %v6919_v43  ;;  %v6921_v34 = vpop.xlane.xlu1 %2204 }
 0x394   :  { %8475 = vst [vmem:[#allocation73_spill] sm:$0xff] %v6921_v34 }
 0x396   :  { %v6923_v57 = vpop.xlane.xlu0 %2206 }
 0x397   :  { %8476 = vst [vmem:[#allocation86_spill] sm:$0xff] %v6923_v57  ;;  %v6925_v27 = vpop.xlane.xlu1 %2178  ;;  %v8487_v57 = vld [vmem:[#allocation136_spill] sm:$0xff] }
 0x398   :  { %8477 = vst [vmem:[#allocation101_spill] sm:$0xff] %v6925_v27  ;;  %v2301_v27 = vadd.f32 %v6683_v35, %v8487_v57  ;;  %v8494_v57 = vld [vmem:[#allocation152_spill] sm:$0xff] }
 0x399   :  { %v2317_v35 = vadd.f32 %v6832_v48, %v8494_v57  ;;  %v8499_v48 = vld [vmem:[#allocation153_spill] sm:$0xff] }
 0x39a   :  { %v6927_v9 = vpop.xlane.xlu0 %2208 }
 0x39b   :  { %8478 = vst [vmem:[#allocation74_spill] sm:$0xff] %v6927_v9  ;;  %v6929_v19 = vpop.xlane.xlu1 %2236  ;;  %v2799_v57 = vrot.slane %v2317_v35, %v6297_v46 }
 0x39c   :  { %8479 = vst [vmem:[#allocation87_spill] sm:$0xff] %v6929_v19  ;;  %v8489_v19 = vld [vmem:[#allocation135_spill] sm:$0xff] }
 0x39e   :  { %v6931_v11 = vpop.xlane.xlu0 %2238 }
 0x39f   :  { %8480 = vst [vmem:[#allocation102_spill] sm:$0xff] %v6931_v11  ;;  %v6933_v14 = vpop.xlane.xlu1 %2180  ;;  %v2300_v11 = vadd.f32 %v6667_v36, %v8489_v19  ;;  %v8495_v19 = vld [vmem:[#allocation139_spill] sm:$0xff] }
 0x3a0   :  { %8481 = vst [vmem:[#allocation88_spill] sm:$0xff] %v6933_v14  ;;  %v2302_v14 = vadd.f32 %v6688_v29, %v8490_v22  ;;  %v2304_v36 = vadd.f32 %v6710_v2, %v8495_v19  ;;  %v8500_v2 = vld [vmem:[#allocation154_spill] sm:$0xff] }
 0x3a1   :  { %v2319_v19 = vadd.f32 %v6850_v52, %v8500_v2  ;;  %v8503_v52 = vld [vmem:[#allocation155_spill] sm:$0xff]  ;;  %v8504_v2 = vld [vmem:[#allocation156_spill] sm:$0xff] }
 0x3a2   :  { %v6935_v44 = vpop.xlane.xlu0 %2210 }
 0x3a3   :  { %8482 = vst [vmem:[#allocation103_spill] sm:$0xff] %v6935_v44  ;;  %v6937_v50 = vpop.xlane.xlu1 %2240 }
 0x3a4   :  { %8483 = vst [vmem:[#allocation105_spill] sm:$0xff] %v6937_v50  ;;  %v2720_v50 = vrot.slane %v2301_v27, %v6297_v46 }
 0x3a6   :  { %v6939_v17 = vpop.xlane.xlu0 %2182 }
 0x3a7   :  { %8484 = vst [vmem:[#allocation264_spill] sm:$0xff] %v6939_v17  ;;  %v6941_v43 = vpop.xlane.xlu1 %2212  ;;  %v8492_v17 = vld [vmem:[#allocation138_spill] sm:$0xff] }
 0x3a8   :  { %8485 = vst [vmem:[#allocation265_spill] sm:$0xff] %v6941_v43  ;;  %v2303_v43 = vadd.f32 %v6706_v51, %v8492_v17  ;;  %v8497_v17 = vld [vmem:[#allocation151_spill] sm:$0xff] }
 0x3aa   :  { %v6943_v34 = vpop.xlane.xlu0 %2242  ;;  %v2730_v27 = vrot.slane %v2303_v43, %v6329_v40  ;;  %v2735_v43 = vrot.slane %v2304_v36, %v6336_v24  ;;  %v2320_v36 = vadd.f32 %v6854_v1, %v8503_v52  ;;  %v8508_v52 = vld [vmem:[#allocation145_spill] sm:$0xff] }
 0x3ab   :  { %8486 = vst [vmem:[#allocation266_spill] sm:$0xff] %v6943_v34  ;;  %v6947_v9 = vpop.xlane.xlu1 %2184  ;;  %v2716_v34 = vrot.slane %v2300_v11, %v6293_v63  ;;  %v2316_v11 = vadd.f32 %v6818_v37, %v8497_v17 }
 0x3ac   :  { %8488 = vst [vmem:[#allocation136_spill] sm:$0xff] %v6947_v9  ;;  %v2725_v9 = vrot.slane %v2302_v14, %v6305_v38  ;;  %v2318_v14 = vadd.f32 %v6836_v39, %v8499_v48 }
 0x3ad   :  { %v2721_v29 = vsel %vm2534_vm1, %v2720_v50, %v2716_v34  ;;  %v8501_v50 = vld [vmem:[#allocation141_spill] sm:$0xff]  ;;  %v2795_v35 = vrot.slane %v2316_v11, %v6293_v63 }
 0x3ae   :  { %v6953_v44 = vpop.xlane.xlu0 %2214  ;;  %v2726_v34 = vsel %vm2541_vm2, %v2725_v9, %v2721_v29  ;;  %v2804_v9 = vrot.slane %v2318_v14, %v6305_v38  ;;  %v2809_v29 = vrot.slane %v2319_v19, %v6329_v40 }
 0x3af   :  { %8491 = vst [vmem:[#allocation135_spill] sm:$0xff] %v6953_v44  ;;  %v6958_v30 = vpop.xlane.xlu1 %2244  ;;  %v8496_v44 = vld [vmem:[#allocation140_spill] sm:$0xff]  ;;  %v2731_v37 = vsel %vm2548_vm5, %v2730_v27, %v2726_v34  ;;  %v2321_v27 = vadd.f32 %v6866_v21, %v8504_v2  ;;  %v2310_v2 = vadd.f32 %v6764_v53, %v8508_v52  ;;  %v2324_v53 = vadd.f32 %v6881_v41, %v5567_v0 }
 0x3b0   :  { %8493 = vst [vmem:[#allocation137_spill] sm:$0xff] %v6958_v30  ;;  %v2305_v51 = vadd.f32 %v6724_v61, %v8496_v44  ;;  %v2306_v61 = vadd.f32 %v6728_v55, %v8501_v50  ;;  %v2800_v55 = vsel %vm2534_vm1, %v2799_v57, %v2795_v35  ;;  %v8506_v50 = vld [vmem:[#allocation144_spill] sm:$0xff]  ;;  %v2334_v0 = vadd.f32 %v6901_v54, %v5657_v13 }
 0x3b1   :  { %v2309_v57 = vadd.f32 %v6760_v8, %v8506_v50  ;;  %v2805_v21 = vsel %vm2541_vm2, %v2804_v9, %v2800_v55  ;;  %v2819_v35 = vrot.slane %v2321_v27, %v6351_v49  ;;  %v8509_v55 = vld [vmem:[#allocation146_spill] sm:$0xff]  ;;  %v2333_v27 = vadd.f32 %v6899_v4, %v5653_v23 }
 0x3b2   :  { %v6966_v22 = vpop.xlane.xlu0 %2186  ;;  %v2740_v17 = vrot.slane %v2305_v51, %v6351_v49  ;;  %v2736_v51 = vsel %vm2555_vm6, %v2735_v43, %v2731_v37  ;;  %v2814_v43 = vrot.slane %v2320_v36, %v6336_v24  ;;  %v8507_v37 = vld [vmem:[#allocation157_spill] sm:$0xff]  ;;  %v2765_v4 = vrot.slane %v2310_v2, %v6420_v3 }
 0x3b3   :  { %v6974_v30 = vpop.xlane.xlu1 %2216  ;;  %v2834_v13 = vrot.slane %v2324_v53, %v6388_v45  ;;  %v2326_v54 = vadd.f32 %v6885_v18, %v5585_v58 }
 0x3b4   :  { %8498 = vst [vmem:[#allocation138_spill] sm:$0xff] %v6974_v30  ;;  %v8502_v30 = vld [vmem:[#allocation142_spill] sm:$0xff]  ;;  %v2741_v14 = vsel %vm2562_vm9, %v2740_v17, %v2736_v51  ;;  %v2323_v17 = vadd.f32 %v6877_v28, %v5565_v59 }
 0x3b5   :  { %v2307_v39 = vadd.f32 %v6742_v60, %v8502_v30  ;;  %v2745_v30 = vrot.slane %v2306_v61, %v6358_v62  ;;  %v8505_v60 = vld [vmem:[#allocation143_spill] sm:$0xff]  ;;  %v2322_v61 = vadd.f32 %v6870_v33, %v8507_v37  ;;  %v2760_v33 = vrot.slane %v2309_v57, %v6409_v26 }
 0x3b6   :  { %v6985_v44 = vpop.xlane.xlu0 %2246  ;;  %v2308_v11 = vadd.f32 %v6746_v42, %v8505_v60  ;;  %v2810_v42 = vsel %vm2548_vm5, %v2809_v29, %v2805_v21  ;;  %v2311_v29 = vadd.f32 %v6778_v47, %v8509_v55  ;;  %v2829_v60 = vrot.slane %v2323_v17, %v6381_v5  ;;  %v8514_v17 = vld [vmem:[#allocation175_spill] sm:$0xff]  ;;  %v8519_v55 = vld [vmem:[#allocation110_spill] sm:$0xff] }
 0x3b7   :  { %v6992_v48 = vpop.xlane.xlu1 %2158  ;;  %v2750_v1 = vrot.slane %v2307_v39, %v6381_v5  ;;  %v2746_v39 = vsel %vm2569_vm10, %v2745_v30, %v2741_v14  ;;  %v2815_v28 = vsel %vm2555_vm6, %v2814_v43, %v2810_v42  ;;  %v2824_v51 = vrot.slane %v2322_v61, %v6358_v62  ;;  %v8510_v14 = vld [vmem:[#allocation147_spill] sm:$0xff]  ;;  %v8513_v42 = vld [vmem:[#allocation76_spill] sm:$0xff] }
 0x3b8   :  { %v2755_v8 = vrot.slane %v2308_v11, %v6388_v45  ;;  %v2820_v30 = vsel %vm2562_vm9, %v2819_v35, %v2815_v28  ;;  %v2325_v11 = vadd.f32 %v6883_v31, %v5581_v12  ;;  %v2332_v47 = vadd.f32 %v6897_v20, %v5639_v6  ;;  %v8511_v31 = vld [vmem:[#allocation148_spill] sm:$0xff] }
 0x3b9   :  { %v2751_v36 = vsel %vm2576_vm13, %v2750_v1, %v2746_v39  ;;  %v2312_v1 = vadd.f32 %v6782_v7, %v8510_v14  ;;  %v2770_v57 = vrot.slane %v2311_v29, %v6439_v32  ;;  %v2878_v12 = vrot.slane %v2333_v27, %v6297_v46  ;;  %v8515_v39 = vld [vmem:[#allocation71_spill] sm:$0xff]  ;;  %v8520_v27 = vld [vmem:[#allocation149_spill] sm:$0xff]  ;;  %v8521_v28 = vld [vmem:[#allocation96_spill] sm:$0xff] }
 0x3ba   :  { %v7005_v34 = vpop.xlane.xlu0 %2188  ;;  %v2756_v23 = vsel %vm2583_vm14, %v2755_v8, %v2751_v36  ;;  %v2335_v6 = vadd.f32 %v6903_v10, %v5673_v25  ;;  %v2313_v21 = vadd.f32 %v6796_v56, %v8511_v31  ;;  %v2825_v7 = vsel %vm2569_vm10, %v2824_v51, %v2820_v30  ;;  %v8524_v14 = vld [vmem:[#allocation163_spill] sm:$0xff] }
 0x3bb   :  { %v7011_v19 = vpop.xlane.xlu1 %2218  ;;  %v2761_v50 = vsel %vm2590_vm0, %v2760_v33, %v2756_v23  ;;  %v2830_v43 = vsel %vm2576_vm13, %v2829_v60, %v2825_v7  ;;  %v2839_v37 = vrot.slane %v2325_v11, %v6409_v26  ;;  %v2327_v61 = vadd.f32 %v6887_v15, %v5599_v16  ;;  %v8517_v16 = vld [vmem:[#allocation178_spill] sm:$0xff]  ;;  %v8518_v15 = vld [vmem:[#allocation84_spill] sm:$0xff]  ;;  %v8523_v11 = vld [vmem:[#allocation131_spill] sm:$0xff] }
 0x3bc   :  { %v2874_v25 = vrot.slane %v2332_v47, %v6293_v63  ;;  %v2766_v10 = vsel %vm8512_vm12, %v2765_v4, %v2761_v50  ;;  %v2775_v56 = vrot.slane %v2312_v1, %v8513_v42  ;;  %v2883_v35 = vrot.slane %v2334_v0, %v6305_v38  ;;  %v8522_v60 = vld [vmem:[#allocation150_spill] sm:$0xff]  ;;  %v8529_v7 = vld [vmem:[#allocation99_spill] sm:$0xff] }
 0x3bd   :  { %v2336_v8 = vadd.f32 %v8515_v39, %v8514_v17  ;;  %v2771_v58 = vsel %vm8516_vm3, %v2770_v57, %v2766_v10  ;;  %v2888_v2 = vrot.slane %v2335_v6, %v6329_v40  ;;  %v2337_v36 = vadd.f32 %v8518_v15, %v8517_v16  ;;  %v8525_v1 = vld [vmem:[#allocation70_spill] sm:$0xff]  ;;  %v8527_v57 = vld [vmem:[#allocation83_spill] sm:$0xff]  ;;  %v8535_v15 = vld [vmem:[#allocation112_spill] sm:$0xff] }
 0x3be   :  { %v7025_v9 = vpop.xlane.xlu0 %2248  ;;  %v2879_v18 = vsel %vm2534_vm1, %v2878_v12, %v2874_v25  ;;  %v2780_v29 = vrot.slane %v2313_v21, %v8519_v55  ;;  %v2314_v51 = vadd.f32 %v8521_v28, %v8520_v27  ;;  %v2835_v53 = vsel %vm2583_vm14, %v2834_v13, %v2830_v43  ;;  %v8526_v50 = vld [vmem:[#allocation166_spill] sm:$0xff]  ;;  %v8528_v21 = vld [vmem:[#allocation179_spill] sm:$0xff] }
 0x3bf   :  { %v7033_v59 = vpop.xlane.xlu1 %2160  ;;  %v2844_v30 = vrot.slane %v2326_v54, %v6420_v3  ;;  %v2315_v47 = vadd.f32 %v8523_v11, %v8522_v60  ;;  %v2840_v23 = vsel %vm2590_vm0, %v2839_v37, %v2835_v53  ;;  %v2849_v4 = vrot.slane %v2327_v61, %v6439_v32  ;;  %v8532_v17 = vld [vmem:[#allocation111_spill] sm:$0xff]  ;;  %v8538_v60 = vld [vmem:[#allocation170_spill] sm:$0xff] }
 0x3c0   :  { %v2328_v0 = vadd.f32 %v8525_v1, %v8524_v14  ;;  %v2329_v12 = vadd.f32 %v8527_v57, %v8526_v50  ;;  %v2884_v6 = vsel %vm2541_vm2, %v2883_v35, %v2879_v18  ;;  %v2893_v31 = vrot.slane %v2336_v8, %v6336_v24  ;;  %v8533_v8 = vld [vmem:[#allocation182_spill] sm:$0xff]  ;;  %v8540_v14 = vld [vmem:[#allocation183_spill] sm:$0xff]  ;;  %v8543_v50 = vld [vmem:[#allocation85_spill] sm:$0xff] }
 0x3c1   :  { %v2338_v13 = vadd.f32 %v8529_v7, %v8528_v21  ;;  %v2776_v43 = vsel %vm8530_vm7, %v2775_v56, %v2771_v58  ;;  %v2889_v37 = vsel %vm2548_vm5, %v2888_v2, %v2884_v6  ;;  %v2898_v61 = vrot.slane %v2337_v36, %v6351_v49  ;;  %v8534_v18 = vld [vmem:[#allocation58_spill] sm:$0xff]  ;;  %v8536_v58 = vld [vmem:[#allocation167_spill] sm:$0xff]  ;;  %v8545_v21 = vld [vmem:[#allocation100_spill] sm:$0xff] }
 0x3c2   :  { %v7051_v41 = vpop.xlane.xlu0 %2190  ;;  %v2781_v10 = vsel %vm8531_vm11, %v2780_v29, %v2776_v43  ;;  %v2785_v39 = vrot.slane %v2314_v51, %v8532_v17  ;;  %v2845_v35 = vsel %vm8512_vm12, %v2844_v30, %v2840_v23  ;;  %v2339_v16 = vadd.f32 %v8534_v18, %v8533_v8  ;;  %v8537_v2 = vld [vmem:[#allocation98_spill] sm:$0xff]  ;;  %v8539_v29 = vld [vmem:[#allocation57_spill] sm:$0xff] }
 0x3c3   :  { %v7058_v20 = vpop.xlane.xlu1 %2220  ;;  %v2790_v27 = vrot.slane %v2315_v47, %v8535_v15  ;;  %v2850_v28 = vsel %vm8516_vm3, %v2849_v4, %v2845_v35  ;;  %v2854_v56 = vrot.slane %v2328_v0, %v8513_v42  ;;  %v2330_v36 = vadd.f32 %v8537_v2, %v8536_v58  ;;  %v8541_v4 = vld [vmem:[#allocation72_spill] sm:$0xff]  ;;  %v8542_v0 = vld [vmem:[#allocation199_spill] sm:$0xff]  ;;  %v8544_v6 = vld [vmem:[#allocation202_spill] sm:$0xff] }
 0x3c4   :  { %v2859_v53 = vrot.slane %v2329_v12, %v8519_v55  ;;  %v2331_v11 = vadd.f32 %v8539_v29, %v8538_v60  ;;  %v2894_v51 = vsel %vm2555_vm6, %v2893_v31, %v2889_v37  ;;  %v2903_v30 = vrot.slane %v2338_v13, %v6358_v62  ;;  %v8548_v35 = vld [vmem:[#allocation59_spill] sm:$0xff] }
 0x3c5   :  { %v2899_v47 = vsel %vm2562_vm9, %v2898_v61, %v2894_v51  ;;  %v2340_v1 = vadd.f32 %v8541_v4, %v8540_v14  ;;  %v2348_v57 = vadd.f32 %v8543_v50, %v8542_v0  ;;  %v2349_v12 = vadd.f32 %v8545_v21, %v8544_v6  ;;  %v8547_v61 = vld [vmem:[#allocation203_spill] sm:$0xff]  ;;  %v8553_v14 = vld [vmem:[#allocation73_spill] sm:$0xff]  ;;  %v8554_v4 = vld [vmem:[#allocation206_spill] sm:$0xff] }
 0x3c6   :  { %v7076_v52 = vpop.xlane.xlu0 %2250  ;;  %v2786_v43 = vsel %vm2625_vm15, %v2785_v39, %v2781_v10  ;;  %v2908_v31 = vrot.slane %v2339_v16, %v6381_v5  ;;  %vm3189_vm7 = vcmask 1042434   ;;  %vm8546_vm11 = vcmask 851712   ;;  %v8558_v6 = vld [vmem:[#allocation24_spill] sm:$0xff]  ;;  %v8559_v21 = vld [vmem:[#allocation74_spill] sm:$0xff] }
 0x3c7   :  { %v7083_v33 = vpop.xlane.xlu1 %2162  ;;  %v2791_v13 = vsel %vm2632_vm4, %v2790_v27, %v2786_v43  ;;  %v2855_v37 = vsel %vm8546_vm11, %v2854_v56, %v2850_v28  ;;  %v2350_v8 = vadd.f32 %v8548_v35, %v8547_v61  ;;  %vm8549_vm12 = vcmask 917312   ;;  %v8550_v27 = vld [vmem:[#allocation23_spill] sm:$0xff]  ;;  %v8551_v28 = vld [vmem:[#allocation86_spill] sm:$0xff] }
 0x3c8   :  { %v2860_v18 = vsel %vm8549_vm12, %v2859_v53, %v2855_v37  ;;  %v2864_v58 = vrot.slane %v2330_v36, %v8532_v17  ;;  %v2869_v2 = vrot.slane %v2331_v11, %v8535_v15  ;;  %v2904_v60 = vsel %vm2569_vm10, %v2903_v30, %v2899_v47  ;;  %v8552_v36 = vld [vmem:[#allocation22_spill] sm:$0xff]  ;;  %v8555_v30 = vld [vmem:[#allocation101_spill] sm:$0xff] }
 0x3c9   :  { %v2913_v10 = vrot.slane %v2340_v1, %v6388_v45  ;;  %v2953_v39 = vrot.slane %v2348_v57, %v6293_v63  ;;  %v2957_v16 = vrot.slane %v2349_v12, %v6297_v46  ;;  %v2365_v56 = vadd.f32 %v8551_v28, %v8550_v27  ;;  %v8556_v1 = vld [vmem:[#allocation124_spill] sm:$0xff]  ;;  %v8563_v28 = vld [vmem:[#allocation207_spill] sm:$0xff]  ;;  %v8582_v15 = vld [vmem:[#allocation137_spill] sm:$0xff] }
 0x3ca   :  { %v7102_v54 = vpop.xlane.xlu0 %2192  ;;  %v2909_v53 = vsel %vm2576_vm13, %v2908_v31, %v2904_v60  ;;  %v2364_v11 = vadd.f32 %v8553_v14, %v8552_v36  ;;  %v2351_v47 = vadd.f32 %v8555_v30, %v8554_v4  ;;  %v2962_v0 = vrot.slane %v2350_v8, %v6305_v38  ;;  %v8562_v60 = vld [vmem:[#allocation102_spill] sm:$0xff]  ;;  %v8564_v36 = vld [vmem:[#allocation88_spill] sm:$0xff] }
 0x3cb   :  { %v7107_v25 = vpop.xlane.xlu1 %2222  ;;  %v7162_v50 = vsel %vm3189_vm7, %v2791_v13, %v8556_v1  ;;  %v2865_v57 = vsel %vm2625_vm15, %v2864_v58, %v2860_v18  ;;  %v2366_v12 = vadd.f32 %v8559_v21, %v8558_v6  ;;  %v7173_v37 = vsel %vm2583_vm14, %v2913_v10, %v2909_v53  ;;  %v8561_v58 = vld [vmem:[#allocation39_spill] sm:$0xff]  ;;  %v8565_v10 = vld [vmem:[#allocation38_spill] sm:$0xff]  ;;  %v8569_v30 = vld [vmem:[#allocation40_spill] sm:$0xff] }
 0x3cc   :  { %8557 = vst [vmem:[#allocation152_spill] sm:$0xff] %v7162_v50  ;;  %v7170_v31 = vsel %vm2632_vm4, %v2869_v2, %v2865_v57  ;;  %v2958_v61 = vsel %vm2534_vm1, %v2957_v16, %v2953_v39  ;;  %v3036_v35 = vrot.slane %v2365_v56, %v6297_v46  ;;  %v3032_v13 = vrot.slane %v2364_v11, %v6293_v63  ;;  %v8566_v53 = vld [vmem:[#allocation87_spill] sm:$0xff]  ;;  %v8567_v39 = vld [vmem:[#allocation25_spill] sm:$0xff]  ;;  %v8572_v6 = vld [vmem:[#allocation264_spill] sm:$0xff] }
 0x3cd   :  { %8560 = vst [vmem:[#allocation139_spill] sm:$0xff] %v7170_v31  ;;  %v2967_v18 = vrot.slane %v2351_v47, %v6329_v40  ;;  %v2381_v27 = vadd.f32 %v8562_v60, %v8561_v58  ;;  %v2352_v2 = vadd.f32 %v8564_v36, %v8563_v28  ;;  %v2963_v14 = vsel %vm2541_vm2, %v2962_v0, %v2958_v61  ;;  %v8568_v16 = vld [vmem:[#allocation103_spill] sm:$0xff]  ;;  %v8570_v1 = vld [vmem:[#allocation105_spill] sm:$0xff]  ;;  %v8571_v47 = vld [vmem:[#allocation210_spill] sm:$0xff] }
 0x3ce   :  { %v7124_v23 = vpop.xlane.xlu0 %2252  ;;  %v2380_v4 = vadd.f32 %v8566_v53, %v8565_v10  ;;  %v2367_v56 = vadd.f32 %v8568_v16, %v8567_v39  ;;  %v2382_v57 = vadd.f32 %v8570_v1, %v8569_v30  ;;  %v3041_v11 = vrot.slane %v2366_v12, %v6305_v38  ;;  %v8573_v58 = vld [vmem:[#allocation26_spill] sm:$0xff]  ;;  %v8574_v60 = vld [vmem:[#allocation265_spill] sm:$0xff]  ;;  %v8577_v53 = vld [vmem:[#allocation211_spill] sm:$0xff] }
 0x3cf   :  { %v7133_v7 = vpop.xlane.xlu1 %2164  ;;  %v2353_v21 = vadd.f32 %v8572_v6, %v8571_v47  ;;  %v2368_v31 = vadd.f32 %v8574_v60, %v8573_v58  ;;  %v8575_v28 = vld [vmem:[#allocation41_spill] sm:$0xff]  ;;  %v8576_v36 = vld [vmem:[#allocation266_spill] sm:$0xff]  ;;  %v3037_v10 = vsel %vm2534_vm1, %v3036_v35, %v3032_v13  ;;  %v8578_v39 = vld [vmem:[#allocation136_spill] sm:$0xff]  ;;  %v2968_v6 = vsel %vm2548_vm5, %v2967_v18, %v2963_v14 }
 0x3d0   :  { %v2383_v0 = vadd.f32 %v8576_v36, %v8575_v28  ;;  %v2354_v16 = vadd.f32 %v8578_v39, %v8577_v53  ;;  %v8579_v50 = vld [vmem:[#allocation27_spill] sm:$0xff]  ;;  %v8581_v12 = vld [vmem:[#allocation42_spill] sm:$0xff]  ;;  %v3115_v58 = vrot.slane %v2381_v27, %v6297_v46  ;;  %v2972_v60 = vrot.slane %v2352_v2, %v6336_v24  ;;  %v8584_v53 = vld [vmem:[#allocation28_spill] sm:$0xff] }
 0x3d1   :  { %v8580_v30 = vld [vmem:[#allocation135_spill] sm:$0xff]  ;;  %v2384_v17 = vadd.f32 %v8582_v15, %v8581_v12  ;;  %v8583_v28 = vld [vmem:[#allocation214_spill] sm:$0xff]  ;;  %v3111_v13 = vrot.slane %v2380_v4, %v6293_v63  ;;  %v3046_v36 = vrot.slane %v2367_v56, %v6329_v40  ;;  %v2977_v18 = vrot.slane %v2353_v21, %v6351_v49 }
 0x3d2   :  { %v7145_v29 = vpop.xlane.xlu0 %2194  ;;  %v2369_v1 = vadd.f32 %v8580_v30, %v8579_v50  ;;  %v2355_v35 = vadd.f32 %v6966_v22, %v8583_v28  ;;  %v3120_v50 = vrot.slane %v2382_v57, %v6305_v38  ;;  %v8585_v39 = vld [vmem:[#allocation138_spill] sm:$0xff]  ;;  %v3042_v30 = vsel %vm2541_vm2, %v3041_v11, %v3037_v10  ;;  %v8586_v38 = vld [vmem:[#allocation43_spill] sm:$0xff] }
 0x3d3   :  { %v7152_v51 = vpop.xlane.xlu1 %2224  ;;  %v2370_v15 = vadd.f32 %v8585_v39, %v8584_v53  ;;  %v3051_v46 = vrot.slane %v2368_v31, %v6336_v24  ;;  %v3125_v27 = vrot.slane %v2383_v0, %v6329_v40  ;;  %v2982_v22 = vrot.slane %v2354_v16, %v6358_v62  ;;  %v8587_v40 = vld [vmem:[#allocation186_spill] sm:$0xff]  ;;  %v8590_v53 = vld [vmem:[#allocation44_spill] sm:$0xff] }
 0x3d4   :  { %v3056_v63 = vrot.slane %v2369_v1, %v6351_v49  ;;  %v3130_v14 = vrot.slane %v2384_v17, %v6336_v24  ;;  %v2385_v4 = vadd.f32 %v6985_v44, %v8586_v38  ;;  %v3116_v57 = vsel %vm2534_vm1, %v3115_v58, %v3111_v13  ;;  %v8588_v17 = vld [vmem:[#allocation215_spill] sm:$0xff] }
 0x3d5   :  { %v2973_v11 = vsel %vm2555_vm6, %v2972_v60, %v2968_v6  ;;  %v2987_v31 = vrot.slane %v2355_v35, %v6381_v5  ;;  %v2341_v21 = vadd.f32 %v6992_v48, %v8587_v40  ;;  %v3047_v0 = vsel %vm2548_vm5, %v3046_v36, %v3042_v30  ;;  %v8589_v6 = vld [vmem:[#allocation29_spill] sm:$0xff]  ;;  %v8597_v40 = vld [vmem:[#allocation31_spill] sm:$0xff] }
 0x3d6   :  { %v7167_v43 = vpop.xlane.xlu0 %2254  ;;  %v3121_v10 = vsel %vm2541_vm2, %v3120_v50, %v3116_v57  ;;  %v3061_v24 = vrot.slane %v2370_v15, %v6358_v62  ;;  %v2356_v44 = vadd.f32 %v7005_v34, %v8588_v17  ;;  %v2978_v16 = vsel %vm2562_vm9, %v2977_v18, %v2973_v11  ;;  %v8596_v57 = vld [vmem:[#allocation219_spill] sm:$0xff]  ;;  %v8600_v17 = vld [vmem:[#allocation222_spill] sm:$0xff]  ;;  %vm8606_vm2 = vmmov %vm8516_vm3 }
 0x3d7   :  { %v7177_v8 = vpop.xlane.xlu1 %2166  ;;  %v3052_v1 = vsel %vm2555_vm6, %v3051_v46, %v3047_v0  ;;  %v3126_v12 = vsel %vm2548_vm5, %v3125_v27, %v3121_v10  ;;  %v2371_v58 = vadd.f32 %v7011_v19, %v8589_v6  ;;  %v2983_v48 = vsel %vm2569_vm10, %v2982_v22, %v2978_v16  ;;  %v8591_v19 = vld [vmem:[#allocation187_spill] sm:$0xff]  ;;  %v8592_v46 = vld [vmem:[#allocation218_spill] sm:$0xff] }
 0x3d8   :  { %v3057_v28 = vsel %vm2562_vm9, %v3056_v63, %v3052_v1  ;;  %v3131_v35 = vsel %vm2555_vm6, %v3130_v14, %v3126_v12  ;;  %v3135_v13 = vrot.slane %v2385_v4, %v6351_v49  ;;  %v2988_v36 = vsel %vm2576_vm13, %v2987_v31, %v2983_v48  ;;  %v8593_v49 = vld [vmem:[#allocation30_spill] sm:$0xff]  ;;  %v8594_v14 = vld [vmem:[#allocation45_spill] sm:$0xff]  ;;  %v8599_v0 = vld [vmem:[#allocation191_spill] sm:$0xff] }
 0x3d9   :  { %v2918_v50 = vrot.slane %v2341_v21, %v6409_v26  ;;  %v2386_v39 = vadd.f32 %v7025_v9, %v8590_v53  ;;  %v2342_v15 = vadd.f32 %v7033_v59, %v8591_v19  ;;  %v3062_v30 = vsel %vm2569_vm10, %v3061_v24, %v3057_v28  ;;  %v8595_v4 = vld [vmem:[#allocation190_spill] sm:$0xff]  ;;  %v8601_v1 = vld [vmem:[#allocation32_spill] sm:$0xff]  ;;  %vm8609_vm6 = vmmov %vm8546_vm11 }
 0x3da   :  { %v7199_v61 = vpop.xlane.xlu0 %2196  ;;  %v2992_v18 = vrot.slane %v2356_v44, %v6388_v45  ;;  %v2357_v27 = vadd.f32 %v7051_v41, %v8592_v46  ;;  %v2372_v22 = vadd.f32 %v7058_v20, %v8593_v49  ;;  %v3066_v63 = vrot.slane %v2371_v58, %v6381_v5  ;;  %v8598_v21 = vld [vmem:[#allocation46_spill] sm:$0xff]  ;;  %v8608_v49 = vld [vmem:[#allocation33_spill] sm:$0xff]  ;;  %vm8622_vm11 = vmmov %vm8549_vm12 }
 0x3db   :  { %v7208_v47 = vpop.xlane.xlu1 %2226  ;;  %v2387_v38 = vadd.f32 %v7076_v52, %v8594_v14  ;;  %v2343_v9 = vadd.f32 %v7083_v33, %v8595_v4  ;;  %v2358_v59 = vadd.f32 %v7102_v54, %v8596_v57  ;;  %v3136_v31 = vsel %vm2562_vm9, %v3135_v13, %v3131_v35  ;;  %v8602_v35 = vld [vmem:[#allocation47_spill] sm:$0xff]  ;;  %v8604_v53 = vld [vmem:[#allocation194_spill] sm:$0xff]  ;;  %vm8610_vm9 = vmmov %vm8606_vm2 }
 0x3dc   :  { %v2373_v41 = vadd.f32 %v7107_v25, %v8597_v40  ;;  %v2388_v20 = vadd.f32 %v7124_v23, %v8598_v21  ;;  %v2344_v10 = vadd.f32 %v7133_v7, %v8599_v0  ;;  %v2919_v52 = vsel %vm2590_vm0, %v2918_v50, %v7173_v37  ;;  %v8612_v40 = vld [vmem:[#allocation195_spill] sm:$0xff]  ;;  %vm8625_vm12 = vmmov %vm8609_vm6 }
 0x3dd   :  { %v3140_v33 = vrot.slane %v2386_v39, %v6358_v62  ;;  %v2923_v54 = vrot.slane %v2342_v15, %v6420_v3  ;;  %v2359_v44 = vadd.f32 %v7145_v29, %v8600_v17  ;;  %v2993_v16 = vsel %vm2583_vm14, %v2992_v18, %v2988_v36  ;;  %v8617_v17 = vld [vmem:[#allocation227_spill] sm:$0xff] }
 0x3de   :  { %v7224_v2 = vpop.xlane.xlu0 %2256  ;;  %v2997_v25 = vrot.slane %v2357_v27, %v6409_v26  ;;  %v3071_v23 = vrot.slane %v2372_v22, %v6388_v45  ;;  %v2374_v7 = vadd.f32 %v7152_v51, %v8601_v1  ;;  %v3067_v12 = vsel %vm2576_vm13, %v3066_v63, %v3062_v30  ;;  %v8605_v30 = vld [vmem:[#allocation223_spill] sm:$0xff] }
 0x3df   :  { %v7231_v56 = vpop.xlane.xlu1 %2168  ;;  %v3145_v37 = vrot.slane %v2387_v38, %v6381_v5  ;;  %v2928_v62 = vrot.slane %v2343_v9, %v6439_v32  ;;  %v3002_v6 = vrot.slane %v2358_v59, %v6420_v3  ;;  %v3076_v29 = vrot.slane %v2373_v41, %v6409_v26  ;;  %v8611_v59 = vld [vmem:[#allocation48_spill] sm:$0xff] }
 0x3e0   :  { %v3150_v48 = vrot.slane %v2388_v20, %v6388_v45  ;;  %v2933_v28 = vrot.slane %v2344_v10, %v8513_v42  ;;  %v2389_v13 = vadd.f32 %v7167_v43, %v8602_v35  ;;  %v3141_v51 = vsel %vm2569_vm10, %v3140_v33, %v3136_v31  ;;  %v8614_v20 = vld [vmem:[#allocation226_spill] sm:$0xff] }
 0x3e1   :  { %vm8603_vm1 = vcmask 720512   ;;  %v3007_v5 = vrot.slane %v2359_v44, %v6439_v32  ;;  %v2345_v39 = vadd.f32 %v7177_v8, %v8604_v53  ;;  %v2998_v19 = vsel %vm2590_vm0, %v2997_v25, %v2993_v16  ;;  %v8616_v33 = vld [vmem:[#allocation198_spill] sm:$0xff]  ;;  %v8618_v44 = vld [vmem:[#allocation35_spill] sm:$0xff] }
 0x3e2   :  { %v7248_v60 = vpop.xlane.xlu0 %2198  ;;  %v2924_v50 = vsel %vm8603_vm1, %v2923_v54, %v2919_v52  ;;  %v3072_v15 = vsel %vm2583_vm14, %v3071_v23, %v3067_v12  ;;  %v3081_v45 = vrot.slane %v2374_v7, %v6420_v3  ;;  %v2360_v18 = vadd.f32 %v7199_v61, %v8605_v30  ;;  %vm8607_vm5 = vmmov %vm8603_vm1  ;;  %v8619_v23 = vld [vmem:[#allocation50_spill] sm:$0xff]  ;;  %v8620_v7 = vld [vmem:[#allocation21_spill] sm:$0xff] }
 0x3e3   :  { %v7254_v34 = vpop.xlane.xlu1 %2228  ;;  %v3146_v43 = vsel %vm2576_vm13, %v3145_v37, %v3141_v51  ;;  %v2929_v46 = vsel %vm8606_vm2, %v2928_v62, %v2924_v50  ;;  %v3003_v27 = vsel %vm8607_vm5, %v3002_v6, %v2998_v19  ;;  %v2375_v22 = vadd.f32 %v7208_v47, %v8608_v49  ;;  %vm8613_vm13 = vmmov %vm8603_vm1  ;;  %v8623_v6 = vld [vmem:[#allocation111_spill] sm:$0xff]  ;;  %v8628_v50 = vld [vmem:[#allocation112_spill] sm:$0xff] }
 0x3e4   :  { %v3077_v8 = vsel %vm2590_vm0, %v3076_v29, %v3072_v15  ;;  %v3151_v14 = vsel %vm2583_vm14, %v3150_v48, %v3146_v43  ;;  %v2934_v38 = vsel %vm8609_vm6, %v2933_v28, %v2929_v46  ;;  %v3155_v4 = vrot.slane %v2389_v13, %v6409_v26  ;;  %v8615_v26 = vld [vmem:[#allocation34_spill] sm:$0xff]  ;;  %v8626_v13 = vld [vmem:[#allocation51_spill] sm:$0xff]  ;;  %v8629_v30 = vld [vmem:[#allocation37_spill] sm:$0xff] }
 0x3e5   :  { %v3008_v61 = vsel %vm8610_vm9, %v3007_v5, %v3003_v27  ;;  %v2938_v57 = vrot.slane %v2345_v39, %v8519_v55  ;;  %v2390_v31 = vadd.f32 %v7224_v2, %v8611_v59  ;;  %v2346_v47 = vadd.f32 %v7231_v56, %v8612_v40  ;;  %v8624_v29 = vld [vmem:[#allocation258_spill] sm:$0xff]  ;;  %vm8632_vm5 = vmmov %vm8609_vm6 }
 0x3e6   :  { %v2259_v11 = vpop.xlane.xlu0 %2258  ;;  %vm3191_vm10 = vcmask 1043459   ;;  %v3082_v41 = vsel %vm8613_vm13, %v3081_v45, %v3077_v8  ;;  %v3012_v21 = vrot.slane %v2360_v18, %v8513_v42  ;;  %v2361_v0 = vadd.f32 %v7248_v60, %v8614_v20  ;;  %v8621_v60 = vld [vmem:[#allocation36_spill] sm:$0xff]  ;;  %v8637_v20 = vld [vmem:[#allocation139_spill] sm:$0xff]  ;;  %vm8638_vm13 = vmmov %vm8632_vm5 }
 0x3e7   :  { %v2171_v24 = vpop.xlane.xlu1 %2170  ;;  %v2376_v10 = vadd.f32 %v7254_v34, %v8615_v26  ;;  %v3086_v52 = vrot.slane %v2375_v22, %v6439_v32  ;;  %vm3193_vm14 = vcmask 1044484   ;;  %v3156_v25 = vsel %vm2590_vm0, %v3155_v4, %v3151_v14  ;;  %vm8627_vm0 = vmmov %vm8606_vm2  ;;  %v8630_v22 = vld [vmem:[#allocation61_spill] sm:$0xff] }
 0x3e8   :  { %v2347_v54 = vadd.f32 %v2171_v24, %v8616_v33  ;;  %v2391_v1 = vadd.f32 %v2259_v11, %v8619_v23  ;;  %vm3195_vm3 = vcmask 1045509   ;;  %v2939_v34 = vsel %vm8622_vm11, %v2938_v57, %v2934_v38  ;;  %vm8631_vm2 = vmmov %vm8622_vm11 }
 0x3e9   :  { %v3160_v24 = vrot.slane %v2390_v31, %v6420_v3  ;;  %v3013_v28 = vsel %vm8625_vm12, %v3012_v21, %v3008_v61  ;;  %v3017_v35 = vrot.slane %v2361_v0, %v8519_v55  ;;  %v3091_v11 = vrot.slane %v2376_v10, %v8513_v42  ;;  %vm8633_vm6 = vmmov %vm8631_vm2  ;;  %v8636_v21 = vld [vmem:[#allocation152_spill] sm:$0xff] }
 0x3ea   :  { %v2201_v58 = vpop.xlane.xlu0 %2200  ;;  %v3087_v51 = vsel %vm8627_vm0, %v3086_v52, %v3082_v41  ;;  %v2948_v5 = vrot.slane %v2347_v54, %v8628_v50  ;;  %v3165_v19 = vrot.slane %v2391_v1, %v6439_v32  ;;  %vm8634_vm9 = vmmov %vm8627_vm0  ;;  %v3192_v0 = vsel %vm3191_vm10, %v8637_v20, %v8636_v21 }
 0x3eb   :  { %v2231_v36 = vpop.xlane.xlu1 %2230  ;;  %v2362_v2 = vadd.f32 %v2201_v58, %v8617_v17  ;;  %v2943_v58 = vrot.slane %v2346_v47, %v8623_v6  ;;  %v3161_v46 = vsel %vm8603_vm1, %v3160_v24, %v3156_v25  ;;  %v3018_v8 = vsel %vm8631_vm2, %v3017_v35, %v3013_v28  ;;  %v8635_v47 = vld [vmem:[#allocation62_spill] sm:$0xff]  ;;  %vm8639_vm12 = vmmov %vm8631_vm2 }
 0x3ec   :  { %v2377_v16 = vadd.f32 %v2231_v36, %v8618_v44  ;;  %v3092_v14 = vsel %vm8632_vm5, %v3091_v11, %v3087_v51  ;;  %vm3197_vm11 = vcmask 1046534   ;;  %vm3199_vm0 = vcmask 1047559  }
 0x3ed   :  { %v3022_v53 = vrot.slane %v2362_v2, %v8623_v6  ;;  %v2944_v27 = vsel %vm2625_vm15, %v2943_v58, %v2939_v34  ;;  %v8640_v34 = vld [vmem:[#allocation20_spill] sm:$0xff] }
 0x3ee   :  { %v2261_v63 = vpop.xlane.xlu0 %2260  ;;  %v3096_v3 = vrot.slane %v2377_v16, %v8519_v55  ;;  %v2949_v4 = vsel %vm2632_vm4, %v2948_v5, %v2944_v27 }
 0x3ef   :  { %v2203_v9 = vpop.xlane.xlu1 %2202  ;;  %v2392_v48 = vadd.f32 %v2261_v63, %v8624_v29  ;;  %v3194_v54 = vsel %vm3193_vm14, %v2949_v4, %v3192_v0 }
 0x3f0   :  { %v2363_v12 = vadd.f32 %v2203_v9, %v8620_v7  ;;  %v3023_v9 = vsel %vm2625_vm15, %v3022_v53, %v3018_v8  ;;  %v3097_v61 = vsel %vm8633_vm6, %v3096_v3, %v3092_v14  ;;  %v8646_v14 = vld [vmem:[#allocation159_spill] sm:$0xff] }
 0x3f1   :  { %v3170_v49 = vrot.slane %v2392_v48, %v8513_v42  ;;  %v3166_v42 = vsel %vm8634_vm9, %v3165_v19, %v3161_v46 }
 0x3f2   :  { %v2233_v56 = vpop.xlane.xlu0 %2232  ;;  %v3027_v15 = vrot.slane %v2363_v12, %v8628_v50 }
 0x3f3   :  { %v2378_v37 = vadd.f32 %v2233_v56, %v8621_v60  ;;  %v2263_v62 = vpop.xlane.xlu1 %2262  ;;  %v3171_v26 = vsel %vm8638_vm13, %v3170_v49, %v3166_v42  ;;  %v4564_v49 = vld [vmem:[#allocation2 + $0x8] sm:$0xff] }
 0x3f4   :  { %v2393_v36 = vadd.f32 %v2263_v62, %v8626_v13  ;;  %v3028_v31 = vsel %vm2632_vm4, %v3027_v15, %v3023_v9  ;;  %v4566_v9 = vld [vmem:[#allocation2 + $0x10] sm:$0xff] }
 0x3f5   :  { %v3101_v45 = vrot.slane %v2378_v37, %v8623_v6  ;;  %v3196_v2 = vsel %vm3195_vm3, %v3028_v31, %v3194_v54  ;;  %v8648_v31 = vld [vmem:[#allocation160_spill] sm:$0xff] }
 0x3f6   :  { %v2235_v39 = vpop.xlane.xlu0 %2234  ;;  %v3175_v32 = vrot.slane %v2393_v36, %v8519_v55  ;;  %v204_v55 = vld [vmem:[%s7836_s3] sm:$0xff]  ;;  %s4864_s3 = smov [#allocation11]  }
 0x3f7   :  { %v2379_v18 = vadd.f32 %v2235_v39, %v8629_v30  ;;  %v2265_v43 = vpop.xlane.xlu1 %2264  ;;  %v3102_v40 = vsel %vm2625_vm15, %v3101_v45, %v3097_v61  ;;  %vm2396_vm1 = vcmp.ne.f32.partialorder %v204_v55, 0.0  ;;  %s4391_s25 = sshll.u32 %s4864_s3, 4  ;;  %s4392_s25 = int_to_ptr.vmem [resolvable:$true] %s4391_s25 }
 0x3f8   :  { %v2394_v63 = vadd.f32 %v2265_v43, %v8630_v22  ;;  %v3176_v52 = vsel %vm8639_vm12, %v3175_v32, %v3171_v26  ;;  %v8650_v26 = vld [vmem:[#allocation161_spill] sm:$0xff]  ;;  %s4780_s8 = scalar_lea.vmem %s4392_s25, 128  ;;  %p4785_p5 = scmp.lt.s32.totalorder %s4392_s25, %s4392_s25 }
 0x3f9   :  { %v3106_v38 = vrot.slane %v2379_v18, %v8628_v50  ;;  %p4781_p4 = scmp.ne.s32.totalorder %s4392_s25, %s4780_s8  ;;  %p4786_p6 = scmp.lt.s32.totalorder %s4780_s8, %s4780_s8 }
 0x3fa   :  { %v3180_v57 = vrot.slane %v2394_v63, %v8623_v6  ;;  %v2267_v59 = vpop.xlane.xlu0 %2266  ;;  %v8641_v6 = vld [vmem:[#allocation19_spill] sm:$0xff]  ;;  %v4565_v63 = vld [vmem:[#allocation2] sm:$0xff] }
 0x3fb   :  { %v2395_v41 = vadd.f32 %v2267_v59, %v8635_v47  ;;  %v3107_v10 = vsel %vm2632_vm4, %v3106_v38, %v3102_v40  ;;  %v8642_v58 = vsub.s32 1, %v8641_v6  ;;  %v8643_v48 = vsub.s32 2, %v8641_v6  ;;  %v8647_v38 = vld [vmem:[#allocation158_spill] sm:$0xff]  ;;  %v4567_v47 = vld [vmem:[#allocation2 + $0x18] sm:$0xff]  ;;  %p4787_p7 = por %p4786_p6, %p4785_p5 }
 0x3fc   :  { %v3181_v17 = vsel %vm2625_vm15, %v3180_v57, %v3176_v52  ;;  %v3198_v16 = vsel %vm3197_vm11, %v3107_v10, %v3196_v2  ;;  %v8644_v35 = vsub.s32 3, %v8641_v6  ;;  %v8645_v5 = vsub.s32 4, %v8641_v6 }
 0x3fd   :  { %v3185_v33 = vrot.slane %v2395_v41, %v8628_v50  ;;  %v8649_v55 = vsub.s32 5, %v8641_v6  ;;  %v8651_v2 = vsub.s32 6, %v8641_v6  ;;  %p4788_p8 = pnand %p4787_p7, %p4781_p4 }
 0x3ff   :  { %v3186_v44 = vsel %vm2632_vm4, %v3185_v33, %v3181_v17 }
 0x400   :  { %v3200_v56 = vsel %vm3199_vm0, %v3186_v44, %v3198_v16  ;;  %v4568_v16 = vld [vmem:[#allocation2 + $0x20] sm:$0xff] }
 0x401   :  { %v3202_v25 = vsel %vm2396_vm1, %v3200_v56, -1e+30 }
 0x402   :  { %3203 = vmax.xlane.f32.xlu1 %v3202_v25 }
 0x48f   :  { %v3204_v23 = vpop.xlane.xlu1 %3203 }
 0x490   :  { %v3205_v1 = vsub.f32 %v3202_v25, %v3204_v23 }
 0x492   :  { %v3206_v7 = vmul.f32 1.442695, %v3205_v1 }
 0x494   :  { %4560 = vpow2.f32 %v3206_v7  ;;  %v4569_v7 = vld [vmem:[#allocation2 + $0x80] sm:$0xff] }
 0x49e   :  { %v4561_v12 = vpop.eup %4560 }
 0x49f   :  { %3208 = vadd.xlane.f32.xlu0 %v4561_v12 }
 0x52c   :  { %v3209_v60 = vpop.xlane.xlu0 %3208 }
 0x52d   :  { %4562 = vrcp.f32 %v3209_v60  ;;  %v8652_v60 = vld [vmem:[#allocation181_spill] sm:$0xff] }
 0x537   :  { %v4563_v37 = vpop.eup %4562 }
 0x538   :  { %v7389_v62 = vmul.f32 %v4563_v37, %v4561_v12 }
 0x53a   :  { %v3215_v24 = vrot.slane %v7389_v62, %v8640_v34  ;;  %4374 = vst [vmem:[#allocation13] sm:$0xff] %v7389_v62  ;;  %v3282_v29 = vrot.slane %v7389_v62, %v8642_v58  ;;  %v3349_v28 = vrot.slane %v7389_v62, %v8643_v48  ;;  %v3416_v11 = vrot.slane %v7389_v62, %v8644_v35  ;;  %v4570_v34 = vld [vmem:[#allocation2 + $0x88] sm:$0xff]  ;;  %v8653_v58 = vld [vmem:[#allocation184_spill] sm:$0xff] }
 0x53b   :  { %v7408_v53 = vrot.slane %v7389_v62, %v8645_v5  ;;  %v7446_v21 = vrot.slane %v7389_v62, %v8649_v55  ;;  %v7456_v44 = vrot.slane %v7389_v62, %v8651_v2  ;;  %v8654_v48 = vld [vmem:[#allocation162_spill] sm:$0xff]  ;;  %v8655_v5 = vld [vmem:[#allocation185_spill] sm:$0xff]  ;;  %v8660_v2 = vld [vmem:[#allocation192_spill] sm:$0xff] }
 0x53c   :  { %3221 = vbcast.lane.b32.xlu0 %v3215_v24, 264  ;;  %3217 = vbcast.lane.b32.xlu1 %v3215_v24, 256 }
 0x540   :  { %3233 = vbcast.lane.b32.xlu0 %v3215_v24, 288  ;;  %3225 = vbcast.lane.b32.xlu1 %v3215_v24, 272 }
 0x544   :  { %3241 = vbcast.lane.b32.xlu0 %v3215_v24, 304  ;;  %3229 = vbcast.lane.b32.xlu1 %v3215_v24, 280 }
 0x548   :  { %3249 = vbcast.lane.b32.xlu0 %v3215_v24, 320  ;;  %3237 = vbcast.lane.b32.xlu1 %v3215_v24, 296 }
 0x54c   :  { %3257 = vbcast.lane.b32.xlu0 %v3215_v24, 336  ;;  %3245 = vbcast.lane.b32.xlu1 %v3215_v24, 312 }
 0x550   :  { %3265 = vbcast.lane.b32.xlu0 %v3215_v24, 352  ;;  %3253 = vbcast.lane.b32.xlu1 %v3215_v24, 328 }
 0x554   :  { %3273 = vbcast.lane.b32.xlu0 %v3215_v24, 368  ;;  %3261 = vbcast.lane.b32.xlu1 %v3215_v24, 344 }
 0x558   :  { %3284 = vbcast.lane.b32.xlu0 %v3282_v29, 256  ;;  %3269 = vbcast.lane.b32.xlu1 %v3215_v24, 360 }
 0x55c   :  { %3292 = vbcast.lane.b32.xlu0 %v3282_v29, 272  ;;  %3277 = vbcast.lane.b32.xlu1 %v3215_v24, 376 }
 0x560   :  { %3300 = vbcast.lane.b32.xlu0 %v3282_v29, 288  ;;  %3288 = vbcast.lane.b32.xlu1 %v3282_v29, 264 }
 0x564   :  { %3308 = vbcast.lane.b32.xlu0 %v3282_v29, 304  ;;  %3296 = vbcast.lane.b32.xlu1 %v3282_v29, 280 }
 0x568   :  { %3316 = vbcast.lane.b32.xlu0 %v3282_v29, 320  ;;  %3304 = vbcast.lane.b32.xlu1 %v3282_v29, 296 }
 0x56c   :  { %3324 = vbcast.lane.b32.xlu0 %v3282_v29, 336  ;;  %3312 = vbcast.lane.b32.xlu1 %v3282_v29, 312 }
 0x570   :  { %3332 = vbcast.lane.b32.xlu0 %v3282_v29, 352  ;;  %3320 = vbcast.lane.b32.xlu1 %v3282_v29, 328 }
 0x574   :  { %3340 = vbcast.lane.b32.xlu0 %v3282_v29, 368  ;;  %3328 = vbcast.lane.b32.xlu1 %v3282_v29, 344 }
 0x578   :  { %3351 = vbcast.lane.b32.xlu0 %v3349_v28, 256  ;;  %3336 = vbcast.lane.b32.xlu1 %v3282_v29, 360 }
 0x57c   :  { %3359 = vbcast.lane.b32.xlu0 %v3349_v28, 272  ;;  %3344 = vbcast.lane.b32.xlu1 %v3282_v29, 376 }
 0x580   :  { %3367 = vbcast.lane.b32.xlu0 %v3349_v28, 288  ;;  %3355 = vbcast.lane.b32.xlu1 %v3349_v28, 264 }
 0x584   :  { %3375 = vbcast.lane.b32.xlu0 %v3349_v28, 304  ;;  %3363 = vbcast.lane.b32.xlu1 %v3349_v28, 280 }
 0x588   :  { %3383 = vbcast.lane.b32.xlu0 %v3349_v28, 320  ;;  %3371 = vbcast.lane.b32.xlu1 %v3349_v28, 296 }
 0x58c   :  { %3391 = vbcast.lane.b32.xlu0 %v3349_v28, 336  ;;  %3379 = vbcast.lane.b32.xlu1 %v3349_v28, 312 }
 0x590   :  { %3399 = vbcast.lane.b32.xlu0 %v3349_v28, 352  ;;  %3387 = vbcast.lane.b32.xlu1 %v3349_v28, 328 }
 0x594   :  { %3407 = vbcast.lane.b32.xlu0 %v3349_v28, 368  ;;  %3395 = vbcast.lane.b32.xlu1 %v3349_v28, 344 }
 0x598   :  { %3418 = vbcast.lane.b32.xlu0 %v3416_v11, 256  ;;  %3403 = vbcast.lane.b32.xlu1 %v3349_v28, 360 }
 0x59c   :  { %3426 = vbcast.lane.b32.xlu0 %v3416_v11, 272  ;;  %3411 = vbcast.lane.b32.xlu1 %v3349_v28, 376 }
 0x5a0   :  { %3434 = vbcast.lane.b32.xlu0 %v3416_v11, 288  ;;  %3422 = vbcast.lane.b32.xlu1 %v3416_v11, 264 }
 0x5a4   :  { %3442 = vbcast.lane.b32.xlu0 %v3416_v11, 304  ;;  %3430 = vbcast.lane.b32.xlu1 %v3416_v11, 280 }
 0x5a8   :  { %3450 = vbcast.lane.b32.xlu0 %v3416_v11, 320  ;;  %3438 = vbcast.lane.b32.xlu1 %v3416_v11, 296 }
 0x5ac   :  { %3458 = vbcast.lane.b32.xlu0 %v3416_v11, 336  ;;  %3446 = vbcast.lane.b32.xlu1 %v3416_v11, 312 }
 0x5ae   :  { %v3222_v13 = vpop.permute.xlu0 %3221  ;;  %v3218_v36 = vpop.permute.xlu1 %3217 }
 0x5af   :  { %v3749_v22 = vmul.f32 %v4564_v49, %v3222_v13  ;;  %v3748_v8 = vmul.f32 %v4565_v63, %v3218_v36  ;;  %v4062_v32 = vmul.f32 %v8646_v14, %v3222_v13  ;;  %v4061_v4 = vmul.f32 %v8647_v38, %v3218_v36  ;;  %v4572_v36 = vld [vmem:[#allocation2 + $0x90] sm:$0xff] }
 0x5b0   :  { %3466 = vbcast.lane.b32.xlu0 %v3416_v11, 352  ;;  %3454 = vbcast.lane.b32.xlu1 %v3416_v11, 328  ;;  %v8656_v63 = vsub.s32 7, %v8641_v6 }
 0x5b1   :  { %v3876_v42 = vadd.f32 %v3749_v22, %v3748_v8  ;;  %v4189_v20 = vadd.f32 %v4062_v32, %v4061_v4 }
 0x5b2   :  { %v7403_v51 = vpop.permute.xlu0 %3233  ;;  %v3226_v50 = vpop.permute.xlu1 %3225  ;;  %v7470_v8 = vrot.slane %v7389_v62, %v8656_v63 }
 0x5b3   :  { %v3750_v61 = vmul.f32 %v4566_v9, %v3226_v50  ;;  %v4063_v40 = vmul.f32 %v8648_v31, %v3226_v50  ;;  %v3752_v56 = vmul.f32 %v4568_v16, %v7403_v51  ;;  %v4065_v28 = vmul.f32 %v8654_v48, %v7403_v51  ;;  %v8657_v9 = vld [vmem:[#allocation164_spill] sm:$0xff] }
 0x5b4   :  { %3474 = vbcast.lane.b32.xlu0 %v3416_v11, 368  ;;  %3462 = vbcast.lane.b32.xlu1 %v3416_v11, 344  ;;  %v8658_v31 = vld [vmem:[#allocation188_spill] sm:$0xff] }
 0x5b5   :  { %v3877_v0 = vadd.f32 %v3876_v42, %v3750_v61  ;;  %v4190_v54 = vadd.f32 %v4189_v20, %v4063_v40 }
 0x5b6   :  { %v7410_v3 = vpop.permute.xlu0 %3241  ;;  %v3230_v39 = vpop.permute.xlu1 %3229 }
 0x5b7   :  { %v3751_v41 = vmul.f32 %v4567_v47, %v3230_v39  ;;  %v4064_v10 = vmul.f32 %v8650_v26, %v3230_v39  ;;  %v4574_v47 = vld [vmem:[#allocation2 + $0xa0] sm:$0xff] }
 0x5b8   :  { %3485 = vbcast.lane.b32.xlu0 %v7408_v53, 256  ;;  %3470 = vbcast.lane.b32.xlu1 %v3416_v11, 360 }
 0x5b9   :  { %v3878_v17 = vadd.f32 %v3877_v0, %v3751_v41  ;;  %v4191_v25 = vadd.f32 %v4190_v54, %v4064_v10  ;;  %v8659_v41 = vld [vmem:[#allocation189_spill] sm:$0xff]  ;;  %v4576_v54 = vld [vmem:[#allocation2 + $0xa8] sm:$0xff] }
 0x5ba   :  { %v7413_v19 = vpop.permute.xlu0 %3249  ;;  %v7415_v15 = vpop.permute.xlu1 %3237 }
 0x5bb   :  { %v3879_v35 = vadd.f32 %v3878_v17, %v3752_v56  ;;  %v4192_v32 = vadd.f32 %v4191_v25, %v4065_v28  ;;  %v4066_v61 = vmul.f32 %v8657_v9, %v7415_v15 }
 0x5bc   :  { %3493 = vbcast.lane.b32.xlu0 %v7408_v53, 272  ;;  %3478 = vbcast.lane.b32.xlu1 %v3416_v11, 376  ;;  %v4571_v11 = vld [vmem:[#allocation2 + $0x28] sm:$0xff] }
 0x5bd   :  { %v3753_v13 = vmul.f32 %v4571_v11, %v7415_v15  ;;  %v4193_v56 = vadd.f32 %v4192_v32, %v4066_v61 }
 0x5be   :  { %v7418_v45 = vpop.permute.xlu0 %3257  ;;  %v7420_v30 = vpop.permute.xlu1 %3245 }
 0x5bf   :  { %v3880_v6 = vadd.f32 %v3879_v35, %v3753_v13  ;;  %v8663_v13 = vld [vmem:[#allocation168_spill] sm:$0xff] }
 0x5c0   :  { %3501 = vbcast.lane.b32.xlu0 %v7408_v53, 288  ;;  %3489 = vbcast.lane.b32.xlu1 %v7408_v53, 264 }
 0x5c2   :  { %v7424_v18 = vpop.permute.xlu0 %3265  ;;  %v7426_v43 = vpop.permute.xlu1 %3253 }
 0x5c4   :  { %3509 = vbcast.lane.b32.xlu0 %v7408_v53, 304  ;;  %3497 = vbcast.lane.b32.xlu1 %v7408_v53, 280 }
 0x5c6   :  { %v7430_v46 = vpop.permute.xlu0 %3273  ;;  %v7432_v27 = vpop.permute.xlu1 %3261 }
 0x5c8   :  { %3517 = vbcast.lane.b32.xlu0 %v7408_v53, 320  ;;  %3505 = vbcast.lane.b32.xlu1 %v7408_v53, 296 }
 0x5ca   :  { %v3285_v57 = vpop.permute.xlu0 %3284  ;;  %v7438_v59 = vpop.permute.xlu1 %3269 }
 0x5cb   :  { %v3764_v12 = vmul.f32 %v4569_v7, %v3285_v57  ;;  %v4077_v37 = vmul.f32 %v8652_v60, %v3285_v57  ;;  %v4573_v57 = vld [vmem:[#allocation2 + $0x98] sm:$0xff] }
 0x5cc   :  { %3525 = vbcast.lane.b32.xlu0 %v7408_v53, 336  ;;  %3513 = vbcast.lane.b32.xlu1 %v7408_v53, 312  ;;  %v4577_v60 = vld [vmem:[#allocation2 + $0x38] sm:$0xff] }
 0x5ce   :  { %v3293_v52 = vpop.permute.xlu0 %3292  ;;  %v7449_v33 = vpop.permute.xlu1 %3277 }
 0x5cf   :  { %v3766_v50 = vmul.f32 %v4572_v36, %v3293_v52  ;;  %v4079_v39 = vmul.f32 %v8655_v5, %v3293_v52  ;;  %v4575_v52 = vld [vmem:[#allocation2 + $0x30] sm:$0xff]  ;;  %v4068_v36 = vmul.f32 %v8663_v13, %v7420_v30 }
 0x5d0   :  { %3556 = vbcast.lane.b32.xlu0 %v7446_v21, 264  ;;  %3521 = vbcast.lane.b32.xlu1 %v7408_v53, 328  ;;  %v3754_v15 = vmul.f32 %v4575_v52, %v7410_v3  ;;  %v4583_v52 = vld [vmem:[#allocation2 + $0x48] sm:$0xff] }
 0x5d2   :  { %v3301_v23 = vpop.permute.xlu0 %3300  ;;  %v3289_v1 = vpop.permute.xlu1 %3288 }
 0x5d3   :  { %v3765_v24 = vmul.f32 %v4570_v34, %v3289_v1  ;;  %v4078_v29 = vmul.f32 %v8653_v58, %v3289_v1  ;;  %v3768_v62 = vmul.f32 %v4574_v47, %v3301_v23  ;;  %v4081_v55 = vmul.f32 %v8659_v41, %v3301_v23  ;;  %v8661_v23 = vld [vmem:[#allocation165_spill] sm:$0xff]  ;;  %v4578_v34 = vld [vmem:[#allocation2 + $0xb0] sm:$0xff]  ;;  %v8666_v47 = vld [vmem:[#allocation200_spill] sm:$0xff] }
 0x5d4   :  { %3623 = vbcast.lane.b32.xlu0 %v7456_v44, 264  ;;  %3552 = vbcast.lane.b32.xlu1 %v7446_v21, 256  ;;  %v4067_v7 = vmul.f32 %v8661_v23, %v7410_v3  ;;  %v8662_v58 = vld [vmem:[#allocation193_spill] sm:$0xff] }
 0x5d5   :  { %v3897_v49 = vadd.f32 %v3765_v24, %v3764_v12  ;;  %v4210_v22 = vadd.f32 %v4078_v29, %v4077_v37  ;;  %v3881_v12 = vadd.f32 %v3880_v6, %v3754_v15  ;;  %v3755_v37 = vmul.f32 %v4577_v60, %v7420_v30  ;;  %v4585_v60 = vld [vmem:[#allocation2 + $0xd8] sm:$0xff] }
 0x5d6   :  { %v3309_v51 = vpop.permute.xlu0 %3308  ;;  %v3297_v14 = vpop.permute.xlu1 %3296  ;;  %v4194_v3 = vadd.f32 %v4193_v56, %v4067_v7  ;;  %v3757_v15 = vmul.f32 %v4583_v52, %v7426_v43  ;;  %v8669_v7 = vld [vmem:[#allocation171_spill] sm:$0xff]  ;;  %v8676_v52 = vld [vmem:[#allocation212_spill] sm:$0xff] }
 0x5d7   :  { %v3898_v38 = vadd.f32 %v3897_v49, %v3766_v50  ;;  %v4211_v4 = vadd.f32 %v4210_v22, %v4079_v39  ;;  %v3767_v42 = vmul.f32 %v4573_v57, %v3297_v14  ;;  %v4080_v40 = vmul.f32 %v8658_v31, %v3297_v14  ;;  %v4579_v50 = vld [vmem:[#allocation2 + $0xb8] sm:$0xff] }
 0x5d8   :  { %3686 = vbcast.lane.b32.xlu0 %v7470_v8, 256  ;;  %3619 = vbcast.lane.b32.xlu1 %v7456_v44, 256  ;;  %v3770_v24 = vmul.f32 %v4578_v34, %v3309_v51  ;;  %v4083_v29 = vmul.f32 %v8662_v58, %v3309_v51  ;;  %v8664_v39 = vld [vmem:[#allocation196_spill] sm:$0xff]  ;;  %v3882_v14 = vadd.f32 %v3881_v12, %v3755_v37  ;;  %v4580_v51 = vld [vmem:[#allocation2 + $0xc0] sm:$0xff] }
 0x5d9   :  { %v3899_v20 = vadd.f32 %v3898_v38, %v3767_v42  ;;  %v4212_v0 = vadd.f32 %v4211_v4, %v4080_v40  ;;  %v8665_v38 = vld [vmem:[#allocation197_spill] sm:$0xff]  ;;  %v4582_v40 = vld [vmem:[#allocation2 + $0xc8] sm:$0xff]  ;;  %v4195_v41 = vadd.f32 %v4194_v3, %v4068_v36  ;;  %v4070_v12 = vmul.f32 %v8669_v7, %v7426_v43  ;;  %v8670_v34 = vld [vmem:[#allocation204_spill] sm:$0xff] }
 0x5da   :  { %v3317_v26 = vpop.permute.xlu0 %3316  ;;  %v3305_v10 = vpop.permute.xlu1 %3304  ;;  %v4581_v42 = vld [vmem:[#allocation2 + $0x40] sm:$0xff]  ;;  %v4588_v3 = vld [vmem:[#allocation2 + $0xe8] sm:$0xff] }
 0x5db   :  { %v3769_v17 = vmul.f32 %v4576_v54, %v3305_v10  ;;  %v4082_v16 = vmul.f32 %v8660_v2, %v3305_v10  ;;  %v3900_v25 = vadd.f32 %v3899_v20, %v3768_v62  ;;  %v4213_v1 = vadd.f32 %v4212_v0, %v4081_v55  ;;  %v8667_v0 = vld [vmem:[#allocation169_spill] sm:$0xff]  ;;  %v4584_v54 = vld [vmem:[#allocation2 + $0xd0] sm:$0xff] }
 0x5dc   :  { %3627 = vbcast.lane.b32.xlu0 %v7456_v44, 272  ;;  %3560 = vbcast.lane.b32.xlu1 %v7446_v21, 272  ;;  %v3772_v32 = vmul.f32 %v4580_v51, %v3317_v26  ;;  %v4085_v4 = vmul.f32 %v8665_v38, %v3317_v26  ;;  %v3756_v31 = vmul.f32 %v4581_v42, %v7413_v19  ;;  %v8668_v2 = vld [vmem:[#allocation201_spill] sm:$0xff]  ;;  %v4590_v42 = vld [vmem:[#allocation2 + $0xf0] sm:$0xff] }
 0x5dd   :  { %v3901_v48 = vadd.f32 %v3900_v25, %v3769_v17  ;;  %v4214_v28 = vadd.f32 %v4213_v1, %v4082_v16  ;;  %v4069_v26 = vmul.f32 %v8667_v0, %v7413_v19  ;;  %v8677_v7 = vld [vmem:[#allocation213_spill] sm:$0xff] }
 0x5de   :  { %v3325_v35 = vpop.permute.xlu0 %3324  ;;  %v3313_v11 = vpop.permute.xlu1 %3312  ;;  %v3883_v10 = vadd.f32 %v3882_v14, %v3756_v31 }
 0x5df   :  { %v3771_v5 = vmul.f32 %v4579_v50, %v3313_v11  ;;  %v4084_v49 = vmul.f32 %v8664_v39, %v3313_v11  ;;  %v3902_v22 = vadd.f32 %v3901_v48, %v3770_v24  ;;  %v4215_v63 = vadd.f32 %v4214_v28, %v4083_v29  ;;  %v4586_v28 = vld [vmem:[#allocation2 + $0xe0] sm:$0xff]  ;;  %v4587_v39 = vld [vmem:[#allocation2 + $0x50] sm:$0xff] }
 0x5e0   :  { %3694 = vbcast.lane.b32.xlu0 %v7470_v8, 272  ;;  %3690 = vbcast.lane.b32.xlu1 %v7470_v8, 264  ;;  %v3774_v17 = vmul.f32 %v4584_v54, %v3325_v35  ;;  %v4087_v16 = vmul.f32 %v8668_v2, %v3325_v35  ;;  %v4196_v19 = vadd.f32 %v4195_v41, %v4069_v26  ;;  %v8671_v11 = vld [vmem:[#allocation205_spill] sm:$0xff]  ;;  %v4591_v26 = vld [vmem:[#allocation2 + $0xf8] sm:$0xff] }
 0x5e1   :  { %v3903_v9 = vadd.f32 %v3902_v22, %v3771_v5  ;;  %v4216_v61 = vadd.f32 %v4215_v63, %v4084_v49  ;;  %v3884_v48 = vadd.f32 %v3883_v10, %v3757_v15  ;;  %v3758_v49 = vmul.f32 %v4587_v39, %v7418_v45  ;;  %v8672_v63 = vld [vmem:[#allocation208_spill] sm:$0xff] }
 0x5e2   :  { %v3333_v57 = vpop.permute.xlu0 %3332  ;;  %v3321_v30 = vpop.permute.xlu1 %3320  ;;  %v4197_v51 = vadd.f32 %v4196_v19, %v4070_v12  ;;  %v4594_v19 = vld [vmem:[#allocation2 + $0x60] sm:$0xff] }
 0x5e3   :  { %v3773_v6 = vmul.f32 %v4582_v40, %v3321_v30  ;;  %v4086_v62 = vmul.f32 %v8666_v47, %v3321_v30  ;;  %v3904_v55 = vadd.f32 %v3903_v9, %v3772_v32  ;;  %v4217_v20 = vadd.f32 %v4216_v61, %v4085_v4  ;;  %v8673_v4 = vld [vmem:[#allocation172_spill] sm:$0xff]  ;;  %v8674_v40 = vld [vmem:[#allocation209_spill] sm:$0xff] }
 0x5e4   :  { %3568 = vbcast.lane.b32.xlu0 %v7446_v21, 288  ;;  %3564 = vbcast.lane.b32.xlu1 %v7446_v21, 280  ;;  %v3776_v35 = vmul.f32 %v4586_v28, %v3333_v57  ;;  %v4089_v13 = vmul.f32 %v8671_v11, %v3333_v57  ;;  %v4071_v9 = vmul.f32 %v8673_v4, %v7418_v45  ;;  %v4589_v57 = vld [vmem:[#allocation2 + $0x58] sm:$0xff] }
 0x5e5   :  { %v3905_v56 = vadd.f32 %v3904_v55, %v3773_v6  ;;  %v4218_v25 = vadd.f32 %v4217_v20, %v4086_v62  ;;  %v3885_v61 = vadd.f32 %v3884_v48, %v3758_v49  ;;  %v3759_v30 = vmul.f32 %v4589_v57, %v7432_v27  ;;  %v8675_v20 = vld [vmem:[#allocation173_spill] sm:$0xff]  ;;  %v4595_v48 = vld [vmem:[#allocation2 + $0x110] sm:$0xff]  ;;  %v4597_v4 = vld [vmem:[#allocation2 + $0x118] sm:$0xff] }
 0x5e6   :  { %v3341_v1 = vpop.permute.xlu0 %3340  ;;  %v3329_v23 = vpop.permute.xlu1 %3328  ;;  %v4072_v0 = vmul.f32 %v8675_v20, %v7432_v27  ;;  %v4198_v45 = vadd.f32 %v4197_v51, %v4071_v9  ;;  %v8684_v20 = vld [vmem:[#allocation224_spill] sm:$0xff] }
 0x5e7   :  { %v3775_v37 = vmul.f32 %v4585_v60, %v3329_v23  ;;  %v4088_v24 = vmul.f32 %v8670_v34, %v3329_v23  ;;  %v3906_v58 = vadd.f32 %v3905_v56, %v3774_v17  ;;  %v4219_v29 = vadd.f32 %v4218_v25, %v4087_v16  ;;  %v4592_v23 = vld [vmem:[#allocation2 + $0x100] sm:$0xff]  ;;  %v4593_v60 = vld [vmem:[#allocation2 + $0x108] sm:$0xff]  ;;  %v8678_v34 = vld [vmem:[#allocation216_spill] sm:$0xff] }
 0x5e8   :  { %3635 = vbcast.lane.b32.xlu0 %v7456_v44, 288  ;;  %3631 = vbcast.lane.b32.xlu1 %v7456_v44, 280  ;;  %v3778_v31 = vmul.f32 %v4590_v42, %v3341_v1  ;;  %v4091_v6 = vmul.f32 %v8674_v40, %v3341_v1  ;;  %v3886_v2 = vadd.f32 %v3885_v61, %v3759_v30  ;;  %v8682_v61 = vld [vmem:[#allocation220_spill] sm:$0xff]  ;;  %v8683_v42 = vld [vmem:[#allocation221_spill] sm:$0xff] }
 0x5e9   :  { %v3907_v36 = vadd.f32 %v3906_v58, %v3775_v37  ;;  %v4220_v50 = vadd.f32 %v4219_v29, %v4088_v24  ;;  %v3760_v58 = vmul.f32 %v4594_v19, %v7424_v18  ;;  %v4199_v29 = vadd.f32 %v4198_v45, %v4072_v0 }
 0x5ea   :  { %v3352_v5 = vpop.permute.xlu0 %3351  ;;  %v3337_v43 = vpop.permute.xlu1 %3336 }
 0x5eb   :  { %v3777_v22 = vmul.f32 %v4588_v3, %v3337_v43  ;;  %v4090_v14 = vmul.f32 %v8672_v63, %v3337_v43  ;;  %v3908_v32 = vadd.f32 %v3907_v36, %v3776_v35  ;;  %v4221_v38 = vadd.f32 %v4220_v50, %v4089_v13  ;;  %v8679_v35 = vld [vmem:[#allocation217_spill] sm:$0xff]  ;;  %v8680_v50 = vld [vmem:[#allocation174_spill] sm:$0xff]  ;;  %v8681_v63 = vld [vmem:[#allocation176_spill] sm:$0xff] }
 0x5ec   :  { %3702 = vbcast.lane.b32.xlu0 %v7470_v8, 288  ;;  %3698 = vbcast.lane.b32.xlu1 %v7470_v8, 280  ;;  %v3780_v27 = vmul.f32 %v4592_v23, %v3352_v5  ;;  %v4093_v12 = vmul.f32 %v8677_v7, %v3352_v5  ;;  %v4073_v5 = vmul.f32 %v8680_v50, %v7424_v18  ;;  %v4596_v43 = vld [vmem:[#allocation2 + $0x68] sm:$0xff]  ;;  %v4598_v18 = vld [vmem:[#allocation2 + $0x120] sm:$0xff] }
 0x5ed   :  { %v3909_v47 = vadd.f32 %v3908_v32, %v3777_v22  ;;  %v4222_v62 = vadd.f32 %v4221_v38, %v4090_v14  ;;  %v3761_v39 = vmul.f32 %v4596_v43, %v7438_v59  ;;  %v3887_v22 = vadd.f32 %v3886_v2, %v3760_v58  ;;  %v4601_v2 = vld [vmem:[#allocation2 + $0x130] sm:$0xff]  ;;  %v4603_v58 = vld [vmem:[#allocation2 + $0x138] sm:$0xff] }
 0x5ee   :  { %v3360_v41 = vpop.permute.xlu0 %3359  ;;  %v3345_v55 = vpop.permute.xlu1 %3344  ;;  %v4074_v14 = vmul.f32 %v8681_v63, %v7438_v59  ;;  %v4200_v38 = vadd.f32 %v4199_v29, %v4073_v5  ;;  %v8689_v5 = vld [vmem:[#allocation229_spill] sm:$0xff] }
 0x5ef   :  { %v3779_v10 = vmul.f32 %v4591_v26, %v3345_v55  ;;  %v4092_v15 = vmul.f32 %v8676_v52, %v3345_v55  ;;  %v3910_v54 = vadd.f32 %v3909_v47, %v3778_v31  ;;  %v4223_v17 = vadd.f32 %v4222_v62, %v4091_v6 }
 0x5f0   :  { %3576 = vbcast.lane.b32.xlu0 %v7446_v21, 304  ;;  %3572 = vbcast.lane.b32.xlu1 %v7446_v21, 296  ;;  %v3782_v28 = vmul.f32 %v4595_v48, %v3360_v41  ;;  %v4095_v11 = vmul.f32 %v8679_v35, %v3360_v41  ;;  %v3888_v59 = vadd.f32 %v3887_v22, %v3761_v39  ;;  %v4599_v41 = vld [vmem:[#allocation2 + $0x128] sm:$0xff]  ;;  %v8688_v48 = vld [vmem:[#allocation228_spill] sm:$0xff] }
 0x5f1   :  { %v7519_v16 = vadd.f32 %v3910_v54, %v3779_v10  ;;  %v7521_v56 = vadd.f32 %v4223_v17, %v4092_v15  ;;  %v4201_v26 = vadd.f32 %v4200_v38, %v4074_v14  ;;  %v4600_v15 = vld [vmem:[#allocation2 + $0x70] sm:$0xff]  ;;  %v8685_v54 = vld [vmem:[#allocation177_spill] sm:$0xff]  ;;  %v4605_v22 = vld [vmem:[#allocation2 + $0x148] sm:$0xff] }
 0x5f2   :  { %v3368_v25 = vpop.permute.xlu0 %3367  ;;  %v3356_v1 = vpop.permute.xlu1 %3355  ;;  %v3762_v45 = vmul.f32 %v4600_v15, %v7430_v46  ;;  %v4075_v17 = vmul.f32 %v8685_v54, %v7430_v46  ;;  %v8690_v14 = vld [vmem:[#allocation230_spill] sm:$0xff]  ;;  %v4608_v54 = vld [vmem:[#allocation2 + $0x160] sm:$0xff] }
 0x5f3   :  { %v3781_v37 = vmul.f32 %v4593_v60, %v3356_v1  ;;  %v4094_v24 = vmul.f32 %v8678_v34, %v3356_v1  ;;  %v3784_v30 = vmul.f32 %v4598_v18, %v3368_v25  ;;  %v4097_v31 = vmul.f32 %v8683_v42, %v3368_v25  ;;  %v8686_v1 = vld [vmem:[#allocation225_spill] sm:$0xff]  ;;  %v4606_v18 = vld [vmem:[#allocation2 + $0x150] sm:$0xff] }
 0x5f4   :  { %3643 = vbcast.lane.b32.xlu0 %v7456_v44, 304  ;;  %3639 = vbcast.lane.b32.xlu1 %v7456_v44, 296  ;;  %v3889_v35 = vadd.f32 %v3888_v59, %v3762_v45  ;;  %v4202_v46 = vadd.f32 %v4201_v26, %v4075_v17  ;;  %v8691_v42 = vld [vmem:[#allocation231_spill] sm:$0xff]  ;;  %v4607_v59 = vld [vmem:[#allocation2 + $0x158] sm:$0xff] }
 0x5f5   :  { %v3918_v13 = vadd.f32 %v3781_v37, %v3780_v27  ;;  %v4231_v36 = vadd.f32 %v4094_v24, %v4093_v12  ;;  %v4602_v37 = vld [vmem:[#allocation2 + $0x78] sm:$0xff] }
 0x5f6   :  { %v3376_v49 = vpop.permute.xlu0 %3375  ;;  %v3364_v3 = vpop.permute.xlu1 %3363  ;;  %v3763_v34 = vmul.f32 %v4602_v37, %v7449_v33  ;;  %v8687_v24 = vld [vmem:[#allocation180_spill] sm:$0xff]  ;;  %v8694_v37 = vld [vmem:[#allocation234_spill] sm:$0xff] }
 0x5f7   :  { %v3919_v51 = vadd.f32 %v3918_v13, %v3782_v28  ;;  %v4232_v32 = vadd.f32 %v4231_v36, %v4095_v11  ;;  %v3783_v9 = vmul.f32 %v4597_v4, %v3364_v3  ;;  %v4096_v57 = vmul.f32 %v8682_v61, %v3364_v3  ;;  %v4604_v36 = vld [vmem:[#allocation2 + $0x140] sm:$0xff] }
 0x5f8   :  { %3710 = vbcast.lane.b32.xlu0 %v7470_v8, 304  ;;  %3706 = vbcast.lane.b32.xlu1 %v7470_v8, 296  ;;  %v3786_v25 = vmul.f32 %v4601_v2, %v3376_v49  ;;  %v4099_v23 = vmul.f32 %v8686_v1, %v3376_v49  ;;  %v4076_v19 = vmul.f32 %v8687_v24, %v7449_v33  ;;  %v3912_v61 = vrot.slane %v7519_v16, 4  ;;  %v8693_v2 = vld [vmem:[#allocation233_spill] sm:$0xff] }
 0x5f9   :  { %v3920_v40 = vadd.f32 %v3919_v51, %v3783_v9  ;;  %v4233_v6 = vadd.f32 %v4232_v32, %v4096_v57  ;;  %v3890_v32 = vadd.f32 %v3889_v35, %v3763_v34  ;;  %v4225_v57 = vrot.slane %v7521_v56, 4  ;;  %v8695_v35 = vld [vmem:[#allocation235_spill] sm:$0xff] }
 0x5fa   :  { %v3384_v47 = vpop.permute.xlu0 %3383  ;;  %v3372_v62 = vpop.permute.xlu1 %3371  ;;  %v4203_v38 = vadd.f32 %v4202_v46, %v4076_v19  ;;  %v3913_v15 = vadd.f32 %v3912_v61, %v7519_v16  ;;  %v4612_v61 = vld [vmem:[#allocation2 + $0x180] sm:$0xff] }
 0x5fb   :  { %v3785_v55 = vmul.f32 %v4599_v41, %v3372_v62  ;;  %v4098_v0 = vmul.f32 %v8684_v20, %v3372_v62  ;;  %v3921_v10 = vadd.f32 %v3920_v40, %v3784_v30  ;;  %v4234_v52 = vadd.f32 %v4233_v6, %v4097_v31 }
 0x5fc   :  { %3584 = vbcast.lane.b32.xlu0 %v7446_v21, 320  ;;  %3580 = vbcast.lane.b32.xlu1 %v7446_v21, 312  ;;  %v3788_v50 = vmul.f32 %v4604_v36, %v3384_v47  ;;  %v4101_v43 = vmul.f32 %v8689_v5, %v3384_v47  ;;  %v4204_v26 = vrot.slane %v4203_v38, 4  ;;  %v4226_v45 = vadd.f32 %v4225_v57, %v7521_v56  ;;  %v4611_v5 = vld [vmem:[#allocation2 + $0x178] sm:$0xff] }
 0x5fd   :  { %v3922_v27 = vadd.f32 %v3921_v10, %v3785_v55  ;;  %v4235_v7 = vadd.f32 %v4234_v52, %v4098_v0  ;;  %v8692_v55 = vld [vmem:[#allocation232_spill] sm:$0xff]  ;;  %v3891_v0 = vrot.slane %v3890_v32, 4  ;;  %v3914_v56 = vrot.slane %v3913_v15, 2 }
 0x5fe   :  { %v3392_v12 = vpop.permute.xlu0 %3391  ;;  %v3380_v60 = vpop.permute.xlu1 %3379  ;;  %v4205_v19 = vadd.f32 %v4204_v26, %v4203_v38 }
 0x5ff   :  { %v3787_v29 = vmul.f32 %v4603_v58, %v3380_v60  ;;  %v4100_v28 = vmul.f32 %v8688_v48, %v3380_v60  ;;  %v3923_v11 = vadd.f32 %v3922_v27, %v3786_v25  ;;  %v4236_v13 = vadd.f32 %v4235_v7, %v4099_v23  ;;  %v4610_v48 = vld [vmem:[#allocation2 + $0x170] sm:$0xff] }
 0x600   :  { %3651 = vbcast.lane.b32.xlu0 %v7456_v44, 320  ;;  %3647 = vbcast.lane.b32.xlu1 %v7456_v44, 312  ;;  %v3790_v30 = vmul.f32 %v4606_v18, %v3392_v12  ;;  %v4103_v31 = vmul.f32 %v8691_v42, %v3392_v12  ;;  %v4609_v12 = vld [vmem:[#allocation2 + $0x168] sm:$0xff]  ;;  %v3892_v24 = vadd.f32 %v3891_v0, %v3890_v32  ;;  %v8697_v18 = vld [vmem:[#allocation237_spill] sm:$0xff]  ;;  %v8699_v0 = vld [vmem:[#allocation239_spill] sm:$0xff] }
 0x601   :  { %v3924_v39 = vadd.f32 %v3923_v11, %v3787_v29  ;;  %v4237_v49 = vadd.f32 %v4236_v13, %v4100_v28  ;;  %v4227_v29 = vrot.slane %v4226_v45, 2  ;;  %v4613_v42 = vld [vmem:[#allocation2 + $0x188] sm:$0xff] }
 0x602   :  { %v3400_v3 = vpop.permute.xlu0 %3399  ;;  %v3388_v33 = vpop.permute.xlu1 %3387 }
 0x603   :  { %v3789_v63 = vmul.f32 %v4605_v22, %v3388_v33  ;;  %v4102_v51 = vmul.f32 %v8690_v14, %v3388_v33  ;;  %v3925_v4 = vadd.f32 %v3924_v39, %v3788_v50  ;;  %v4238_v9 = vadd.f32 %v4237_v49, %v4101_v43  ;;  %v8696_v39 = vld [vmem:[#allocation236_spill] sm:$0xff] }
 0x604   :  { %3718 = vbcast.lane.b32.xlu0 %v7470_v8, 320  ;;  %3714 = vbcast.lane.b32.xlu1 %v7470_v8, 312  ;;  %v3792_v17 = vmul.f32 %v4608_v54, %v3400_v3  ;;  %v4105_v25 = vmul.f32 %v8693_v2, %v3400_v3  ;;  %v3893_v3 = vrot.slane %v3892_v24, 2  ;;  %v4206_v33 = vrot.slane %v4205_v19, 2 }
 0x605   :  { %v3926_v40 = vadd.f32 %v3925_v4, %v3789_v63  ;;  %v4239_v6 = vadd.f32 %v4238_v9, %v4102_v51  ;;  %v3915_v14 = vadd.f32 %v3914_v56, %v3913_v15  ;;  %v4228_v51 = vadd.f32 %v4227_v29, %v4226_v45  ;;  %v8701_v56 = vld [vmem:[#allocation241_spill] sm:$0xff] }
 0x606   :  { %v3408_v47 = vpop.permute.xlu0 %3407  ;;  %v3396_v62 = vpop.permute.xlu1 %3395 }
 0x607   :  { %v3791_v41 = vmul.f32 %v4607_v59, %v3396_v62  ;;  %v4104_v20 = vmul.f32 %v8692_v55, %v3396_v62  ;;  %v3927_v10 = vadd.f32 %v3926_v40, %v3790_v30  ;;  %v4240_v52 = vadd.f32 %v4239_v6, %v4103_v31  ;;  %v8698_v40 = vld [vmem:[#allocation238_spill] sm:$0xff]  ;;  %v4614_v55 = vld [vmem:[#allocation2 + $0x190] sm:$0xff] }
 0x608   :  { %3592 = vbcast.lane.b32.xlu0 %v7446_v21, 336  ;;  %3588 = vbcast.lane.b32.xlu1 %v7446_v21, 328  ;;  %v3794_v28 = vmul.f32 %v4610_v48, %v3408_v47  ;;  %v4107_v46 = vmul.f32 %v8695_v35, %v3408_v47  ;;  %v3894_v47 = vadd.f32 %v3893_v3, %v3892_v24  ;;  %v3916_v2 = vrot.slane %v3915_v14, 1 }
 0x609   :  { %v3928_v1 = vadd.f32 %v3927_v10, %v3791_v41  ;;  %v4241_v23 = vadd.f32 %v4240_v52, %v4104_v20  ;;  %v4207_v62 = vadd.f32 %v4206_v33, %v4205_v19 }
 0x60a   :  { %v3419_v27 = vpop.permute.xlu0 %3418  ;;  %v3404_v7 = vpop.permute.xlu1 %3403  ;;  %v3895_v24 = vrot.slane %v3894_v47, 1 }
 0x60b   :  { %v3793_v60 = vmul.f32 %v4609_v12, %v3404_v7  ;;  %v4106_v34 = vmul.f32 %v8694_v37, %v3404_v7  ;;  %v3929_v58 = vadd.f32 %v3928_v1, %v3792_v17  ;;  %v4242_v16 = vadd.f32 %v4241_v23, %v4105_v25  ;;  %v4615_v12 = vld [vmem:[#allocation2 + $0x198] sm:$0xff] }
 0x60c   :  { %3529 = vbcast.lane.b32.xlu0 %v7408_v53, 344  ;;  %3655 = vbcast.lane.b32.xlu1 %v7456_v44, 328  ;;  %v3796_v57 = vmul.f32 %v4612_v61, %v3419_v27  ;;  %v4109_v30 = vmul.f32 %v8697_v18, %v3419_v27  ;;  %v4229_v25 = vrot.slane %v4228_v51, 1  ;;  %v8700_v37 = vld [vmem:[#allocation240_spill] sm:$0xff]  ;;  %v4208_v19 = vrot.slane %v4207_v62, 1  ;;  %v8703_v61 = vld [vmem:[#allocation243_spill] sm:$0xff] }
 0x60d   :  { %v3930_v11 = vadd.f32 %v3929_v58, %v3793_v60  ;;  %v4243_v13 = vadd.f32 %v4242_v16, %v4106_v34  ;;  %v4616_v58 = vld [vmem:[#allocation2 + $0x1a0] sm:$0xff] }
 0x60e   :  { %v3427_v36 = vpop.permute.xlu0 %3426  ;;  %v3412_v50 = vpop.permute.xlu1 %3411 }
 0x60f   :  { %v3795_v43 = vmul.f32 %v4611_v5, %v3412_v50  ;;  %v4108_v49 = vmul.f32 %v8696_v39, %v3412_v50  ;;  %v3931_v22 = vadd.f32 %v3930_v11, %v3794_v28  ;;  %v4244_v63 = vadd.f32 %v4243_v13, %v4107_v46  ;;  %v4617_v5 = vld [vmem:[#allocation2 + $0x1a8] sm:$0xff] }
 0x610   :  { %3596 = vbcast.lane.b32.xlu0 %v7446_v21, 344  ;;  %3722 = vbcast.lane.b32.xlu1 %v7470_v8, 328  ;;  %v3798_v20 = vmul.f32 %v4614_v55, %v3427_v36  ;;  %v4111_v26 = vmul.f32 %v8699_v0, %v3427_v36  ;;  %v3917_v36 = vadd.f32 %v3916_v2, %v3915_v14  ;;  %v8702_v39 = vld [vmem:[#allocation242_spill] sm:$0xff] }
 0x611   :  { %v3932_v32 = vadd.f32 %v3931_v22, %v3795_v43  ;;  %v4245_v38 = vadd.f32 %v4244_v63, %v4108_v49  ;;  %v4230_v50 = vadd.f32 %v4229_v25, %v4228_v51 }
 0x612   :  { %v3435_v4 = vpop.permute.xlu0 %3434  ;;  %v3423_v9 = vpop.permute.xlu1 %3422 }
 0x613   :  { %v3797_v31 = vmul.f32 %v4613_v42, %v3423_v9  ;;  %v4110_v6 = vmul.f32 %v8698_v40, %v3423_v9  ;;  %v3933_v59 = vrot.slane %v3932_v32, 4  ;;  %v4246_v41 = vrot.slane %v4245_v38, 4 }
 0x614   :  { %3533 = vbcast.lane.b32.xlu0 %v7408_v53, 352  ;;  %3659 = vbcast.lane.b32.xlu1 %v7456_v44, 336  ;;  %v3800_v16 = vmul.f32 %v4616_v58, %v3435_v4  ;;  %v4113_v29 = vmul.f32 %v8701_v56, %v3435_v4  ;;  %v4618_v4 = vld [vmem:[#allocation2 + $0x1b0] sm:$0xff] }
 0x615   :  { %v3939_v10 = vadd.f32 %v3797_v31, %v3796_v57  ;;  %v4252_v52 = vadd.f32 %v4110_v6, %v4109_v30  ;;  %v3934_v15 = vadd.f32 %v3933_v59, %v3932_v32  ;;  %v4247_v45 = vadd.f32 %v4246_v41, %v4245_v38  ;;  %v4619_v59 = vld [vmem:[#allocation2 + $0x1b8] sm:$0xff] }
 0x616   :  { %v3443_v54 = vpop.permute.xlu0 %3442  ;;  %v3431_v17 = vpop.permute.xlu1 %3430  ;;  %v3896_v32 = vadd.f32 %v3895_v24, %v3894_v47  ;;  %v4209_v38 = vadd.f32 %v4208_v19, %v4207_v62  ;;  %v8704_v47 = vld [vmem:[#allocation244_spill] sm:$0xff]  ;;  %v8707_v24 = vld [vmem:[#allocation247_spill] sm:$0xff] }
 0x617   :  { %v3940_v1 = vadd.f32 %v3939_v10, %v3798_v20  ;;  %v4253_v23 = vadd.f32 %v4252_v52, %v4111_v26  ;;  %v3935_v27 = vrot.slane %v3934_v15, 2  ;;  %v4248_v7 = vrot.slane %v4247_v45, 2  ;;  %v4620_v10 = vld [vmem:[#allocation2 + $0x1c0] sm:$0xff] }
 0x618   :  { %v3799_v60 = vmul.f32 %v4615_v12, %v3431_v17  ;;  %v4112_v34 = vmul.f32 %v8700_v37, %v3431_v17  ;;  %3600 = vbcast.lane.b32.xlu0 %v7446_v21, 352  ;;  %3726 = vbcast.lane.b32.xlu1 %v7470_v8, 336  ;;  %v3802_v9 = vmul.f32 %v4618_v4, %v3443_v54  ;;  %v4622_v37 = vld [vmem:[#allocation2 + $0x1d0] sm:$0xff] }
 0x619   :  { %v3936_v48 = vadd.f32 %v3935_v27, %v3934_v15  ;;  %v4249_v28 = vadd.f32 %v4248_v7, %v4247_v45  ;;  %v4115_v57 = vmul.f32 %v8703_v61, %v3443_v54  ;;  %v4052_v40 = vsel %vm3187_vm8, %v3917_v36, %v3896_v32  ;;  %v8705_v15 = vld [vmem:[#allocation245_spill] sm:$0xff]  ;;  %v8706_v27 = vld [vmem:[#allocation246_spill] sm:$0xff]  ;;  %v4626_v61 = vld [vmem:[#allocation2 + $0x1f0] sm:$0xff] }
 0x61a   :  { %v3941_v35 = vadd.f32 %v3940_v1, %v3799_v60  ;;  %v4254_v46 = vadd.f32 %v4253_v23, %v4112_v34  ;;  %v3451_v11 = vpop.permute.xlu0 %3450  ;;  %v3439_v13 = vpop.permute.xlu1 %3438  ;;  %v4365_v6 = vsel %vm3187_vm8, %v4230_v50, %v4209_v38  ;;  %v4621_v1 = vld [vmem:[#allocation2 + $0x1c8] sm:$0xff]  ;;  %v4624_v36 = vld [vmem:[#allocation2 + $0x1e0] sm:$0xff] }
 0x61b   :  { %v3801_v43 = vmul.f32 %v4617_v5, %v3439_v13  ;;  %v4114_v49 = vmul.f32 %v8702_v39, %v3439_v13  ;;  %v3937_v3 = vrot.slane %v3936_v48, 1  ;;  %v4250_v33 = vrot.slane %v4249_v28, 1  ;;  %v8709_v5 = vld [vmem:[#allocation249_spill] sm:$0xff]  ;;  %v8710_v32 = vld [vmem:[#allocation250_spill] sm:$0xff] }
 0x61c   :  { %v3942_v22 = vadd.f32 %v3941_v35, %v3800_v16  ;;  %v4255_v63 = vadd.f32 %v4254_v46, %v4113_v29  ;;  %3537 = vbcast.lane.b32.xlu0 %v7408_v53, 360  ;;  %3663 = vbcast.lane.b32.xlu1 %v7456_v44, 344  ;;  %v3804_v52 = vmul.f32 %v4620_v10, %v3451_v11  ;;  %v8708_v35 = vld [vmem:[#allocation248_spill] sm:$0xff] }
 0x61d   :  { %v3938_v14 = vadd.f32 %v3937_v3, %v3936_v48  ;;  %v4251_v51 = vadd.f32 %v4250_v33, %v4249_v28  ;;  %v4117_v45 = vmul.f32 %v8705_v15, %v3451_v11  ;;  %v4623_v48 = vld [vmem:[#allocation2 + $0x1d8] sm:$0xff] }
 0x61e   :  { %v3943_v18 = vadd.f32 %v3942_v22, %v3801_v43  ;;  %v4256_v30 = vadd.f32 %v4255_v63, %v4114_v49  ;;  %v3459_v42 = vpop.permute.xlu0 %3458  ;;  %v3447_v31 = vpop.permute.xlu1 %3446  ;;  %v4625_v22 = vld [vmem:[#allocation2 + $0x1e8] sm:$0xff] }
 0x61f   :  { %v3803_v41 = vmul.f32 %v4619_v59, %v3447_v31  ;;  %v4116_v62 = vmul.f32 %v8704_v47, %v3447_v31  ;;  %v7589_v0 = vsel %vm3189_vm7, %v4251_v51, %v4365_v6  ;;  %v7592_v26 = vsel %vm3189_vm7, %v3938_v14, %v4052_v40  ;;  %v8711_v14 = vld [vmem:[#allocation251_spill] sm:$0xff]  ;;  %v4627_v40 = vld [vmem:[#allocation2 + $0x1f8] sm:$0xff] }
 0x620   :  { %v3944_v55 = vadd.f32 %v3943_v18, %v3802_v9  ;;  %v4257_v20 = vadd.f32 %v4256_v30, %v4115_v57  ;;  %3604 = vbcast.lane.b32.xlu0 %v7446_v21, 360  ;;  %3730 = vbcast.lane.b32.xlu1 %v7470_v8, 344  ;;  %v3806_v34 = vmul.f32 %v4622_v37, %v3459_v42  ;;  %v8712_v59 = vld [vmem:[#allocation252_spill] sm:$0xff] }
 0x621   :  { %v4119_v19 = vmul.f32 %v8707_v24, %v3459_v42 }
 0x622   :  { %v3945_v54 = vadd.f32 %v3944_v55, %v3803_v41  ;;  %v4258_v17 = vadd.f32 %v4257_v20, %v4116_v62  ;;  %v3467_v2 = vpop.permute.xlu0 %3466  ;;  %v3455_v25 = vpop.permute.xlu1 %3454 }
 0x623   :  { %v3805_v23 = vmul.f32 %v4621_v1, %v3455_v25  ;;  %v4118_v7 = vmul.f32 %v8706_v27, %v3455_v25  ;;  %v3808_v50 = vmul.f32 %v4624_v36, %v3467_v2  ;;  %v4121_v43 = vmul.f32 %v8709_v5, %v3467_v2  ;;  %v8714_v25 = vld [vmem:[#allocation254_spill] sm:$0xff]  ;;  %v4632_v36 = vld [vmem:[#allocation2 + $0x220] sm:$0xff] }
 0x624   :  { %v3946_v12 = vadd.f32 %v3945_v54, %v3804_v52  ;;  %v4259_v60 = vadd.f32 %v4258_v17, %v4117_v45  ;;  %3541 = vbcast.lane.b32.xlu0 %v7408_v53, 368  ;;  %3667 = vbcast.lane.b32.xlu1 %v7456_v44, 352  ;;  %v4628_v52 = vld [vmem:[#allocation2 + $0x200] sm:$0xff]  ;;  %v4629_v17 = vld [vmem:[#allocation2 + $0x208] sm:$0xff] }
 0x625   :  { %v8713_v45 = vld [vmem:[#allocation253_spill] sm:$0xff] }
 0x626   :  { %v3947_v58 = vadd.f32 %v3946_v12, %v3805_v23  ;;  %v4260_v16 = vadd.f32 %v4259_v60, %v4118_v7  ;;  %v3475_v56 = vpop.permute.xlu0 %3474  ;;  %v3463_v29 = vpop.permute.xlu1 %3462  ;;  %v4630_v7 = vld [vmem:[#allocation2 + $0x210] sm:$0xff]  ;;  %v8717_v5 = vld [vmem:[#allocation49_spill] sm:$0xff] }
 0x627   :  { %v3807_v28 = vmul.f32 %v4623_v48, %v3463_v29  ;;  %v4120_v46 = vmul.f32 %v8708_v35, %v3463_v29  ;;  %v3810_v57 = vmul.f32 %v4626_v61, %v3475_v56  ;;  %v4123_v51 = vmul.f32 %v8711_v14, %v3475_v56  ;;  %v8715_v12 = vld [vmem:[#allocation255_spill] sm:$0xff]  ;;  %v4631_v35 = vld [vmem:[#allocation2 + $0x218] sm:$0xff] }
 0x628   :  { %v3948_v11 = vadd.f32 %v3947_v58, %v3806_v34  ;;  %v4261_v13 = vadd.f32 %v4260_v16, %v4119_v19  ;;  %3608 = vbcast.lane.b32.xlu0 %v7446_v21, 368  ;;  %3734 = vbcast.lane.b32.xlu1 %v7470_v8, 352 }
 0x62a   :  { %v3949_v39 = vadd.f32 %v3948_v11, %v3807_v28  ;;  %v4262_v49 = vadd.f32 %v4261_v13, %v4120_v46  ;;  %v3486_v3 = vpop.permute.xlu0 %3485  ;;  %v3471_v33 = vpop.permute.xlu1 %3470  ;;  %v8716_v11 = vld [vmem:[#allocation256_spill] sm:$0xff] }
 0x62b   :  { %v3809_v63 = vmul.f32 %v4625_v22, %v3471_v33  ;;  %v4122_v38 = vmul.f32 %v8710_v32, %v3471_v33  ;;  %v3812_v15 = vmul.f32 %v4628_v52, %v3486_v3  ;;  %v4125_v54 = vmul.f32 %v8713_v45, %v3486_v3 }
 0x62c   :  { %v3950_v4 = vadd.f32 %v3949_v39, %v3808_v50  ;;  %v4263_v9 = vadd.f32 %v4262_v49, %v4121_v43  ;;  %3545 = vbcast.lane.b32.xlu0 %v7408_v53, 376  ;;  %3671 = vbcast.lane.b32.xlu1 %v7456_v44, 360 }
 0x62e   :  { %v3951_v18 = vadd.f32 %v3950_v4, %v3809_v63  ;;  %v4264_v30 = vadd.f32 %v4263_v9, %v4122_v38  ;;  %v3494_v42 = vpop.permute.xlu0 %3493  ;;  %v3479_v31 = vpop.permute.xlu1 %3478  ;;  %v4633_v63 = vld [vmem:[#allocation2 + $0x228] sm:$0xff]  ;;  %v8718_v38 = vld [vmem:[#allocation257_spill] sm:$0xff] }
 0x62f   :  { %v3811_v6 = vmul.f32 %v4627_v40, %v3479_v31  ;;  %v4124_v41 = vmul.f32 %v8712_v59, %v3479_v31  ;;  %v4127_v60 = vmul.f32 %v8715_v12, %v3494_v42  ;;  %v8722_v12 = vld [vmem:[#allocation116_spill] sm:$0xff] }
 0x630   :  { %v3952_v47 = vadd.f32 %v3951_v18, %v3810_v57  ;;  %v4265_v62 = vadd.f32 %v4264_v30, %v4123_v51  ;;  %3612 = vbcast.lane.b32.xlu0 %v7446_v21, 376  ;;  %3738 = vbcast.lane.b32.xlu1 %v7470_v8, 360  ;;  %v3814_v21 = vmul.f32 %v4630_v7, %v3494_v42  ;;  %v4634_v51 = vld [vmem:[#allocation2 + $0x230] sm:$0xff]  ;;  %v4637_v7 = vld [vmem:[#allocation2 + $0x248] sm:$0xff] }
 0x631   :  { %v8719_v30 = vld [vmem:[#allocation259_spill] sm:$0xff] }
 0x632   :  { %v3953_v53 = vadd.f32 %v3952_v47, %v3811_v6  ;;  %v4266_v55 = vadd.f32 %v4265_v62, %v4124_v41  ;;  %v3502_v20 = vpop.permute.xlu0 %3501  ;;  %v3490_v10 = vpop.permute.xlu1 %3489  ;;  %v4635_v62 = vld [vmem:[#allocation2 + $0x238] sm:$0xff] }
 0x633   :  { %v3813_v2 = vmul.f32 %v4629_v17, %v3490_v10  ;;  %v4126_v1 = vmul.f32 %v8714_v25, %v3490_v10  ;;  %v3816_v50 = vmul.f32 %v4632_v36, %v3502_v20  ;;  %v4129_v43 = vmul.f32 %v8717_v5, %v3502_v20  ;;  %v8721_v17 = vld [vmem:[#allocation60_spill] sm:$0xff] }
 0x634   :  { %v3954_v23 = vrot.slane %v3953_v53, 4  ;;  %v4267_v27 = vrot.slane %v4266_v55, 4  ;;  %3679 = vbcast.lane.b32.xlu0 %v7456_v44, 376  ;;  %3675 = vbcast.lane.b32.xlu1 %v7456_v44, 368  ;;  %v8725_v36 = vld [vmem:[#allocation260_spill] sm:$0xff] }
 0x635   :  { %v3960_v37 = vadd.f32 %v3813_v2, %v3812_v15  ;;  %v4273_v34 = vadd.f32 %v4126_v1, %v4125_v54 }
 0x636   :  { %v3955_v24 = vadd.f32 %v3954_v23, %v3953_v53  ;;  %v4268_v19 = vadd.f32 %v4267_v27, %v4266_v55  ;;  %v3510_v58 = vpop.permute.xlu0 %3509  ;;  %v3498_v16 = vpop.permute.xlu1 %3497  ;;  %v8720_v55 = vld [vmem:[#allocation52_spill] sm:$0xff] }
 0x637   :  { %v3961_v56 = vadd.f32 %v3960_v37, %v3814_v21  ;;  %v4274_v29 = vadd.f32 %v4273_v34, %v4127_v60  ;;  %v3815_v46 = vmul.f32 %v4631_v35, %v3498_v16  ;;  %v4128_v13 = vmul.f32 %v8716_v11, %v3498_v16  ;;  %v8724_v35 = vld [vmem:[#allocation261_spill] sm:$0xff] }
 0x638   :  { %v3956_v48 = vrot.slane %v3955_v24, 2  ;;  %v4269_v28 = vrot.slane %v4268_v19, 2  ;;  %3742 = vbcast.lane.b32.xlu1 %v7470_v8, 368  ;;  %v3818_v18 = vmul.f32 %v4634_v51, %v3510_v58  ;;  %v4131_v42 = vmul.f32 %v8719_v30, %v3510_v58  ;;  %v4640_v11 = vld [vmem:[#allocation2 + $0x280] sm:$0xff]  ;;  %v4643_v30 = vld [vmem:[#allocation2 + $0x290] sm:$0xff] }
 0x639   :  { %v3962_v49 = vadd.f32 %v3961_v56, %v3815_v46  ;;  %v4275_v3 = vadd.f32 %v4274_v29, %v4128_v13 }
 0x63a   :  { %v3957_v39 = vadd.f32 %v3956_v48, %v3955_v24  ;;  %v4270_v44 = vadd.f32 %v4269_v28, %v4268_v19  ;;  %v3518_v33 = vpop.permute.xlu0 %3517  ;;  %v3506_v22 = vpop.permute.xlu1 %3505  ;;  %v8723_v19 = vld [vmem:[#allocation93_spill] sm:$0xff]  ;;  %v4639_v48 = vld [vmem:[#allocation2 + $0x288] sm:$0xff] }
 0x63b   :  { %v3817_v32 = vmul.f32 %v4633_v63, %v3506_v22  ;;  %v4130_v4 = vmul.f32 %v8718_v38, %v3506_v22  ;;  %v3963_v57 = vadd.f32 %v3962_v49, %v3816_v50  ;;  %v4276_v14 = vadd.f32 %v4275_v3, %v4129_v43  ;;  %v8726_v63 = vld [vmem:[#allocation107_spill] sm:$0xff]  ;;  %v4642_v38 = vld [vmem:[#allocation2 + $0x300] sm:$0xff] }
 0x63c   :  { %v3958_v9 = vrot.slane %v3957_v39, 1  ;;  %v4271_v61 = vrot.slane %v4270_v44, 1  ;;  %3746 = vbcast.lane.b32.xlu1 %v7470_v8, 376  ;;  %v4636_v8 = vld [vmem:[#allocation2 + $0x240] sm:$0xff]  ;;  %v4133_v2 = vmul.f32 %v8721_v17, %v3518_v33 }
 0x63d   :  { %v3964_v6 = vadd.f32 %v3963_v57, %v3817_v32  ;;  %v4277_v59 = vadd.f32 %v4276_v14, %v4130_v4  ;;  %v3820_v54 = vmul.f32 %v4636_v8, %v3518_v33  ;;  %v4641_v33 = vld [vmem:[#allocation2 + $0x308] sm:$0xff]  ;;  %v8730_v8 = vld [vmem:[#allocation108_spill] sm:$0xff] }
 0x63e   :  { %v3959_v31 = vadd.f32 %v3958_v9, %v3957_v39  ;;  %v4272_v40 = vadd.f32 %v4271_v61, %v4270_v44  ;;  %v3526_v41 = vpop.permute.xlu0 %3525  ;;  %v3514_v47 = vpop.permute.xlu1 %3513  ;;  %v8727_v9 = vld [vmem:[#allocation104_spill] sm:$0xff] }
 0x63f   :  { %v3819_v53 = vmul.f32 %v4635_v62, %v3514_v47  ;;  %v4132_v20 = vmul.f32 %v8720_v55, %v3514_v47  ;;  %v3965_v10 = vadd.f32 %v3964_v6, %v3818_v18  ;;  %v4278_v52 = vadd.f32 %v4277_v59, %v4131_v42  ;;  %v4644_v62 = vld [vmem:[#allocation2 + $0x380] sm:$0xff]  ;;  %v8729_v55 = vld [vmem:[#allocation75_spill] sm:$0xff] }
 0x640   :  { %v7625_v15 = vsel %vm3191_vm10, %v4272_v40, %v7589_v0  ;;  %v7629_v45 = vsel %vm3191_vm10, %v3959_v31, %v7592_v26  ;;  %v4638_v0 = vld [vmem:[#allocation2 + $0x250] sm:$0xff]  ;;  %v4135_v58 = vmul.f32 %v8723_v19, %v3526_v41 }
 0x641   :  { %v3966_v25 = vadd.f32 %v3965_v10, %v3819_v53  ;;  %v4279_v1 = vadd.f32 %v4278_v52, %v4132_v20  ;;  %v3822_v24 = vmul.f32 %v4638_v0, %v3526_v41  ;;  %v8728_v31 = vld [vmem:[#allocation63_spill] sm:$0xff]  ;;  %v4645_v10 = vld [vmem:[#allocation2 + $0x388] sm:$0xff] }
 0x642   :  { %v3557_v23 = vpop.permute.xlu0 %3556  ;;  %v3522_v27 = vpop.permute.xlu1 %3521 }
 0x643   :  { %v3821_v21 = vmul.f32 %v4637_v7, %v3522_v27  ;;  %v4134_v60 = vmul.f32 %v8722_v12, %v3522_v27  ;;  %v3967_v37 = vadd.f32 %v3966_v25, %v3820_v54  ;;  %v4280_v34 = vadd.f32 %v4279_v1, %v4133_v2 }
 0x644   :  { %v3829_v28 = vmul.f32 %v4639_v48, %v3557_v23  ;;  %v4142_v46 = vmul.f32 %v8724_v35, %v3557_v23  ;;  %v4646_v48 = vld [vmem:[#allocation2 + $0x310] sm:$0xff]  ;;  %v8731_v35 = vld [vmem:[#allocation106_spill] sm:$0xff] }
 0x645   :  { %v3968_v26 = vadd.f32 %v3967_v37, %v3821_v21  ;;  %v4281_v16 = vadd.f32 %v4280_v34, %v4134_v60 }
 0x646   :  { %v3624_v56 = vpop.permute.xlu0 %3623  ;;  %v3553_v29 = vpop.permute.xlu1 %3552 }
 0x647   :  { %v3828_v13 = vmul.f32 %v4640_v11, %v3553_v29  ;;  %v4141_v50 = vmul.f32 %v8725_v36, %v3553_v29  ;;  %v7636_v5 = vadd.f32 %v3968_v26, %v3822_v24  ;;  %v7638_v43 = vadd.f32 %v4281_v16, %v4135_v58  ;;  %v4647_v11 = vld [vmem:[#allocation2 + $0x298] sm:$0xff]  ;;  %v8732_v36 = vld [vmem:[#allocation262_spill] sm:$0xff] }
 0x648   :  { %v3845_v22 = vmul.f32 %v4641_v33, %v3624_v56  ;;  %v4158_v32 = vmul.f32 %v8726_v63, %v3624_v56  ;;  %v8733_v33 = vld [vmem:[#allocation89_spill] sm:$0xff] }
 0x649   :  { %v3981_v39 = vadd.f32 %v3829_v28, %v3828_v13  ;;  %v4294_v44 = vadd.f32 %v4142_v46, %v4141_v50 }
 0x64a   :  { %v3687_v49 = vpop.permute.xlu0 %3686  ;;  %v3620_v3 = vpop.permute.xlu1 %3619 }
 0x64b   :  { %v3844_v4 = vmul.f32 %v4642_v38, %v3620_v3  ;;  %v4157_v61 = vmul.f32 %v8727_v9, %v3620_v3  ;;  %v3860_v53 = vmul.f32 %v4644_v62, %v3687_v49  ;;  %v4173_v20 = vmul.f32 %v8729_v55, %v3687_v49  ;;  %v4648_v49 = vld [vmem:[#allocation2 + $0x318] sm:$0xff]  ;;  %v4649_v38 = vld [vmem:[#allocation2 + $0x390] sm:$0xff]  ;;  %v8734_v9 = vld [vmem:[#allocation109_spill] sm:$0xff] }
 0x64c   :  { %v4651_v62 = vld [vmem:[#allocation2 + $0x398] sm:$0xff]  ;;  %v8736_v55 = vld [vmem:[#allocation91_spill] sm:$0xff] }
 0x64d   :  { %v4002_v57 = vadd.f32 %v3845_v22, %v3844_v4  ;;  %v4315_v14 = vadd.f32 %v4158_v32, %v4157_v61 }
 0x64e   :  { %v3628_v51 = vpop.permute.xlu0 %3627  ;;  %v3561_v18 = vpop.permute.xlu1 %3560 }
 0x64f   :  { %v3830_v42 = vmul.f32 %v4643_v30, %v3561_v18  ;;  %v4143_v40 = vmul.f32 %v8728_v31, %v3561_v18  ;;  %v3846_v28 = vmul.f32 %v4646_v48, %v3628_v51  ;;  %v4159_v46 = vmul.f32 %v8731_v35, %v3628_v51 }
 0x651   :  { %v3982_v6 = vadd.f32 %v3981_v39, %v3830_v42  ;;  %v4295_v59 = vadd.f32 %v4294_v44, %v4143_v40  ;;  %v4003_v63 = vadd.f32 %v4002_v57, %v3846_v28  ;;  %v4316_v32 = vadd.f32 %v4315_v14, %v4159_v46  ;;  %v4650_v42 = vld [vmem:[#allocation2 + $0x2a0] sm:$0xff]  ;;  %v8735_v40 = vld [vmem:[#allocation263_spill] sm:$0xff]  ;;  %v4654_v46 = vld [vmem:[#allocation2 + $0x328] sm:$0xff] }
 0x652   :  { %v3695_v41 = vpop.permute.xlu0 %3694  ;;  %v3691_v47 = vpop.permute.xlu1 %3690 }
 0x653   :  { %v3861_v52 = vmul.f32 %v4645_v10, %v3691_v47  ;;  %v4174_v54 = vmul.f32 %v8730_v8, %v3691_v47  ;;  %v3862_v4 = vmul.f32 %v4649_v38, %v3695_v41  ;;  %v4175_v61 = vmul.f32 %v8734_v9, %v3695_v41  ;;  %v4656_v38 = vld [vmem:[#allocation2 + $0x2b0] sm:$0xff]  ;;  %v8741_v9 = vld [vmem:[#allocation65_spill] sm:$0xff] }
 0x655   :  { %v4023_v17 = vadd.f32 %v3861_v52, %v3860_v53  ;;  %v4336_v2 = vadd.f32 %v4174_v54, %v4173_v20  ;;  %v4652_v52 = vld [vmem:[#allocation2 + $0x2a8] sm:$0xff]  ;;  %v8737_v54 = vld [vmem:[#allocation64_spill] sm:$0xff] }
 0x656   :  { %v3569_v25 = vpop.permute.xlu0 %3568  ;;  %v3565_v1 = vpop.permute.xlu1 %3564 }
 0x657   :  { %v3831_v13 = vmul.f32 %v4647_v11, %v3565_v1  ;;  %v4144_v50 = vmul.f32 %v8732_v36, %v3565_v1  ;;  %v3832_v31 = vmul.f32 %v4650_v42, %v3569_v25  ;;  %v4145_v47 = vmul.f32 %v8735_v40, %v3569_v25  ;;  %v8738_v1 = vld [vmem:[#allocation90_spill] sm:$0xff]  ;;  %v4658_v40 = vld [vmem:[#allocation2 + $0x2b8] sm:$0xff] }
 0x658   :  { %v4024_v48 = vadd.f32 %v4023_v17, %v3862_v4  ;;  %v4337_v28 = vadd.f32 %v4336_v2, %v4175_v61  ;;  %v4657_v61 = vld [vmem:[#allocation2 + $0x3a8] sm:$0xff] }
 0x659   :  { %v3983_v18 = vadd.f32 %v3982_v6, %v3831_v13  ;;  %v4296_v51 = vadd.f32 %v4295_v59, %v4144_v50  ;;  %v4653_v6 = vld [vmem:[#allocation2 + $0x320] sm:$0xff] }
 0x65a   :  { %v3636_v23 = vpop.permute.xlu0 %3635  ;;  %v3632_v27 = vpop.permute.xlu1 %3631  ;;  %v8739_v13 = vld [vmem:[#allocation77_spill] sm:$0xff] }
 0x65b   :  { %v3847_v3 = vmul.f32 %v4648_v49, %v3632_v27  ;;  %v4160_v22 = vmul.f32 %v8733_v33, %v3632_v27  ;;  %v3848_v59 = vmul.f32 %v4653_v6, %v3636_v23  ;;  %v4161_v27 = vmul.f32 %v8738_v1, %v3636_v23  ;;  %v4655_v50 = vld [vmem:[#allocation2 + $0x3a0] sm:$0xff]  ;;  %v4660_v6 = vld [vmem:[#allocation2 + $0x338] sm:$0xff]  ;;  %v8745_v1 = vld [vmem:[#allocation118_spill] sm:$0xff] }
 0x65c   :  { %v3984_v35 = vadd.f32 %v3983_v18, %v3832_v31  ;;  %v4297_v25 = vadd.f32 %v4296_v51, %v4145_v47  ;;  %v8742_v51 = vld [vmem:[#allocation115_spill] sm:$0xff] }
 0x65d   :  { %v4004_v57 = vadd.f32 %v4003_v63, %v3847_v3  ;;  %v4317_v14 = vadd.f32 %v4316_v32, %v4160_v22  ;;  %v8740_v3 = vld [vmem:[#allocation113_spill] sm:$0xff] }
 0x65e   :  { %v3703_v7 = vpop.permute.xlu0 %3702  ;;  %v3699_v21 = vpop.permute.xlu1 %3698 }
 0x65f   :  { %v3863_v53 = vmul.f32 %v4651_v62, %v3699_v21  ;;  %v4176_v20 = vmul.f32 %v8736_v55, %v3699_v21  ;;  %v3864_v49 = vmul.f32 %v4655_v50, %v3703_v7  ;;  %v4177_v33 = vmul.f32 %v8740_v3, %v3703_v7  ;;  %v8743_v62 = vld [vmem:[#allocation114_spill] sm:$0xff] }
 0x660   :  { %v4005_v17 = vadd.f32 %v4004_v57, %v3848_v59  ;;  %v4318_v2 = vadd.f32 %v4317_v14, %v4161_v27  ;;  %v4661_v27 = vld [vmem:[#allocation2 + $0x3b0] sm:$0xff] }
 0x661   :  { %v4025_v22 = vadd.f32 %v4024_v48, %v3863_v53 }
 0x662   :  { %v7645_v12 = vpop.permute.xlu0 %3576  ;;  %v3573_v60 = vpop.permute.xlu1 %3572 }
 0x663   :  { %v3833_v8 = vmul.f32 %v4652_v52, %v3573_v60  ;;  %v4146_v41 = vmul.f32 %v8737_v54, %v3573_v60  ;;  %v4338_v60 = vadd.f32 %v4337_v28, %v4176_v20  ;;  %v3834_v4 = vmul.f32 %v4656_v38, %v7645_v12  ;;  %v4659_v20 = vld [vmem:[#allocation2 + $0x330] sm:$0xff]  ;;  %v8746_v28 = vld [vmem:[#allocation78_spill] sm:$0xff] }
 0x664   :  { %v4026_v52 = vadd.f32 %v4025_v22, %v3864_v49  ;;  %v4662_v49 = vld [vmem:[#allocation2 + $0x2c0] sm:$0xff]  ;;  %v4663_v22 = vld [vmem:[#allocation2 + $0x3b8] sm:$0xff]  ;;  %v4664_v38 = vld [vmem:[#allocation2 + $0x2c8] sm:$0xff] }
 0x665   :  { %v3985_v32 = vadd.f32 %v3984_v35, %v3833_v8  ;;  %v4298_v23 = vadd.f32 %v4297_v25, %v4146_v41  ;;  %v4339_v8 = vadd.f32 %v4338_v60, %v4177_v33  ;;  %v8747_v33 = vld [vmem:[#allocation117_spill] sm:$0xff] }
 0x666   :  { %v7647_v37 = vpop.permute.xlu0 %3643  ;;  %v3640_v34 = vpop.permute.xlu1 %3639 }
 0x667   :  { %v3849_v11 = vmul.f32 %v4654_v46, %v3640_v34  ;;  %v4162_v21 = vmul.f32 %v8739_v13, %v3640_v34  ;;  %v4147_v34 = vmul.f32 %v8741_v9, %v7645_v12  ;;  %v3850_v57 = vmul.f32 %v4659_v20, %v7647_v37  ;;  %v8744_v12 = vld [vmem:[#allocation92_spill] sm:$0xff]  ;;  %v8749_v9 = vld [vmem:[#allocation119_spill] sm:$0xff] }
 0x668   :  { %v4163_v14 = vmul.f32 %v8744_v12, %v7647_v37 }
 0x669   :  { %v4006_v42 = vadd.f32 %v4005_v17, %v3849_v11  ;;  %v4319_v31 = vadd.f32 %v4318_v2, %v4162_v21  ;;  %v4299_v41 = vadd.f32 %v4298_v23, %v4147_v34 }
 0x66a   :  { %v7649_v0 = vpop.permute.xlu0 %3710  ;;  %v7651_v24 = vpop.permute.xlu1 %3706 }
 0x66b   :  { %v3865_v18 = vmul.f32 %v4657_v61, %v7651_v24  ;;  %v4178_v7 = vmul.f32 %v8742_v51, %v7651_v24  ;;  %v3986_v24 = vadd.f32 %v3985_v32, %v3834_v4  ;;  %v3866_v48 = vmul.f32 %v4661_v27, %v7649_v0  ;;  %v8748_v32 = vld [vmem:[#allocation120_spill] sm:$0xff]  ;;  %v4665_v51 = vld [vmem:[#allocation2 + $0x340] sm:$0xff]  ;;  %v8753_v27 = vld [vmem:[#allocation122_spill] sm:$0xff] }
 0x66c   :  { %v4179_v35 = vmul.f32 %v8746_v28, %v7649_v0  ;;  %v4007_v13 = vadd.f32 %v4006_v42, %v3850_v57  ;;  %v4320_v21 = vadd.f32 %v4319_v31, %v4163_v14 }
 0x66d   :  { %v4027_v25 = vadd.f32 %v4026_v52, %v3865_v18  ;;  %v4340_v37 = vadd.f32 %v4339_v8, %v4178_v7  ;;  %v8750_v7 = vld [vmem:[#allocation66_spill] sm:$0xff] }
 0x66e   :  { %v7653_v19 = vpop.permute.xlu0 %3584  ;;  %v7655_v58 = vpop.permute.xlu1 %3580 }
 0x66f   :  { %v3835_v47 = vmul.f32 %v4658_v40, %v7655_v58  ;;  %v4148_v53 = vmul.f32 %v8743_v62, %v7655_v58  ;;  %v3836_v3 = vmul.f32 %v4662_v49, %v7653_v19  ;;  %v4028_v61 = vadd.f32 %v4027_v25, %v3866_v48 }
 0x670   :  { %v4341_v18 = vadd.f32 %v4340_v37, %v4179_v35  ;;  %v8754_v35 = vld [vmem:[#allocation121_spill] sm:$0xff]  ;;  %v4670_v37 = vld [vmem:[#allocation2 + $0x2d8] sm:$0xff] }
 0x671   :  { %v3987_v46 = vadd.f32 %v3986_v24, %v3835_v47  ;;  %v4300_v11 = vadd.f32 %v4299_v41, %v4148_v53  ;;  %v4666_v47 = vld [vmem:[#allocation2 + $0x3c0] sm:$0xff]  ;;  %v8751_v53 = vld [vmem:[#allocation94_spill] sm:$0xff]  ;;  %v4667_v41 = vld [vmem:[#allocation2 + $0x258] sm:$0xff] }
 0x672   :  { %v7657_v26 = vpop.permute.xlu0 %3651  ;;  %v7659_v16 = vpop.permute.xlu1 %3647 }
 0x673   :  { %v3851_v59 = vmul.f32 %v4660_v6, %v7659_v16  ;;  %v4164_v58 = vmul.f32 %v8745_v1, %v7659_v16  ;;  %v4149_v16 = vmul.f32 %v8747_v33, %v7653_v19  ;;  %v3852_v19 = vmul.f32 %v4665_v51, %v7657_v26  ;;  %v4668_v1 = vld [vmem:[#allocation2 + $0x348] sm:$0xff]  ;;  %v8758_v51 = vld [vmem:[#allocation67_spill] sm:$0xff] }
 0x674   :  { %v4165_v42 = vmul.f32 %v8750_v7, %v7657_v26  ;;  %v3988_v31 = vadd.f32 %v3987_v46, %v3836_v3  ;;  %v8752_v26 = vld [vmem:[#allocation79_spill] sm:$0xff]  ;;  %v4671_v3 = vld [vmem:[#allocation2 + $0x3c8] sm:$0xff] }
 0x675   :  { %v4008_v17 = vadd.f32 %v4007_v13, %v3851_v59  ;;  %v4321_v2 = vadd.f32 %v4320_v21, %v4164_v58 }
 0x676   :  { %v7661_v56 = vpop.permute.xlu0 %3718  ;;  %v7663_v29 = vpop.permute.xlu1 %3714 }
 0x677   :  { %v3867_v60 = vmul.f32 %v4663_v22, %v7663_v29  ;;  %v4180_v0 = vmul.f32 %v8748_v32, %v7663_v29  ;;  %v4301_v29 = vadd.f32 %v4300_v11, %v4149_v16  ;;  %v3868_v62 = vmul.f32 %v4666_v47, %v7661_v56  ;;  %v8755_v11 = vld [vmem:[#allocation123_spill] sm:$0xff] }
 0x678   :  { %v4181_v20 = vmul.f32 %v8751_v53, %v7661_v56  ;;  %v4009_v8 = vadd.f32 %v4008_v17, %v3852_v19  ;;  %v4322_v24 = vadd.f32 %v4321_v2, %v4165_v42  ;;  %v4669_v56 = vld [vmem:[#allocation2 + $0x2d0] sm:$0xff]  ;;  %v8757_v17 = vld [vmem:[#allocation53_spill] sm:$0xff] }
 0x679   :  { %v4029_v57 = vadd.f32 %v4028_v61, %v3867_v60  ;;  %v4342_v12 = vadd.f32 %v4341_v18, %v4180_v0  ;;  %v4672_v0 = vld [vmem:[#allocation2 + $0x260] sm:$0xff]  ;;  %v4673_v18 = vld [vmem:[#allocation2 + $0x350] sm:$0xff] }
 0x67a   :  { %v7667_v39 = vpop.permute.xlu0 %3592  ;;  %v7669_v44 = vpop.permute.xlu1 %3588 }
 0x67b   :  { %v3837_v4 = vmul.f32 %v4664_v38, %v7669_v44  ;;  %v4150_v34 = vmul.f32 %v8749_v9, %v7669_v44  ;;  %v3838_v28 = vmul.f32 %v4669_v56, %v7667_v39  ;;  %v4151_v25 = vmul.f32 %v8754_v35, %v7667_v39 }
 0x67c   :  { %v4343_v49 = vadd.f32 %v4342_v12, %v4181_v20  ;;  %v4675_v20 = vld [vmem:[#allocation2 + $0x3d0] sm:$0xff]  ;;  %v8760_v12 = vld [vmem:[#allocation54_spill] sm:$0xff] }
 0x67d   :  { %v3989_v14 = vadd.f32 %v3988_v31, %v3837_v4  ;;  %v4302_v52 = vadd.f32 %v4301_v29, %v4150_v34  ;;  %v4674_v29 = vld [vmem:[#allocation2 + $0x2e0] sm:$0xff] }
 0x67e   :  { %v7673_v30 = vpop.permute.xlu0 %3529  ;;  %v7677_v10 = vpop.permute.xlu1 %3655 }
 0x67f   :  { %v3823_v6 = vmul.f32 %v4667_v41, %v7673_v30  ;;  %v4136_v59 = vmul.f32 %v8752_v26, %v7673_v30  ;;  %v3853_v58 = vmul.f32 %v4668_v1, %v7677_v10  ;;  %v4166_v48 = vmul.f32 %v8753_v27, %v7677_v10  ;;  %v8756_v10 = vld [vmem:[#allocation80_spill] sm:$0xff]  ;;  %v8762_v26 = vld [vmem:[#allocation95_spill] sm:$0xff] }
 0x680   :  { %v4030_v30 = vadd.f32 %v4029_v57, %v3868_v62  ;;  %v3990_v60 = vadd.f32 %v3989_v14, %v3838_v28  ;;  %v4303_v32 = vadd.f32 %v4302_v52, %v4151_v25  ;;  %v4676_v52 = vld [vmem:[#allocation2 + $0x268] sm:$0xff]  ;;  %v4677_v41 = vld [vmem:[#allocation2 + $0x358] sm:$0xff] }
 0x681   :  { %v4283_v38 = vadd.f32 %v7638_v43, %v4136_v59  ;;  %v4010_v4 = vadd.f32 %v4009_v8, %v3853_v58  ;;  %v4323_v9 = vadd.f32 %v4322_v24, %v4166_v48  ;;  %v8761_v8 = vld [vmem:[#allocation125_spill] sm:$0xff]  ;;  %v8763_v48 = vld [vmem:[#allocation68_spill] sm:$0xff] }
 0x682   :  { %v7682_v36 = vpop.permute.xlu0 %3596  ;;  %v7685_v63 = vpop.permute.xlu1 %3722 }
 0x683   :  { %v3839_v46 = vmul.f32 %v4670_v37, %v7682_v36  ;;  %v4152_v13 = vmul.f32 %v8755_v11, %v7682_v36  ;;  %v3869_v33 = vmul.f32 %v4671_v3, %v7685_v63  ;;  %v4182_v16 = vmul.f32 %v8756_v10, %v7685_v63  ;;  %v4679_v37 = vld [vmem:[#allocation2 + $0x270] sm:$0xff] }
 0x684   :  { %v3970_v36 = vadd.f32 %v7636_v5, %v3823_v6  ;;  %v8759_v5 = vld [vmem:[#allocation126_spill] sm:$0xff] }
 0x685   :  { %v3991_v34 = vadd.f32 %v3990_v60, %v3839_v46  ;;  %v4304_v61 = vadd.f32 %v4303_v32, %v4152_v13  ;;  %v4031_v42 = vadd.f32 %v4030_v30, %v3869_v33  ;;  %v4344_v31 = vadd.f32 %v4343_v49, %v4182_v16  ;;  %v4680_v49 = vld [vmem:[#allocation2 + $0x3d8] sm:$0xff] }
 0x686   :  { %v7696_v55 = vpop.permute.xlu0 %3533  ;;  %v7701_v54 = vpop.permute.xlu1 %3659  ;;  %v8765_v33 = vld [vmem:[#allocation128_spill] sm:$0xff] }
 0x687   :  { %v3824_v39 = vmul.f32 %v4672_v0, %v7696_v55  ;;  %v4137_v2 = vmul.f32 %v8757_v17, %v7696_v55  ;;  %v3854_v63 = vmul.f32 %v4673_v18, %v7701_v54  ;;  %v4167_v19 = vmul.f32 %v8758_v51, %v7701_v54  ;;  %v8767_v18 = vld [vmem:[#allocation129_spill] sm:$0xff] }
 0x689   :  { %v3971_v62 = vadd.f32 %v3970_v36, %v3824_v39  ;;  %v4284_v53 = vadd.f32 %v4283_v38, %v4137_v2  ;;  %v4011_v1 = vadd.f32 %v4010_v4, %v3854_v63  ;;  %v4324_v58 = vadd.f32 %v4323_v9, %v4167_v19  ;;  %v4681_v39 = vld [vmem:[#allocation2 + $0x2f0] sm:$0xff] }
 0x68a   :  { %v7709_v50 = vpop.permute.xlu0 %3600  ;;  %v7717_v23 = vpop.permute.xlu1 %3726  ;;  %v8766_v2 = vld [vmem:[#allocation55_spill] sm:$0xff] }
 0x68b   :  { %v3840_v55 = vmul.f32 %v4674_v29, %v7709_v50  ;;  %v4153_v47 = vmul.f32 %v8759_v5, %v7709_v50  ;;  %v3870_v57 = vmul.f32 %v4675_v20, %v7717_v23  ;;  %v4183_v14 = vmul.f32 %v8760_v12, %v7717_v23  ;;  %v4678_v50 = vld [vmem:[#allocation2 + $0x2e8] sm:$0xff]  ;;  %v8764_v23 = vld [vmem:[#allocation127_spill] sm:$0xff] }
 0x68d   :  { %v3992_v35 = vadd.f32 %v3991_v34, %v3840_v55  ;;  %v4305_v25 = vadd.f32 %v4304_v61, %v4153_v47  ;;  %v4032_v30 = vadd.f32 %v4031_v42, %v3870_v57  ;;  %v4682_v34 = vld [vmem:[#allocation2 + $0x278] sm:$0xff]  ;;  %v4684_v55 = vld [vmem:[#allocation2 + $0x3e0] sm:$0xff] }
 0x68e   :  { %v3538_v40 = vpop.permute.xlu0 %3537  ;;  %v3664_v44 = vpop.permute.xlu1 %3663  ;;  %v8769_v47 = vld [vmem:[#allocation69_spill] sm:$0xff] }
 0x68f   :  { %v3825_v54 = vmul.f32 %v4676_v52, %v3538_v40  ;;  %v4138_v24 = vmul.f32 %v8761_v8, %v3538_v40  ;;  %v3855_v6 = vmul.f32 %v4677_v41, %v3664_v44  ;;  %v4168_v59 = vmul.f32 %v8762_v26, %v3664_v44  ;;  %v4686_v26 = vld [vmem:[#allocation2 + $0x2f8] sm:$0xff] }
 0x690   :  { %v4345_v40 = vadd.f32 %v4344_v31, %v4183_v14  ;;  %v8768_v31 = vld [vmem:[#allocation81_spill] sm:$0xff]  ;;  %v4685_v14 = vld [vmem:[#allocation2 + $0x368] sm:$0xff] }
 0x691   :  { %v3972_v10 = vadd.f32 %v3971_v62, %v3825_v54  ;;  %v4285_v16 = vadd.f32 %v4284_v53, %v4138_v24  ;;  %v4012_v60 = vadd.f32 %v4011_v1, %v3855_v6  ;;  %v4325_v32 = vadd.f32 %v4324_v58, %v4168_v59  ;;  %v8770_v54 = vld [vmem:[#allocation130_spill] sm:$0xff] }
 0x692   :  { %v3605_v21 = vpop.permute.xlu0 %3604  ;;  %v3731_v22 = vpop.permute.xlu1 %3730  ;;  %v8771_v1 = vld [vmem:[#allocation82_spill] sm:$0xff] }
 0x693   :  { %v3841_v27 = vmul.f32 %v4678_v50, %v3605_v21  ;;  %v4154_v56 = vmul.f32 %v8763_v48, %v3605_v21  ;;  %v3871_v3 = vmul.f32 %v4680_v49, %v3731_v22  ;;  %v4184_v44 = vmul.f32 %v8765_v33, %v3731_v22  ;;  %v4687_v48 = vld [vmem:[#allocation2 + $0x3e8] sm:$0xff] }
 0x695   :  { %v3993_v0 = vadd.f32 %v3992_v35, %v3841_v27  ;;  %v4306_v21 = vadd.f32 %v4305_v25, %v4154_v56  ;;  %v4033_v19 = vadd.f32 %v4032_v30, %v3871_v3  ;;  %v4346_v22 = vadd.f32 %v4345_v40, %v4184_v44 }
 0x696   :  { %v3542_v7 = vpop.permute.xlu0 %3541  ;;  %v3668_v43 = vpop.permute.xlu1 %3667 }
 0x697   :  { %v3826_v46 = vmul.f32 %v4679_v37, %v3542_v7  ;;  %v4139_v11 = vmul.f32 %v8764_v23, %v3542_v7  ;;  %v4683_v7 = vld [vmem:[#allocation2 + $0x360] sm:$0xff]  ;;  %v4169_v29 = vmul.f32 %v8768_v31, %v3668_v43 }
 0x698   :  { %v3856_v42 = vmul.f32 %v4683_v7, %v3668_v43 }
 0x699   :  { %v3973_v4 = vadd.f32 %v3972_v10, %v3826_v46  ;;  %v4286_v9 = vadd.f32 %v4285_v16, %v4139_v11  ;;  %v4326_v27 = vadd.f32 %v4325_v32, %v4169_v29 }
 0x69a   :  { %v3609_v28 = vpop.permute.xlu0 %3608  ;;  %v3735_v13 = vpop.permute.xlu1 %3734  ;;  %v4013_v50 = vadd.f32 %v4012_v60, %v3856_v42 }
 0x69b   :  { %v3842_v17 = vmul.f32 %v4681_v39, %v3609_v28  ;;  %v4155_v36 = vmul.f32 %v8766_v2, %v3609_v28  ;;  %v3872_v5 = vmul.f32 %v4684_v55, %v3735_v13  ;;  %v4185_v62 = vmul.f32 %v8769_v47, %v3735_v13  ;;  %v8772_v28 = vld [vmem:[#allocation133_spill] sm:$0xff]  ;;  %v8773_v39 = vld [vmem:[#allocation132_spill] sm:$0xff] }
 0x69d   :  { %v3994_v57 = vadd.f32 %v3993_v0, %v3842_v17  ;;  %v4307_v12 = vadd.f32 %v4306_v21, %v4155_v36  ;;  %v4034_v11 = vadd.f32 %v4033_v19, %v3872_v5  ;;  %v4347_v13 = vadd.f32 %v4346_v22, %v4185_v62  ;;  %v4688_v0 = vld [vmem:[#allocation2 + $0x370] sm:$0xff]  ;;  %v8775_v62 = vld [vmem:[#allocation56_spill] sm:$0xff] }
 0x69e   :  { %v3546_v38 = vpop.permute.xlu0 %3545  ;;  %v3672_v51 = vpop.permute.xlu1 %3671  ;;  %v4690_v5 = vld [vmem:[#allocation2 + $0x3f0] sm:$0xff] }
 0x69f   :  { %v3827_v61 = vmul.f32 %v4682_v34, %v3546_v38  ;;  %v4140_v63 = vmul.f32 %v8767_v18, %v3546_v38  ;;  %v3857_v52 = vmul.f32 %v4685_v14, %v3672_v51  ;;  %v4170_v8 = vmul.f32 %v8770_v54, %v3672_v51 }
 0x6a1   :  { %v3974_v53 = vadd.f32 %v3973_v4, %v3827_v61  ;;  %v4287_v20 = vadd.f32 %v4286_v9, %v4140_v63  ;;  %v4014_v30 = vadd.f32 %v4013_v50, %v3857_v52  ;;  %v4327_v40 = vadd.f32 %v4326_v27, %v4170_v8  ;;  %v4689_v9 = vld [vmem:[#allocation2 + $0x378] sm:$0xff]  ;;  %v8774_v61 = vld [vmem:[#allocation97_spill] sm:$0xff] }
 0x6a2   :  { %v3613_v24 = vpop.permute.xlu0 %3612  ;;  %v3739_v43 = vpop.permute.xlu1 %3738  ;;  %v4691_v50 = vld [vmem:[#allocation2 + $0x3f8] sm:$0xff] }
 0x6a3   :  { %v3975_v41 = vrot.slane %v3974_v53, 4  ;;  %v4288_v6 = vrot.slane %v4287_v20, 4  ;;  %v3843_v59 = vmul.f32 %v4686_v26, %v3613_v24  ;;  %v4156_v58 = vmul.f32 %v8771_v1, %v3613_v24 }
 0x6a4   :  { %v3873_v56 = vmul.f32 %v4687_v48, %v3739_v43  ;;  %v4186_v35 = vmul.f32 %v8772_v28, %v3739_v43  ;;  %v8776_v48 = vld [vmem:[#allocation134_spill] sm:$0xff] }
 0x6a5   :  { %v3976_v25 = vadd.f32 %v3975_v41, %v3974_v53  ;;  %v4289_v37 = vadd.f32 %v4288_v6, %v4287_v20  ;;  %v3995_v46 = vadd.f32 %v3994_v57, %v3843_v59  ;;  %v4308_v23 = vadd.f32 %v4307_v12, %v4156_v58 }
 0x6a6   :  { %v3680_v10 = vpop.permute.xlu0 %3679  ;;  %v3676_v16 = vpop.permute.xlu1 %3675  ;;  %v4035_v60 = vadd.f32 %v4034_v11, %v3873_v56  ;;  %v4348_v32 = vadd.f32 %v4347_v13, %v4186_v35 }
 0x6a7   :  { %v3977_v49 = vrot.slane %v3976_v25, 2  ;;  %v4290_v3 = vrot.slane %v4289_v37, 2  ;;  %v3996_v33 = vrot.slane %v3995_v46, 4  ;;  %v4309_v44 = vrot.slane %v4308_v23, 4 }
 0x6a8   :  { %v3858_v21 = vmul.f32 %v4688_v0, %v3676_v16  ;;  %v4171_v17 = vmul.f32 %v8773_v39, %v3676_v16  ;;  %v3859_v34 = vmul.f32 %v4689_v9, %v3680_v10  ;;  %v4172_v18 = vmul.f32 %v8774_v61, %v3680_v10 }
 0x6a9   :  { %v3978_v2 = vadd.f32 %v3977_v49, %v3976_v25  ;;  %v4291_v36 = vadd.f32 %v4290_v3, %v4289_v37  ;;  %v3997_v38 = vadd.f32 %v3996_v33, %v3995_v46  ;;  %v4310_v4 = vadd.f32 %v4309_v44, %v4308_v23 }
 0x6aa   :  { %v4015_v63 = vadd.f32 %v4014_v30, %v3858_v21  ;;  %v4328_v51 = vadd.f32 %v4327_v40, %v4171_v17  ;;  %v3743_v31 = vpop.permute.xlu1 %3742 }
 0x6ab   :  { %v3979_v19 = vrot.slane %v3978_v2, 1  ;;  %v4292_v22 = vrot.slane %v4291_v36, 1  ;;  %v3998_v7 = vrot.slane %v3997_v38, 2  ;;  %v4311_v42 = vrot.slane %v4310_v4, 2 }
 0x6ac   :  { %v4016_v29 = vadd.f32 %v4015_v63, %v3859_v34  ;;  %v4329_v55 = vadd.f32 %v4328_v51, %v4172_v18  ;;  %v3874_v47 = vmul.f32 %v4690_v5, %v3743_v31  ;;  %v4187_v53 = vmul.f32 %v8775_v62, %v3743_v31 }
 0x6ad   :  { %v3980_v20 = vadd.f32 %v3979_v19, %v3978_v2  ;;  %v4293_v57 = vadd.f32 %v4292_v22, %v4291_v36  ;;  %v3999_v12 = vadd.f32 %v3998_v7, %v3997_v38  ;;  %v4312_v14 = vadd.f32 %v4311_v42, %v4310_v4 }
 0x6ae   :  { %v4017_v52 = vrot.slane %v4016_v29, 4  ;;  %v4330_v54 = vrot.slane %v4329_v55, 4  ;;  %v4036_v8 = vadd.f32 %v4035_v60, %v3874_v47  ;;  %v4349_v24 = vadd.f32 %v4348_v32, %v4187_v53  ;;  %v3747_v26 = vpop.permute.xlu1 %3746 }
 0x6af   :  { %v4000_v41 = vrot.slane %v3999_v12, 1  ;;  %v4313_v6 = vrot.slane %v4312_v14, 1  ;;  %v4368_v59 = vsel %vm3193_vm14, %v4293_v57, %v7625_v15  ;;  %v4055_v1 = vsel %vm3193_vm14, %v3980_v20, %v7629_v45 }
 0x6b0   :  { %v4018_v58 = vadd.f32 %v4017_v52, %v4016_v29  ;;  %v4331_v43 = vadd.f32 %v4330_v54, %v4329_v55  ;;  %v3875_v27 = vmul.f32 %v4691_v50, %v3747_v26  ;;  %v4188_v56 = vmul.f32 %v8776_v48, %v3747_v26 }
 0x6b1   :  { %v4001_v28 = vadd.f32 %v4000_v41, %v3999_v12  ;;  %v4314_v35 = vadd.f32 %v4313_v6, %v4312_v14 }
 0x6b2   :  { %v4019_v25 = vrot.slane %v4018_v58, 2  ;;  %v4332_v37 = vrot.slane %v4331_v43, 2  ;;  %v4037_v46 = vadd.f32 %v4036_v8, %v3875_v27  ;;  %v4350_v23 = vadd.f32 %v4349_v24, %v4188_v56 }
 0x6b3   :  { %v4369_v11 = vsel %vm3195_vm3, %v4314_v35, %v4368_v59  ;;  %v4056_v13 = vsel %vm3195_vm3, %v4001_v28, %v4055_v1 }
 0x6b4   :  { %v4020_v15 = vadd.f32 %v4019_v25, %v4018_v58  ;;  %v4333_v30 = vadd.f32 %v4332_v37, %v4331_v43  ;;  %v4038_v40 = vrot.slane %v4037_v46, 4  ;;  %v4351_v45 = vrot.slane %v4350_v23, 4 }
 0x6b6   :  { %v4039_v49 = vadd.f32 %v4038_v40, %v4037_v46  ;;  %v4352_v3 = vadd.f32 %v4351_v45, %v4350_v23  ;;  %v4334_v33 = vrot.slane %v4333_v30, 1  ;;  %v4021_v44 = vrot.slane %v4020_v15, 1 }
 0x6b8   :  { %v4040_v10 = vrot.slane %v4039_v49, 2  ;;  %v4353_v16 = vrot.slane %v4352_v3, 2  ;;  %v4335_v60 = vadd.f32 %v4334_v33, %v4333_v30  ;;  %v4022_v32 = vadd.f32 %v4021_v44, %v4020_v15 }
 0x6ba   :  { %v4041_v0 = vadd.f32 %v4040_v10, %v4039_v49  ;;  %v4354_v21 = vadd.f32 %v4353_v16, %v4352_v3  ;;  %v4370_v39 = vsel %vm3197_vm11, %v4335_v60, %v4369_v11  ;;  %v4057_v17 = vsel %vm3197_vm11, %v4022_v32, %v4056_v13 }
 0x6bc   :  { %v4042_v2 = vrot.slane %v4041_v0, 1  ;;  %v4355_v36 = vrot.slane %v4354_v21, 1 }
 0x6be   :  { %v4356_v38 = vadd.f32 %v4355_v36, %v4354_v21  ;;  %v4043_v4 = vadd.f32 %v4042_v2, %v4041_v0 }
 0x6c0   :  { %v4371_v9 = vsel %vm3199_vm0, %v4356_v38, %v4370_v39  ;;  %v4058_v34 = vsel %vm3199_vm0, %v4043_v4, %v4057_v17 }
 0x6c1   :  { %4373 = vst [vmem:[#allocation11] sm:$0xff] %v4371_v9  ;;  %4060 = vst [vmem:[#allocation10] sm:$0xff] %v4058_v34 }
 0x6c2   :  { %4791 = shalt.err (!%p4788_p8)
}
 0x6c3   :  { %s4792_s11 = scalar_lea.hbm %s7839_s6, 128 }
 0x6c4   :  { %p4793_p9 = scmp.ne.s32.totalorder %s7839_s6, %s4792_s11  ;;  %p4796_p10 = scmp.lt.u32.totalorder %s4792_s11, %s7839_s6 }
 0x6c6   :  { %p4798_p11 = pnand %p4796_p10, %p4793_p9 }
 0x6c8   :  { %4801 = shalt.err (!%p4798_p11)
}
 0x6c9   :  { %4394 = dma.vmem_to_hbm [thread:$0]  %s4392_s25, 128, %s7839_s6, [#allocation12]  }
 0x6ca   :  { %s4802_s16 = scalar_lea.vmem %s7783_s28, 128  ;;  %p4807_p13 = scmp.lt.s32.totalorder %s7783_s28, %s7783_s28 }
 0x6cb   :  { %p4803_p12 = scmp.ne.s32.totalorder %s7783_s28, %s4802_s16  ;;  %p4808_p0 = scmp.lt.s32.totalorder %s4802_s16, %s4802_s16 }
 0x6cd   :  { %p4809_p1 = por %p4808_p0, %p4807_p13 }
 0x6cf   :  { %p4810_p2 = pnand %p4809_p1, %p4803_p12 }
 0x6d1   :  { %4813 = shalt.err (!%p4810_p2)
}
 0x6d2   :  { %s4814_s19 = scalar_lea.hbm %s7838_s5, 128 }
 0x6d3   :  { %p4815_p3 = scmp.ne.s32.totalorder %s7838_s5, %s4814_s19  ;;  %p4818_p4 = scmp.lt.u32.totalorder %s4814_s19, %s7838_s5 }
 0x6d5   :  { %p4820_p5 = pnand %p4818_p4, %p4815_p3 }
 0x6d7   :  { %4823 = shalt.err (!%p4820_p5)
}
 0x6d8   :  { %4384 = dma.vmem_to_hbm [thread:$0]  %s7783_s28, 128, %s7838_s5, [#allocation4]  }
 0x6d9   :  { %s4824_s23 = scalar_lea.vmem %s7785_s30, 128  ;;  %p4829_p7 = scmp.lt.s32.totalorder %s7785_s30, %s7785_s30 }
 0x6da   :  { %p4825_p6 = scmp.ne.s32.totalorder %s7785_s30, %s4824_s23  ;;  %p4830_p8 = scmp.lt.s32.totalorder %s4824_s23, %s4824_s23 }
 0x6dc   :  { %p4831_p9 = por %p4830_p8, %p4829_p7 }
 0x6de   :  { %p4832_p10 = pnand %p4831_p9, %p4825_p6 }
 0x6e0   :  { %4835 = shalt.err (!%p4832_p10)
}
 0x6e1   :  { %s4836_s3 = scalar_lea.hbm %s7840_s7, 128 }
 0x6e2   :  { %p4837_p11 = scmp.ne.s32.totalorder %s7840_s7, %s4836_s3  ;;  %p4840_p12 = scmp.lt.u32.totalorder %s4836_s3, %s7840_s7 }
 0x6e4   :  { %p4842_p13 = pnand %p4840_p12, %p4837_p11 }
 0x6e6   :  { %4845 = shalt.err (!%p4842_p13)
}
 0x6e7   :  { %4404 = dma.vmem_to_hbm [thread:$0]  %s7785_s30, 128, %s7840_s7, [#allocation12]  }
 0x6e8   :  { %4852 = dma.done.wait [#allocation4], 128  }
 0x6e9   :  { %4853 = vsyncadd [#allocation4], 4294967168 }
 0x6ea   :  { %4854 = dma.done.wait [#allocation12], 256  }
 0x6eb   :  { %4855 = vsyncadd [#allocation12], 4294967040 }
 0x6ec   :  { %4414 = vsyncpa [#allocation3], 1 }
 0x6ed   :  { %4415 = vsyncpa [#allocation6], 1 }
 0x6ee   :  { %4416 = vsyncpa [#allocation9], 1 }
 0x6ef   :  { %4417 = vsyncpa [#allocation4], 1 }
 0x6f0   :  { %4418 = vsyncpa [#allocation12], 1 }

</bundles_post_ra>
